<compile_context>
chip_gen: v7x
topology: tpu7x:2x2x1
jax: 0.10.0
libtpu: 0.0.40
codegen_flags: <defaults>
</compile_context>

<pallas_src>
import functools
import math

import jax
import jax.numpy as jnp
from jax.experimental import pallas as pl
from jax.experimental.pallas import tpu as pltpu


def _layer_norm(x, gamma, beta, eps):
    # f32 statistics; rsqrt goes to the EUP (its own bundle slot).
    mean = jnp.mean(x, axis=-1, keepdims=True)
    xc = x - mean
    var = jnp.mean(xc * xc, axis=-1, keepdims=True)
    return xc * jax.lax.rsqrt(var + eps) * gamma + beta


def _encoder_block_kernel(q_ref, k_ref, v_ref, mask_ref,
                          wq_ref, bq_ref, wk_ref, bk_ref, wv_ref, bv_ref,
                          wo_ref, bo_ref, w1_ref, b1_ref, w2_ref, b2_ref,
                          gamma_ref, beta_ref,
                          out_ref,
                          kp_ref, vp_ref,
                          *, num_heads, eps):
    q_in = q_ref[0]          # (block_q, D)  input dtype (f32 or bf16)
    mask = mask_ref[0]       # (block_q, S)  f32 (nonzero keep / 0 mask)

    dt = q_in.dtype          # MXU operand dtype
    d_model = q_in.shape[-1]
    d_head = d_model // num_heads
    scale = 1.0 / math.sqrt(d_head)

    # ---- K/V projections: once per batch element (q-tile axis is innermost
    # and "arbitrary", so program_id(1) == 0 marks a new batch element). ----
    @pl.when(pl.program_id(1) == 0)
    def _():
        kp = (jnp.dot(k_ref[0], wk_ref[...], preferred_element_type=jnp.float32)
              + bk_ref[...].astype(jnp.float32))
        vp = (jnp.dot(v_ref[0], wv_ref[...], preferred_element_type=jnp.float32)
              + bv_ref[...].astype(jnp.float32))
        kp_ref[...] = kp.astype(kp_ref.dtype)
        vp_ref[...] = vp.astype(vp_ref.dtype)

    # Additive mask built ONCE per grid step (shared by all heads, f32).
    # score + (-10000) is numerically equivalent to masked_fill(-10000) after
    # softmax (both underflow to 0 probability).
    neg_mask = jnp.where(mask == 0.0, -10000.0, 0.0).astype(jnp.float32)

    # ---- Q projection for this query tile (f32 accumulation). -------------
    qp = (jnp.dot(q_in, wq_ref[...], preferred_element_type=jnp.float32)
          + bq_ref[...].astype(jnp.float32)).astype(dt)

    kp = kp_ref[...]          # (S, D) dt
    vp = vp_ref[...]          # (S, D) dt

    # ---- Per-head attention; assemble full-width context in registers. ----
    ctx_parts = []
    for h in range(num_heads):            # static loop, static lane slices
        lo = h * d_head
        qh = qp[:, lo:lo + d_head]         # (block_q, dh)
        kh = kp[:, lo:lo + d_head]         # (S, dh)
        vh = vp[:, lo:lo + d_head]         # (S, dh)
        # Contract last dims directly -> no kh.T transpose through the XLU.
        s = jax.lax.dot_general(qh, kh, (((1,), (1,)), ((), ())),
                                preferred_element_type=jnp.float32)  # (bq, S)
        s = s * scale + neg_mask           # scale f32 scores (not pre-cast Q)
        s = s - jnp.max(s, axis=-1, keepdims=True)
        p = jnp.exp(s)
        p = p / jnp.sum(p, axis=-1, keepdims=True)   # exact division (f32)
        ctx_parts.append(jnp.dot(p.astype(dt), vh,
                                 preferred_element_type=jnp.float32))
    ctx = jnp.concatenate(ctx_parts, axis=-1)        # (block_q, D) lane-dense

    gamma = gamma_ref[...].astype(jnp.float32)
    beta = beta_ref[...].astype(jnp.float32)

    attn = (jnp.dot(ctx.astype(dt), wo_ref[...],
                    preferred_element_type=jnp.float32)
            + bo_ref[...].astype(jnp.float32))

    # Dropout is identity in eval mode.
    x1 = _layer_norm(attn + q_in.astype(jnp.float32), gamma, beta, eps)

    # ---- Position-wise feed-forward ---------------------------------------
    h1 = (jnp.dot(x1.astype(dt), w1_ref[...],
                  preferred_element_type=jnp.float32)
          + b1_ref[...].astype(jnp.float32))
    h1 = jnp.maximum(h1, 0.0)              # ReLU (+dropout = identity)
    ffn = (jnp.dot(h1.astype(dt), w2_ref[...],
                   preferred_element_type=jnp.float32)
           + b2_ref[...].astype(jnp.float32))

    x2 = _layer_norm(ffn + x1, gamma, beta, eps)
    out_ref[0] = x2.astype(out_ref.dtype)


def encoder_block(q, k, v, mask, params, *, num_heads, eps=1e-12,
                  block_q=None, single_buffer_weights=True):
    """q, k, v: (B, S, D); mask: (B, S, S) (nonzero keep / 0 mask)."""
    B, S, D = q.shape
    hidden = params["w1"].shape[-1]
    if block_q is None:
        block_q = min(S, 256)              # >=256 M keeps the 256-wide MXU fed
    assert S % block_q == 0 and D % num_heads == 0

    kernel = functools.partial(_encoder_block_kernel,
                               num_heads=num_heads, eps=eps)

    q_spec = pl.BlockSpec((1, block_q, D), lambda b, i: (b, i, 0))
    kv_spec = pl.BlockSpec((1, S, D), lambda b, i: (b, 0, 0))       # full keys
    mask_spec = pl.BlockSpec((1, block_q, S), lambda b, i: (b, i, 0))

    def const_spec(shape, single_buf):
        idx_map = lambda b, i: tuple(0 for _ in shape)
        if single_buf:
            try:
                # Constant block index -> double buffering is pure VMEM waste.
                return pl.BlockSpec(shape, idx_map,
                                    pipeline_mode=pl.Buffered(1))
            except Exception:   # older JAX without pipeline_mode / Buffered
                pass
        return pl.BlockSpec(shape, idx_map)

    def build(single_buf):
        full = lambda shape: const_spec(shape, single_buf)
        in_specs = [
            q_spec, kv_spec, kv_spec, mask_spec,
            full((D, D)), full((1, D)),            # Wq, bq
            full((D, D)), full((1, D)),            # Wk, bk
            full((D, D)), full((1, D)),            # Wv, bv
            full((D, D)), full((1, D)),            # Wo, bo
            full((D, hidden)), full((1, hidden)),  # W1, b1
            full((hidden, D)), full((1, D)),       # W2, b2
            full((1, D)), full((1, D)),            # gamma, beta
        ]

        # ---- VMEM budget (no double counting): weights (single- or double-
        # buffered), double-buffered streaming blocks, persistent K/V scratch,
        # and rough f32 intermediates, plus headroom for compiler scratch.
        act_isz = jnp.dtype(q.dtype).itemsize
        w_isz = jnp.dtype(params["wq"].dtype).itemsize
        mask_isz = jnp.dtype(mask.dtype).itemsize
        w_buf = 1 if single_buf else 2
        weight_bytes = w_buf * (4 * D * D + 2 * D * hidden + 6 * D + hidden) * w_isz
        stream_bytes = 2 * (2 * block_q * D * act_isz + block_q * S * mask_isz)
        kv_in_bytes = 2 * (2 * S * D * act_isz)
        scratch_bytes = 2 * S * D * act_isz
        inter_bytes = 4 * (2 * block_q * S + block_q * hidden
                           + 6 * block_q * D + S * D)
        est = (weight_bytes + stream_bytes + kv_in_bytes + scratch_bytes
               + inter_bytes + (4 << 20))

        try:
            cap = int(pltpu.get_tpu_info().vmem_capacity_bytes)
        except Exception:
            cap = 64 * 1024 * 1024          # conservative (v7x-sized) default
        # 0.8 * capacity: ~102 MiB scoped on v5e/v6e, ~51 MiB on v7x.
        vmem_limit = int(min(max(est, 32 * 1024 * 1024), int(0.8 * cap)))

        return pl.pallas_call(
            kernel,
            out_shape=jax.ShapeDtypeStruct((B, S, D), q.dtype),
            grid_spec=pltpu.PrefetchScalarGridSpec(
                num_scalar_prefetch=0,
                grid=(B, S // block_q),
                in_specs=in_specs,
                out_specs=q_spec,
                scratch_shapes=[pltpu.VMEM((S, D), q.dtype),   # K projection
                                pltpu.VMEM((S, D), q.dtype)],  # V projection
            ),
            compiler_params=pltpu.CompilerParams(
                # q-tile axis carries the persistent K/V scratch -> arbitrary.
                dimension_semantics=("parallel", "arbitrary"),
                vmem_limit_bytes=vmem_limit),
        )

    args = (q, k, v, mask,
            params["wq"], params["bq"], params["wk"], params["bk"],
            params["wv"], params["bv"], params["wo"], params["bo"],
            params["w1"], params["b1"], params["w2"], params["b2"],
            params["gamma"], params["beta"])

    if single_buffer_weights:
        try:
            return build(True)(*args)
        except Exception:
            pass   # version-compat fallback: default double-buffered weights
    return build(False)(*args)


def encoder_block_ref(q, k, v, mask, params, *, num_heads, eps=1e-12):
    """Pure-JAX reference mirroring the PyTorch EncoderBlock (eval mode)."""
    B, S, D = q.shape
    dh = D // num_heads

    def ln(x):
        mean = jnp.mean(x, axis=-1, keepdims=True)
        var = jnp.mean((x - mean) ** 2, axis=-1, keepdims=True)
        return (x - mean) / jnp.sqrt(var + eps) * params["gamma"] + params["beta"]

    qp = q @ params["wq"] + params["bq"]
    kp = k @ params["wk"] + params["bk"]
    vp = v @ params["wv"] + params["bv"]

    def split(x):  # (B,S,D) -> (B,H,S,dh)
        return x.reshape(B, S, num_heads, dh).transpose(0, 2, 1, 3)

    qh, kh, vh = split(qp), split(kp), split(vp)
    scores = jnp.einsum("bhqd,bhkd->bhqk", qh, kh) / math.sqrt(dh)
    scores = jnp.where(mask[:, None, :, :] == 0.0, -10000.0, scores)
    p = jax.nn.softmax(scores, axis=-1)
    ctx = jnp.einsum("bhqk,bhkd->bhqd", p, vh)
    ctx = ctx.transpose(0, 2, 1, 3).reshape(B, S, D)
    attn_out = ctx @ params["wo"] + params["bo"]

    x1 = ln(attn_out + q)
    h1 = jnp.maximum(x1 @ params["w1"] + params["b1"], 0.0)
    ffn_out = h1 @ params["w2"] + params["b2"]
    return ln(ffn_out + x1)


def init_params(key, d_model, hidden):
    ks = jax.random.split(key, 8)
    scale_d = 1.0 / math.sqrt(d_model)
    scale_h = 1.0 / math.sqrt(hidden)
    return {
        "wq": jax.random.normal(ks[0], (d_model, d_model), jnp.float32) * scale_d,
        "bq": jnp.zeros((1, d_model), jnp.float32),
        "wk": jax.random.normal(ks[1], (d_model, d_model), jnp.float32) * scale_d,
        "bk": jnp.zeros((1, d_model), jnp.float32),
        "wv": jax.random.normal(ks[2], (d_model, d_model), jnp.float32) * scale_d,
        "bv": jnp.zeros((1, d_model), jnp.float32),
        "wo": jax.random.normal(ks[3], (d_model, d_model), jnp.float32) * scale_d,
        "bo": jax.random.normal(ks[4], (1, d_model), jnp.float32) * 0.01,
        "w1": jax.random.normal(ks[5], (d_model, hidden), jnp.float32) * scale_d,
        "b1": jax.random.normal(ks[6], (1, hidden), jnp.float32) * 0.01,
        "w2": jax.random.normal(ks[7], (hidden, d_model), jnp.float32) * scale_h,
        "b2": jnp.zeros((1, d_model), jnp.float32),
        "gamma": jnp.ones((1, d_model), jnp.float32),
        "beta": jnp.zeros((1, d_model), jnp.float32),
    }


if __name__ == "__main__":
    B, S, D, H, HIDDEN = 2, 16, 32, 4, 64
    key = jax.random.PRNGKey(0)
    kq_, kk_, kv_, kp_ = jax.random.split(key, 4)

    q = jax.random.normal(kq_, (B, S, D), jnp.float32)
    k = jax.random.normal(kk_, (B, S, D), jnp.float32)
    v = jax.random.normal(kv_, (B, S, D), jnp.float32)

    # Padding-style mask: batch 0 attends to all 16 keys, batch 1 to first 11.
    lengths = jnp.array([16, 11], dtype=jnp.int32)
    key_ids = jnp.arange(S)[None, None, :]                    # (1, 1, S)
    mask = (key_ids < lengths[:, None, None]).astype(jnp.float32)
    mask = jnp.broadcast_to(mask, (B, S, S))                  # (B, S, S)

    params = init_params(kp_, D, HIDDEN)
    ref = encoder_block_ref(q, k, v, mask, params, num_heads=H)

    # f32 path: multiple query tiles exercise the once-per-batch K/V scratch.
    out = encoder_block(q, k, v, mask, params, num_heads=H, block_q=8)
    out = jax.block_until_ready(out)
    assert out.shape == (B, S, D)
    err = float(jnp.max(jnp.abs(out - ref)))
    assert err < 1e-2, f"f32 max abs err {err}"

    # bf16 fast path: bf16 MXU operands, f32 accumulation & statistics.
    q16, k16, v16 = (t.astype(jnp.bfloat16) for t in (q, k, v))
    params16 = {n: p.astype(jnp.bfloat16) for n, p in params.items()}
    out16 = encoder_block(q16, k16, v16, mask, params16, num_heads=H)
    out16 = jax.block_until_ready(out16)
    assert out16.shape == (B, S, D)
    err16 = float(jnp.max(jnp.abs(out16.astype(jnp.float32) - ref)))
    assert err16 < 0.3, f"bf16 max abs err {err16}"

    print("KERNEL_OK")
</pallas_src>

<mosaic_0001>
module attributes {stable_mosaic.version = 11 : i64} {
  func.func @_encoder_block_kernel(%arg0: i32, %arg1: i32, %arg2: memref<1x8x32xf32, #tpu.memory_space<vmem>>, %arg3: memref<1x16x32xf32, #tpu.memory_space<vmem>>, %arg4: memref<1x16x32xf32, #tpu.memory_space<vmem>>, %arg5: memref<1x8x16xf32, #tpu.memory_space<vmem>>, %arg6: memref<32x32xf32, #tpu.memory_space<vmem>>, %arg7: memref<1x32xf32, #tpu.memory_space<vmem>>, %arg8: memref<32x32xf32, #tpu.memory_space<vmem>>, %arg9: memref<1x32xf32, #tpu.memory_space<vmem>>, %arg10: memref<32x32xf32, #tpu.memory_space<vmem>>, %arg11: memref<1x32xf32, #tpu.memory_space<vmem>>, %arg12: memref<32x32xf32, #tpu.memory_space<vmem>>, %arg13: memref<1x32xf32, #tpu.memory_space<vmem>>, %arg14: memref<32x64xf32, #tpu.memory_space<vmem>>, %arg15: memref<1x64xf32, #tpu.memory_space<vmem>>, %arg16: memref<64x32xf32, #tpu.memory_space<vmem>>, %arg17: memref<1x32xf32, #tpu.memory_space<vmem>>, %arg18: memref<1x32xf32, #tpu.memory_space<vmem>>, %arg19: memref<1x32xf32, #tpu.memory_space<vmem>>, %arg20: memref<1x8x32xf32, #tpu.memory_space<vmem>>, %arg21: memref<16x32xf32, #tpu.memory_space<vmem>>, %arg22: memref<16x32xf32, #tpu.memory_space<vmem>>) attributes {dimension_semantics = [#tpu.dimension_semantics<parallel>, #tpu.dimension_semantics<arbitrary>], iteration_bounds = array<i64: 2, 2>, scalar_prefetch = 0 : i64, scratch_operands = 2 : i64, tpu.core_type = #tpu.core_type<tc>, window_params = [{transform_indices = @transform_0, window_bounds = array<i64: 1, 8, 32>}, {transform_indices = @transform_1, window_bounds = array<i64: 1, 16, 32>}, {transform_indices = @transform_2, window_bounds = array<i64: 1, 16, 32>}, {transform_indices = @transform_3, window_bounds = array<i64: 1, 8, 16>}, {pipeline_mode = #tpu.pipeline_mode<synchronous>, transform_indices = @transform_4, window_bounds = array<i64: 32, 32>}, {pipeline_mode = #tpu.pipeline_mode<synchronous>, transform_indices = @transform_5, window_bounds = array<i64: 1, 32>}, {pipeline_mode = #tpu.pipeline_mode<synchronous>, transform_indices = @transform_6, window_bounds = array<i64: 32, 32>}, {pipeline_mode = #tpu.pipeline_mode<synchronous>, transform_indices = @transform_7, window_bounds = array<i64: 1, 32>}, {pipeline_mode = #tpu.pipeline_mode<synchronous>, transform_indices = @transform_8, window_bounds = array<i64: 32, 32>}, {pipeline_mode = #tpu.pipeline_mode<synchronous>, transform_indices = @transform_9, window_bounds = array<i64: 1, 32>}, {pipeline_mode = #tpu.pipeline_mode<synchronous>, transform_indices = @transform_10, window_bounds = array<i64: 32, 32>}, {pipeline_mode = #tpu.pipeline_mode<synchronous>, transform_indices = @transform_11, window_bounds = array<i64: 1, 32>}, {pipeline_mode = #tpu.pipeline_mode<synchronous>, transform_indices = @transform_12, window_bounds = array<i64: 32, 64>}, {pipeline_mode = #tpu.pipeline_mode<synchronous>, transform_indices = @transform_13, window_bounds = array<i64: 1, 64>}, {pipeline_mode = #tpu.pipeline_mode<synchronous>, transform_indices = @transform_14, window_bounds = array<i64: 64, 32>}, {pipeline_mode = #tpu.pipeline_mode<synchronous>, transform_indices = @transform_15, window_bounds = array<i64: 1, 32>}, {pipeline_mode = #tpu.pipeline_mode<synchronous>, transform_indices = @transform_16, window_bounds = array<i64: 1, 32>}, {pipeline_mode = #tpu.pipeline_mode<synchronous>, transform_indices = @transform_17, window_bounds = array<i64: 1, 32>}, {transform_indices = @transform_18, window_bounds = array<i64: 1, 8, 32>}]} {
    %c0 = arith.constant 0 : index
    %c0_0 = arith.constant 0 : index
    %c0_1 = arith.constant 0 : index
    %0 = vector.load %arg2[%c0, %c0_0, %c0_1] : memref<1x8x32xf32, #tpu.memory_space<vmem>>, vector<1x8x32xf32>
    %1 = vector.shape_cast %0 : vector<1x8x32xf32> to vector<8x32xf32>
    %c0_2 = arith.constant 0 : index
    %c0_3 = arith.constant 0 : index
    %c0_4 = arith.constant 0 : index
    %2 = vector.load %arg5[%c0_2, %c0_3, %c0_4] : memref<1x8x16xf32, #tpu.memory_space<vmem>>, vector<1x8x16xf32>
    %3 = vector.shape_cast %2 : vector<1x8x16xf32> to vector<8x16xf32>
    %c0_i32 = arith.constant 0 : i32
    %4 = arith.cmpi eq, %arg1, %c0_i32 : i32
    %5 = arith.extui %4 : i1 to i32
    %c0_i32_5 = arith.constant 0 : i32
    %6 = arith.cmpi ne, %5, %c0_i32_5 : i32
    scf.if %6 {
      %c0_70 = arith.constant 0 : index
      %c0_71 = arith.constant 0 : index
      %c0_72 = arith.constant 0 : index
      %152 = vector.load %arg3[%c0_70, %c0_71, %c0_72] : memref<1x16x32xf32, #tpu.memory_space<vmem>>, vector<1x16x32xf32>
      %153 = vector.shape_cast %152 : vector<1x16x32xf32> to vector<16x32xf32>
      %c0_73 = arith.constant 0 : index
      %c0_74 = arith.constant 0 : index
      %154 = vector.load %arg8[%c0_73, %c0_74] : memref<32x32xf32, #tpu.memory_space<vmem>>, vector<32x32xf32>
      %cst_75 = arith.constant dense<0.000000e+00> : vector<16x32xf32>
      %155 = tpu.matmul %153, %154, %cst_75 {dimension_numbers = #tpu.dot_dimension_numbers<[1], [0], [0], [1], [0, 0, 1, 1], [], []>} : vector<16x32xf32>, vector<32x32xf32>, vector<16x32xf32> -> vector<16x32xf32>
      %c0_76 = arith.constant 0 : index
      %c0_77 = arith.constant 0 : index
      %156 = vector.load %arg9[%c0_76, %c0_77] : memref<1x32xf32, #tpu.memory_space<vmem>>, vector<1x32xf32>
      %157 = vector.broadcast %156 : vector<1x32xf32> to vector<16x32xf32>
      %158 = arith.addf %155, %157 : vector<16x32xf32>
      %c0_78 = arith.constant 0 : index
      %c0_79 = arith.constant 0 : index
      %c0_80 = arith.constant 0 : index
      %159 = vector.load %arg4[%c0_78, %c0_79, %c0_80] : memref<1x16x32xf32, #tpu.memory_space<vmem>>, vector<1x16x32xf32>
      %160 = vector.shape_cast %159 : vector<1x16x32xf32> to vector<16x32xf32>
      %c0_81 = arith.constant 0 : index
      %c0_82 = arith.constant 0 : index
      %161 = vector.load %arg10[%c0_81, %c0_82] : memref<32x32xf32, #tpu.memory_space<vmem>>, vector<32x32xf32>
      %cst_83 = arith.constant dense<0.000000e+00> : vector<16x32xf32>
      %162 = tpu.matmul %160, %161, %cst_83 {dimension_numbers = #tpu.dot_dimension_numbers<[1], [0], [0], [1], [0, 0, 1, 1], [], []>} : vector<16x32xf32>, vector<32x32xf32>, vector<16x32xf32> -> vector<16x32xf32>
      %c0_84 = arith.constant 0 : index
      %c0_85 = arith.constant 0 : index
      %163 = vector.load %arg11[%c0_84, %c0_85] : memref<1x32xf32, #tpu.memory_space<vmem>>, vector<1x32xf32>
      %164 = vector.broadcast %163 : vector<1x32xf32> to vector<16x32xf32>
      %165 = arith.addf %162, %164 : vector<16x32xf32>
      %c0_86 = arith.constant 0 : index
      %c0_87 = arith.constant 0 : index
      %166 = vector.load %arg21[%c0_86, %c0_87] : memref<16x32xf32, #tpu.memory_space<vmem>>, vector<16x32xf32>
      tpu.vector_store %arg21[%c0_86, %c0_87], %158 {strides = array<i32>} : memref<16x32xf32, #tpu.memory_space<vmem>>, vector<16x32xf32>,
      %c0_88 = arith.constant 0 : index
      %c0_89 = arith.constant 0 : index
      %167 = vector.load %arg22[%c0_88, %c0_89] : memref<16x32xf32, #tpu.memory_space<vmem>>, vector<16x32xf32>
      tpu.vector_store %arg22[%c0_88, %c0_89], %165 {strides = array<i32>} : memref<16x32xf32, #tpu.memory_space<vmem>>, vector<16x32xf32>,
    } else {
    }
    %cst = arith.constant 0.000000e+00 : f32
    %7 = vector.broadcast %cst : f32 to vector<8x16xf32>
    %8 = arith.cmpf oeq, %3, %7 : vector<8x16xf32>
    %cst_6 = arith.constant -1.000000e+04 : f32
    %cst_7 = arith.constant 0.000000e+00 : f32
    %9 = vector.broadcast %cst_6 : f32 to vector<8x16xf32>
    %10 = vector.broadcast %cst_7 : f32 to vector<8x16xf32>
    %11 = arith.select %8, %9, %10 : vector<8x16xi1>, vector<8x16xf32>
    %c0_8 = arith.constant 0 : index
    %c0_9 = arith.constant 0 : index
    %12 = vector.load %arg6[%c0_8, %c0_9] : memref<32x32xf32, #tpu.memory_space<vmem>>, vector<32x32xf32>
    %cst_10 = arith.constant dense<0.000000e+00> : vector<8x32xf32>
    %13 = tpu.matmul %1, %12, %cst_10 {dimension_numbers = #tpu.dot_dimension_numbers<[1], [0], [0], [1], [0, 0, 1, 1], [], []>} : vector<8x32xf32>, vector<32x32xf32>, vector<8x32xf32> -> vector<8x32xf32>
    %c0_11 = arith.constant 0 : index
    %c0_12 = arith.constant 0 : index
    %14 = vector.load %arg7[%c0_11, %c0_12] : memref<1x32xf32, #tpu.memory_space<vmem>>, vector<1x32xf32>
    %15 = vector.broadcast %14 : vector<1x32xf32> to vector<8x32xf32>
    %16 = arith.addf %13, %15 : vector<8x32xf32>
    %c0_13 = arith.constant 0 : index
    %c0_14 = arith.constant 0 : index
    %17 = vector.load %arg21[%c0_13, %c0_14] : memref<16x32xf32, #tpu.memory_space<vmem>>, vector<16x32xf32>
    %c0_15 = arith.constant 0 : index
    %c0_16 = arith.constant 0 : index
    %18 = vector.load %arg22[%c0_15, %c0_16] : memref<16x32xf32, #tpu.memory_space<vmem>>, vector<16x32xf32>
    %19 = vector.extract_strided_slice %16 {offsets = [0, 0], sizes = [8, 8], strides = [1, 1]} : vector<8x32xf32> to vector<8x8xf32>
    %20 = vector.extract_strided_slice %17 {offsets = [0, 0], sizes = [16, 8], strides = [1, 1]} : vector<16x32xf32> to vector<16x8xf32>
    %21 = vector.extract_strided_slice %18 {offsets = [0, 0], sizes = [16, 8], strides = [1, 1]} : vector<16x32xf32> to vector<16x8xf32>
    %cst_17 = arith.constant dense<0.000000e+00> : vector<8x16xf32>
    %22 = tpu.matmul %19, %20, %cst_17 {dimension_numbers = #tpu.dot_dimension_numbers<[1], [1], [0], [0], [0, 0, 1, 0], [], []>} : vector<8x8xf32>, vector<16x8xf32>, vector<8x16xf32> -> vector<8x16xf32>
    %cst_18 = arith.constant 0.353553385 : f32
    %23 = vector.broadcast %cst_18 : f32 to vector<8x16xf32>
    %24 = arith.mulf %22, %23 : vector<8x16xf32>
    %25 = arith.addf %24, %11 : vector<8x16xf32>
    %cst_19 = arith.constant dense<0xFF800000> : vector<8xf32>
    %26 = vector.multi_reduction <maximumf>, %25, %cst_19 [1] : vector<8x16xf32> to vector<8xf32>
    %27 = vector.shape_cast %26 : vector<8xf32> to vector<8x1xf32>
    %28 = vector.broadcast %27 : vector<8x1xf32> to vector<8x16xf32>
    %29 = arith.subf %25, %28 : vector<8x16xf32>
    %30 = math.exp %29 : vector<8x16xf32>
    %cst_20 = arith.constant dense<0.000000e+00> : vector<8xf32>
    %31 = vector.multi_reduction <add>, %30, %cst_20 [1] : vector<8x16xf32> to vector<8xf32>
    %32 = vector.shape_cast %31 : vector<8xf32> to vector<8x1xf32>
    %33 = vector.broadcast %32 : vector<8x1xf32> to vector<8x16xf32>
    %34 = arith.divf %30, %33 : vector<8x16xf32>
    %cst_21 = arith.constant dense<0.000000e+00> : vector<8x8xf32>
    %35 = tpu.matmul %34, %21, %cst_21 {dimension_numbers = #tpu.dot_dimension_numbers<[1], [0], [0], [1], [0, 0, 1, 1], [], []>} : vector<8x16xf32>, vector<16x8xf32>, vector<8x8xf32> -> vector<8x8xf32>
    %36 = vector.extract_strided_slice %16 {offsets = [0, 8], sizes = [8, 8], strides = [1, 1]} : vector<8x32xf32> to vector<8x8xf32>
    %37 = vector.extract_strided_slice %17 {offsets = [0, 8], sizes = [16, 8], strides = [1, 1]} : vector<16x32xf32> to vector<16x8xf32>
    %38 = vector.extract_strided_slice %18 {offsets = [0, 8], sizes = [16, 8], strides = [1, 1]} : vector<16x32xf32> to vector<16x8xf32>
    %cst_22 = arith.constant dense<0.000000e+00> : vector<8x16xf32>
    %39 = tpu.matmul %36, %37, %cst_22 {dimension_numbers = #tpu.dot_dimension_numbers<[1], [1], [0], [0], [0, 0, 1, 0], [], []>} : vector<8x8xf32>, vector<16x8xf32>, vector<8x16xf32> -> vector<8x16xf32>
    %cst_23 = arith.constant 0.353553385 : f32
    %40 = vector.broadcast %cst_23 : f32 to vector<8x16xf32>
    %41 = arith.mulf %39, %40 : vector<8x16xf32>
    %42 = arith.addf %41, %11 : vector<8x16xf32>
    %cst_24 = arith.constant dense<0xFF800000> : vector<8xf32>
    %43 = vector.multi_reduction <maximumf>, %42, %cst_24 [1] : vector<8x16xf32> to vector<8xf32>
    %44 = vector.shape_cast %43 : vector<8xf32> to vector<8x1xf32>
    %45 = vector.broadcast %44 : vector<8x1xf32> to vector<8x16xf32>
    %46 = arith.subf %42, %45 : vector<8x16xf32>
    %47 = math.exp %46 : vector<8x16xf32>
    %cst_25 = arith.constant dense<0.000000e+00> : vector<8xf32>
    %48 = vector.multi_reduction <add>, %47, %cst_25 [1] : vector<8x16xf32> to vector<8xf32>
    %49 = vector.shape_cast %48 : vector<8xf32> to vector<8x1xf32>
    %50 = vector.broadcast %49 : vector<8x1xf32> to vector<8x16xf32>
    %51 = arith.divf %47, %50 : vector<8x16xf32>
    %cst_26 = arith.constant dense<0.000000e+00> : vector<8x8xf32>
    %52 = tpu.matmul %51, %38, %cst_26 {dimension_numbers = #tpu.dot_dimension_numbers<[1], [0], [0], [1], [0, 0, 1, 1], [], []>} : vector<8x16xf32>, vector<16x8xf32>, vector<8x8xf32> -> vector<8x8xf32>
    %53 = vector.extract_strided_slice %16 {offsets = [0, 16], sizes = [8, 8], strides = [1, 1]} : vector<8x32xf32> to vector<8x8xf32>
    %54 = vector.extract_strided_slice %17 {offsets = [0, 16], sizes = [16, 8], strides = [1, 1]} : vector<16x32xf32> to vector<16x8xf32>
    %55 = vector.extract_strided_slice %18 {offsets = [0, 16], sizes = [16, 8], strides = [1, 1]} : vector<16x32xf32> to vector<16x8xf32>
    %cst_27 = arith.constant dense<0.000000e+00> : vector<8x16xf32>
    %56 = tpu.matmul %53, %54, %cst_27 {dimension_numbers = #tpu.dot_dimension_numbers<[1], [1], [0], [0], [0, 0, 1, 0], [], []>} : vector<8x8xf32>, vector<16x8xf32>, vector<8x16xf32> -> vector<8x16xf32>
    %cst_28 = arith.constant 0.353553385 : f32
    %57 = vector.broadcast %cst_28 : f32 to vector<8x16xf32>
    %58 = arith.mulf %56, %57 : vector<8x16xf32>
    %59 = arith.addf %58, %11 : vector<8x16xf32>
    %cst_29 = arith.constant dense<0xFF800000> : vector<8xf32>
    %60 = vector.multi_reduction <maximumf>, %59, %cst_29 [1] : vector<8x16xf32> to vector<8xf32>
    %61 = vector.shape_cast %60 : vector<8xf32> to vector<8x1xf32>
    %62 = vector.broadcast %61 : vector<8x1xf32> to vector<8x16xf32>
    %63 = arith.subf %59, %62 : vector<8x16xf32>
    %64 = math.exp %63 : vector<8x16xf32>
    %cst_30 = arith.constant dense<0.000000e+00> : vector<8xf32>
    %65 = vector.multi_reduction <add>, %64, %cst_30 [1] : vector<8x16xf32> to vector<8xf32>
    %66 = vector.shape_cast %65 : vector<8xf32> to vector<8x1xf32>
    %67 = vector.broadcast %66 : vector<8x1xf32> to vector<8x16xf32>
    %68 = arith.divf %64, %67 : vector<8x16xf32>
    %cst_31 = arith.constant dense<0.000000e+00> : vector<8x8xf32>
    %69 = tpu.matmul %68, %55, %cst_31 {dimension_numbers = #tpu.dot_dimension_numbers<[1], [0], [0], [1], [0, 0, 1, 1], [], []>} : vector<8x16xf32>, vector<16x8xf32>, vector<8x8xf32> -> vector<8x8xf32>
    %70 = vector.extract_strided_slice %16 {offsets = [0, 24], sizes = [8, 8], strides = [1, 1]} : vector<8x32xf32> to vector<8x8xf32>
    %71 = vector.extract_strided_slice %17 {offsets = [0, 24], sizes = [16, 8], strides = [1, 1]} : vector<16x32xf32> to vector<16x8xf32>
    %72 = vector.extract_strided_slice %18 {offsets = [0, 24], sizes = [16, 8], strides = [1, 1]} : vector<16x32xf32> to vector<16x8xf32>
    %cst_32 = arith.constant dense<0.000000e+00> : vector<8x16xf32>
    %73 = tpu.matmul %70, %71, %cst_32 {dimension_numbers = #tpu.dot_dimension_numbers<[1], [1], [0], [0], [0, 0, 1, 0], [], []>} : vector<8x8xf32>, vector<16x8xf32>, vector<8x16xf32> -> vector<8x16xf32>
    %cst_33 = arith.constant 0.353553385 : f32
    %74 = vector.broadcast %cst_33 : f32 to vector<8x16xf32>
    %75 = arith.mulf %73, %74 : vector<8x16xf32>
    %76 = arith.addf %75, %11 : vector<8x16xf32>
    %cst_34 = arith.constant dense<0xFF800000> : vector<8xf32>
    %77 = vector.multi_reduction <maximumf>, %76, %cst_34 [1] : vector<8x16xf32> to vector<8xf32>
    %78 = vector.shape_cast %77 : vector<8xf32> to vector<8x1xf32>
    %79 = vector.broadcast %78 : vector<8x1xf32> to vector<8x16xf32>
    %80 = arith.subf %76, %79 : vector<8x16xf32>
    %81 = math.exp %80 : vector<8x16xf32>
    %cst_35 = arith.constant dense<0.000000e+00> : vector<8xf32>
    %82 = vector.multi_reduction <add>, %81, %cst_35 [1] : vector<8x16xf32> to vector<8xf32>
    %83 = vector.shape_cast %82 : vector<8xf32> to vector<8x1xf32>
    %84 = vector.broadcast %83 : vector<8x1xf32> to vector<8x16xf32>
    %85 = arith.divf %81, %84 : vector<8x16xf32>
    %cst_36 = arith.constant dense<0.000000e+00> : vector<8x8xf32>
    %86 = tpu.matmul %85, %72, %cst_36 {dimension_numbers = #tpu.dot_dimension_numbers<[1], [0], [0], [1], [0, 0, 1, 1], [], []>} : vector<8x16xf32>, vector<16x8xf32>, vector<8x8xf32> -> vector<8x8xf32>
    %87 = tpu.concatenate %35, %52, %69, %86 in 1 : vector<8x8xf32>, vector<8x8xf32>, vector<8x8xf32>, vector<8x8xf32> -> vector<8x32xf32>
    %c0_37 = arith.constant 0 : index
    %c0_38 = arith.constant 0 : index
    %88 = vector.load %arg18[%c0_37, %c0_38] : memref<1x32xf32, #tpu.memory_space<vmem>>, vector<1x32xf32>
    %c0_39 = arith.constant 0 : index
    %c0_40 = arith.constant 0 : index
    %89 = vector.load %arg19[%c0_39, %c0_40] : memref<1x32xf32, #tpu.memory_space<vmem>>, vector<1x32xf32>
    %c0_41 = arith.constant 0 : index
    %c0_42 = arith.constant 0 : index
    %90 = vector.load %arg12[%c0_41, %c0_42] : memref<32x32xf32, #tpu.memory_space<vmem>>, vector<32x32xf32>
    %cst_43 = arith.constant dense<0.000000e+00> : vector<8x32xf32>
    %91 = tpu.matmul %87, %90, %cst_43 {dimension_numbers = #tpu.dot_dimension_numbers<[1], [0], [0], [1], [0, 0, 1, 1], [], []>} : vector<8x32xf32>, vector<32x32xf32>, vector<8x32xf32> -> vector<8x32xf32>
    %c0_44 = arith.constant 0 : index
    %c0_45 = arith.constant 0 : index
    %92 = vector.load %arg13[%c0_44, %c0_45] : memref<1x32xf32, #tpu.memory_space<vmem>>, vector<1x32xf32>
    %93 = vector.broadcast %92 : vector<1x32xf32> to vector<8x32xf32>
    %94 = arith.addf %91, %93 : vector<8x32xf32>
    %95 = arith.addf %94, %1 : vector<8x32xf32>
    %cst_46 = arith.constant dense<0.000000e+00> : vector<8xf32>
    %96 = vector.multi_reduction <add>, %95, %cst_46 [1] : vector<8x32xf32> to vector<8xf32>
    %97 = vector.shape_cast %96 : vector<8xf32> to vector<8x1xf32>
    %cst_47 = arith.constant 3.200000e+01 : f32
    %98 = vector.broadcast %cst_47 : f32 to vector<8x1xf32>
    %99 = arith.divf %97, %98 : vector<8x1xf32>
    %100 = vector.broadcast %99 : vector<8x1xf32> to vector<8x32xf32>
    %101 = arith.subf %95, %100 : vector<8x32xf32>
    %102 = arith.mulf %101, %101 : vector<8x32xf32>
    %cst_48 = arith.constant dense<0.000000e+00> : vector<8xf32>
    %103 = vector.multi_reduction <add>, %102, %cst_48 [1] : vector<8x32xf32> to vector<8xf32>
    %104 = vector.shape_cast %103 : vector<8xf32> to vector<8x1xf32>
    %cst_49 = arith.constant 3.200000e+01 : f32
    %105 = vector.broadcast %cst_49 : f32 to vector<8x1xf32>
    %106 = arith.divf %104, %105 : vector<8x1xf32>
    %cst_50 = arith.constant 9.99999996E-13 : f32
    %107 = vector.broadcast %cst_50 : f32 to vector<8x1xf32>
    %108 = arith.addf %106, %107 : vector<8x1xf32>
    %109 = math.rsqrt %108 : vector<8x1xf32>
    %110 = vector.broadcast %109 : vector<8x1xf32> to vector<8x32xf32>
    %111 = arith.mulf %101, %110 : vector<8x32xf32>
    %112 = vector.broadcast %88 : vector<1x32xf32> to vector<8x32xf32>
    %113 = arith.mulf %111, %112 : vector<8x32xf32>
    %114 = vector.broadcast %89 : vector<1x32xf32> to vector<8x32xf32>
    %115 = arith.addf %113, %114 : vector<8x32xf32>
    %c0_51 = arith.constant 0 : index
    %c0_52 = arith.constant 0 : index
    %116 = vector.load %arg14[%c0_51, %c0_52] : memref<32x64xf32, #tpu.memory_space<vmem>>, vector<32x64xf32>
    %cst_53 = arith.constant dense<0.000000e+00> : vector<8x64xf32>
    %117 = tpu.matmul %115, %116, %cst_53 {dimension_numbers = #tpu.dot_dimension_numbers<[1], [0], [0], [1], [0, 0, 1, 1], [], []>} : vector<8x32xf32>, vector<32x64xf32>, vector<8x64xf32> -> vector<8x64xf32>
    %c0_54 = arith.constant 0 : index
    %c0_55 = arith.constant 0 : index
    %118 = vector.load %arg15[%c0_54, %c0_55] : memref<1x64xf32, #tpu.memory_space<vmem>>, vector<1x64xf32>
    %119 = vector.broadcast %118 : vector<1x64xf32> to vector<8x64xf32>
    %120 = arith.addf %117, %119 : vector<8x64xf32>
    %cst_56 = arith.constant 0.000000e+00 : f32
    %121 = vector.broadcast %cst_56 : f32 to vector<8x64xf32>
    %122 = arith.maximumf %120, %121 : vector<8x64xf32>
    %c0_57 = arith.constant 0 : index
    %c0_58 = arith.constant 0 : index
    %123 = vector.load %arg16[%c0_57, %c0_58] : memref<64x32xf32, #tpu.memory_space<vmem>>, vector<64x32xf32>
    %cst_59 = arith.constant dense<0.000000e+00> : vector<8x32xf32>
    %124 = tpu.matmul %122, %123, %cst_59 {dimension_numbers = #tpu.dot_dimension_numbers<[1], [0], [0], [1], [0, 0, 1, 1], [], []>} : vector<8x64xf32>, vector<64x32xf32>, vector<8x32xf32> -> vector<8x32xf32>
    %c0_60 = arith.constant 0 : index
    %c0_61 = arith.constant 0 : index
    %125 = vector.load %arg17[%c0_60, %c0_61] : memref<1x32xf32, #tpu.memory_space<vmem>>, vector<1x32xf32>
    %126 = vector.broadcast %125 : vector<1x32xf32> to vector<8x32xf32>
    %127 = arith.addf %124, %126 : vector<8x32xf32>
    %128 = arith.addf %127, %115 : vector<8x32xf32>
    %cst_62 = arith.constant dense<0.000000e+00> : vector<8xf32>
    %129 = vector.multi_reduction <add>, %128, %cst_62 [1] : vector<8x32xf32> to vector<8xf32>
    %130 = vector.shape_cast %129 : vector<8xf32> to vector<8x1xf32>
    %cst_63 = arith.constant 3.200000e+01 : f32
    %131 = vector.broadcast %cst_63 : f32 to vector<8x1xf32>
    %132 = arith.divf %130, %131 : vector<8x1xf32>
    %133 = vector.broadcast %132 : vector<8x1xf32> to vector<8x32xf32>
    %134 = arith.subf %128, %133 : vector<8x32xf32>
    %135 = arith.mulf %134, %134 : vector<8x32xf32>
    %cst_64 = arith.constant dense<0.000000e+00> : vector<8xf32>
    %136 = vector.multi_reduction <add>, %135, %cst_64 [1] : vector<8x32xf32> to vector<8xf32>
    %137 = vector.shape_cast %136 : vector<8xf32> to vector<8x1xf32>
    %cst_65 = arith.constant 3.200000e+01 : f32
    %138 = vector.broadcast %cst_65 : f32 to vector<8x1xf32>
    %139 = arith.divf %137, %138 : vector<8x1xf32>
    %cst_66 = arith.constant 9.99999996E-13 : f32
    %140 = vector.broadcast %cst_66 : f32 to vector<8x1xf32>
    %141 = arith.addf %139, %140 : vector<8x1xf32>
    %142 = math.rsqrt %141 : vector<8x1xf32>
    %143 = vector.broadcast %142 : vector<8x1xf32> to vector<8x32xf32>
    %144 = arith.mulf %134, %143 : vector<8x32xf32>
    %145 = vector.broadcast %88 : vector<1x32xf32> to vector<8x32xf32>
    %146 = arith.mulf %144, %145 : vector<8x32xf32>
    %147 = vector.broadcast %89 : vector<1x32xf32> to vector<8x32xf32>
    %148 = arith.addf %146, %147 : vector<8x32xf32>
    %c0_67 = arith.constant 0 : index
    %c0_68 = arith.constant 0 : index
    %c0_69 = arith.constant 0 : index
    %149 = vector.load %arg20[%c0_67, %c0_68, %c0_69] : memref<1x8x32xf32, #tpu.memory_space<vmem>>, vector<1x8x32xf32>
    %150 = vector.shape_cast %149 : vector<1x8x32xf32> to vector<8x32xf32>
    %151 = vector.shape_cast %148 : vector<8x32xf32> to vector<1x8x32xf32>
    tpu.vector_store %arg20[%c0_67, %c0_68, %c0_69], %151 {strides = array<i32>} : memref<1x8x32xf32, #tpu.memory_space<vmem>>, vector<1x8x32xf32>,
    return
  }
  func.func @transform_0(%arg0: i32, %arg1: i32) -> (i32, i32, i32) {
    %c0_i32 = arith.constant 0 : i32
    %c0_i32_0 = arith.constant 0 : i32
    return %arg0, %arg1, %c0_i32 : i32, i32, i32
  }
  func.func @transform_1(%arg0: i32, %arg1: i32) -> (i32, i32, i32) {
    %c0_i32 = arith.constant 0 : i32
    %c0_i32_0 = arith.constant 0 : i32
    %c0_i32_1 = arith.constant 0 : i32
    return %arg0, %c0_i32, %c0_i32_0 : i32, i32, i32
  }
  func.func @transform_2(%arg0: i32, %arg1: i32) -> (i32, i32, i32) {
    %c0_i32 = arith.constant 0 : i32
    %c0_i32_0 = arith.constant 0 : i32
    %c0_i32_1 = arith.constant 0 : i32
    return %arg0, %c0_i32, %c0_i32_0 : i32, i32, i32
  }
  func.func @transform_3(%arg0: i32, %arg1: i32) -> (i32, i32, i32) {
    %c0_i32 = arith.constant 0 : i32
    %c0_i32_0 = arith.constant 0 : i32
    return %arg0, %arg1, %c0_i32 : i32, i32, i32
  }
  func.func @transform_4(%arg0: i32, %arg1: i32) -> (i32, i32) {
    %c0_i32 = arith.constant 0 : i32
    %c0_i32_0 = arith.constant 0 : i32
    %c0_i32_1 = arith.constant 0 : i32
    return %c0_i32, %c0_i32_0 : i32, i32
  }
  func.func @transform_5(%arg0: i32, %arg1: i32) -> (i32, i32) {
    %c0_i32 = arith.constant 0 : i32
    %c0_i32_0 = arith.constant 0 : i32
    %c0_i32_1 = arith.constant 0 : i32
    return %c0_i32, %c0_i32_0 : i32, i32
  }
  func.func @transform_6(%arg0: i32, %arg1: i32) -> (i32, i32) {
    %c0_i32 = arith.constant 0 : i32
    %c0_i32_0 = arith.constant 0 : i32
    %c0_i32_1 = arith.constant 0 : i32
    return %c0_i32, %c0_i32_0 : i32, i32
  }
  func.func @transform_7(%arg0: i32, %arg1: i32) -> (i32, i32) {
    %c0_i32 = arith.constant 0 : i32
    %c0_i32_0 = arith.constant 0 : i32
    %c0_i32_1 = arith.constant 0 : i32
    return %c0_i32, %c0_i32_0 : i32, i32
  }
  func.func @transform_8(%arg0: i32, %arg1: i32) -> (i32, i32) {
    %c0_i32 = arith.constant 0 : i32
    %c0_i32_0 = arith.constant 0 : i32
    %c0_i32_1 = arith.constant 0 : i32
    return %c0_i32, %c0_i32_0 : i32, i32
  }
  func.func @transform_9(%arg0: i32, %arg1: i32) -> (i32, i32) {
    %c0_i32 = arith.constant 0 : i32
    %c0_i32_0 = arith.constant 0 : i32
    %c0_i32_1 = arith.constant 0 : i32
    return %c0_i32, %c0_i32_0 : i32, i32
  }
  func.func @transform_10(%arg0: i32, %arg1: i32) -> (i32, i32) {
    %c0_i32 = arith.constant 0 : i32
    %c0_i32_0 = arith.constant 0 : i32
    %c0_i32_1 = arith.constant 0 : i32
    return %c0_i32, %c0_i32_0 : i32, i32
  }
  func.func @transform_11(%arg0: i32, %arg1: i32) -> (i32, i32) {
    %c0_i32 = arith.constant 0 : i32
    %c0_i32_0 = arith.constant 0 : i32
    %c0_i32_1 = arith.constant 0 : i32
    return %c0_i32, %c0_i32_0 : i32, i32
  }
  func.func @transform_12(%arg0: i32, %arg1: i32) -> (i32, i32) {
    %c0_i32 = arith.constant 0 : i32
    %c0_i32_0 = arith.constant 0 : i32
    %c0_i32_1 = arith.constant 0 : i32
    return %c0_i32, %c0_i32_0 : i32, i32
  }
  func.func @transform_13(%arg0: i32, %arg1: i32) -> (i32, i32) {
    %c0_i32 = arith.constant 0 : i32
    %c0_i32_0 = arith.constant 0 : i32
    %c0_i32_1 = arith.constant 0 : i32
    return %c0_i32, %c0_i32_0 : i32, i32
  }
  func.func @transform_14(%arg0: i32, %arg1: i32) -> (i32, i32) {
    %c0_i32 = arith.constant 0 : i32
    %c0_i32_0 = arith.constant 0 : i32
    %c0_i32_1 = arith.constant 0 : i32
    return %c0_i32, %c0_i32_0 : i32, i32
  }
  func.func @transform_15(%arg0: i32, %arg1: i32) -> (i32, i32) {
    %c0_i32 = arith.constant 0 : i32
    %c0_i32_0 = arith.constant 0 : i32
    %c0_i32_1 = arith.constant 0 : i32
    return %c0_i32, %c0_i32_0 : i32, i32
  }
  func.func @transform_16(%arg0: i32, %arg1: i32) -> (i32, i32) {
    %c0_i32 = arith.constant 0 : i32
    %c0_i32_0 = arith.constant 0 : i32
    %c0_i32_1 = arith.constant 0 : i32
    return %c0_i32, %c0_i32_0 : i32, i32
  }
  func.func @transform_17(%arg0: i32, %arg1: i32) -> (i32, i32) {
    %c0_i32 = arith.constant 0 : i32
    %c0_i32_0 = arith.constant 0 : i32
    %c0_i32_1 = arith.constant 0 : i32
    return %c0_i32, %c0_i32_0 : i32, i32
  }
  func.func @transform_18(%arg0: i32, %arg1: i32) -> (i32, i32, i32) {
    %c0_i32 = arith.constant 0 : i32
    %c0_i32_0 = arith.constant 0 : i32
    return %arg0, %arg1, %c0_i32 : i32, i32, i32
  }
}

module attributes {stable_mosaic.version = 11 : i64} {
  func.func @_encoder_block_kernel(%arg0: i32, %arg1: i32, %arg2: memref<1x8x32xf32, #tpu.memory_space<vmem>>, %arg3: memref<1x16x32xf32, #tpu.memory_space<vmem>>, %arg4: memref<1x16x32xf32, #tpu.memory_space<vmem>>, %arg5: memref<1x8x16xf32, #tpu.memory_space<vmem>>, %arg6: memref<32x32xf32, #tpu.memory_space<vmem>>, %arg7: memref<1x32xf32, #tpu.memory_space<vmem>>, %arg8: memref<32x32xf32, #tpu.memory_space<vmem>>, %arg9: memref<1x32xf32, #tpu.memory_space<vmem>>, %arg10: memref<32x32xf32, #tpu.memory_space<vmem>>, %arg11: memref<1x32xf32, #tpu.memory_space<vmem>>, %arg12: memref<32x32xf32, #tpu.memory_space<vmem>>, %arg13: memref<1x32xf32, #tpu.memory_space<vmem>>, %arg14: memref<32x64xf32, #tpu.memory_space<vmem>>, %arg15: memref<1x64xf32, #tpu.memory_space<vmem>>, %arg16: memref<64x32xf32, #tpu.memory_space<vmem>>, %arg17: memref<1x32xf32, #tpu.memory_space<vmem>>, %arg18: memref<1x32xf32, #tpu.memory_space<vmem>>, %arg19: memref<1x32xf32, #tpu.memory_space<vmem>>, %arg20: memref<1x8x32xf32, #tpu.memory_space<vmem>>, %arg21: memref<16x32xf32, #tpu.memory_space<vmem>>, %arg22: memref<16x32xf32, #tpu.memory_space<vmem>>) attributes {dimension_semantics = [#tpu.dimension_semantics<parallel>, #tpu.dimension_semantics<arbitrary>], iteration_bounds = array<i64: 2, 2>, scalar_prefetch = 0 : i64, scratch_operands = 2 : i64, tpu.core_type = #tpu.core_type<tc>, window_params = [{transform_indices = @transform_0, window_bounds = array<i64: 1, 8, 32>}, {transform_indices = @transform_1, window_bounds = array<i64: 1, 16, 32>}, {transform_indices = @transform_2, window_bounds = array<i64: 1, 16, 32>}, {transform_indices = @transform_3, window_bounds = array<i64: 1, 8, 16>}, {pipeline_mode = #tpu.pipeline_mode<synchronous>, transform_indices = @transform_4, window_bounds = array<i64: 32, 32>}, {pipeline_mode = #tpu.pipeline_mode<synchronous>, transform_indices = @transform_5, window_bounds = array<i64: 1, 32>}, {pipeline_mode = #tpu.pipeline_mode<synchronous>, transform_indices = @transform_6, window_bounds = array<i64: 32, 32>}, {pipeline_mode = #tpu.pipeline_mode<synchronous>, transform_indices = @transform_7, window_bounds = array<i64: 1, 32>}, {pipeline_mode = #tpu.pipeline_mode<synchronous>, transform_indices = @transform_8, window_bounds = array<i64: 32, 32>}, {pipeline_mode = #tpu.pipeline_mode<synchronous>, transform_indices = @transform_9, window_bounds = array<i64: 1, 32>}, {pipeline_mode = #tpu.pipeline_mode<synchronous>, transform_indices = @transform_10, window_bounds = array<i64: 32, 32>}, {pipeline_mode = #tpu.pipeline_mode<synchronous>, transform_indices = @transform_11, window_bounds = array<i64: 1, 32>}, {pipeline_mode = #tpu.pipeline_mode<synchronous>, transform_indices = @transform_12, window_bounds = array<i64: 32, 64>}, {pipeline_mode = #tpu.pipeline_mode<synchronous>, transform_indices = @transform_13, window_bounds = array<i64: 1, 64>}, {pipeline_mode = #tpu.pipeline_mode<synchronous>, transform_indices = @transform_14, window_bounds = array<i64: 64, 32>}, {pipeline_mode = #tpu.pipeline_mode<synchronous>, transform_indices = @transform_15, window_bounds = array<i64: 1, 32>}, {pipeline_mode = #tpu.pipeline_mode<synchronous>, transform_indices = @transform_16, window_bounds = array<i64: 1, 32>}, {pipeline_mode = #tpu.pipeline_mode<synchronous>, transform_indices = @transform_17, window_bounds = array<i64: 1, 32>}, {transform_indices = @transform_18, window_bounds = array<i64: 1, 8, 32>}]} {
    %c0 = arith.constant 0 : index
    %c0_0 = arith.constant 0 : index
    %c0_1 = arith.constant 0 : index
    %0 = vector.load %arg2[%c0, %c0_0, %c0_1] : memref<1x8x32xf32, #tpu.memory_space<vmem>>, vector<1x8x32xf32>
    %1 = vector.shape_cast %0 : vector<1x8x32xf32> to vector<8x32xf32>
    %c0_2 = arith.constant 0 : index
    %c0_3 = arith.constant 0 : index
    %c0_4 = arith.constant 0 : index
    %2 = vector.load %arg5[%c0_2, %c0_3, %c0_4] : memref<1x8x16xf32, #tpu.memory_space<vmem>>, vector<1x8x16xf32>
    %3 = vector.shape_cast %2 : vector<1x8x16xf32> to vector<8x16xf32>
    %c0_i32 = arith.constant 0 : i32
    %4 = arith.cmpi eq, %arg1, %c0_i32 : i32
    %5 = arith.extui %4 : i1 to i32
    %c0_i32_5 = arith.constant 0 : i32
    %6 = arith.cmpi ne, %5, %c0_i32_5 : i32
    scf.if %6 {
      %c0_70 = arith.constant 0 : index
      %c0_71 = arith.constant 0 : index
      %c0_72 = arith.constant 0 : index
      %152 = vector.load %arg3[%c0_70, %c0_71, %c0_72] : memref<1x16x32xf32, #tpu.memory_space<vmem>>, vector<1x16x32xf32>
      %153 = vector.shape_cast %152 : vector<1x16x32xf32> to vector<16x32xf32>
      %c0_73 = arith.constant 0 : index
      %c0_74 = arith.constant 0 : index
      %154 = vector.load %arg8[%c0_73, %c0_74] : memref<32x32xf32, #tpu.memory_space<vmem>>, vector<32x32xf32>
      %cst_75 = arith.constant dense<0.000000e+00> : vector<16x32xf32>
      %155 = tpu.matmul %153, %154, %cst_75 {dimension_numbers = #tpu.dot_dimension_numbers<[1], [0], [0], [1], [0, 0, 1, 1], [], []>} : vector<16x32xf32>, vector<32x32xf32>, vector<16x32xf32> -> vector<16x32xf32>
      %c0_76 = arith.constant 0 : index
      %c0_77 = arith.constant 0 : index
      %156 = vector.load %arg9[%c0_76, %c0_77] : memref<1x32xf32, #tpu.memory_space<vmem>>, vector<1x32xf32>
      %157 = vector.broadcast %156 : vector<1x32xf32> to vector<16x32xf32>
      %158 = arith.addf %155, %157 : vector<16x32xf32>
      %c0_78 = arith.constant 0 : index
      %c0_79 = arith.constant 0 : index
      %c0_80 = arith.constant 0 : index
      %159 = vector.load %arg4[%c0_78, %c0_79, %c0_80] : memref<1x16x32xf32, #tpu.memory_space<vmem>>, vector<1x16x32xf32>
      %160 = vector.shape_cast %159 : vector<1x16x32xf32> to vector<16x32xf32>
      %c0_81 = arith.constant 0 : index
      %c0_82 = arith.constant 0 : index
      %161 = vector.load %arg10[%c0_81, %c0_82] : memref<32x32xf32, #tpu.memory_space<vmem>>, vector<32x32xf32>
      %cst_83 = arith.constant dense<0.000000e+00> : vector<16x32xf32>
      %162 = tpu.matmul %160, %161, %cst_83 {dimension_numbers = #tpu.dot_dimension_numbers<[1], [0], [0], [1], [0, 0, 1, 1], [], []>} : vector<16x32xf32>, vector<32x32xf32>, vector<16x32xf32> -> vector<16x32xf32>
      %c0_84 = arith.constant 0 : index
      %c0_85 = arith.constant 0 : index
      %163 = vector.load %arg11[%c0_84, %c0_85] : memref<1x32xf32, #tpu.memory_space<vmem>>, vector<1x32xf32>
      %164 = vector.broadcast %163 : vector<1x32xf32> to vector<16x32xf32>
      %165 = arith.addf %162, %164 : vector<16x32xf32>
      %c0_86 = arith.constant 0 : index
      %c0_87 = arith.constant 0 : index
      %166 = vector.load %arg21[%c0_86, %c0_87] : memref<16x32xf32, #tpu.memory_space<vmem>>, vector<16x32xf32>
      tpu.vector_store %arg21[%c0_86, %c0_87], %158 {strides = array<i32>} : memref<16x32xf32, #tpu.memory_space<vmem>>, vector<16x32xf32>,
      %c0_88 = arith.constant 0 : index
      %c0_89 = arith.constant 0 : index
      %167 = vector.load %arg22[%c0_88, %c0_89] : memref<16x32xf32, #tpu.memory_space<vmem>>, vector<16x32xf32>
      tpu.vector_store %arg22[%c0_88, %c0_89], %165 {strides = array<i32>} : memref<16x32xf32, #tpu.memory_space<vmem>>, vector<16x32xf32>,
    } else {
    }
    %cst = arith.constant 0.000000e+00 : f32
    %7 = vector.broadcast %cst : f32 to vector<8x16xf32>
    %8 = arith.cmpf oeq, %3, %7 : vector<8x16xf32>
    %cst_6 = arith.constant -1.000000e+04 : f32
    %cst_7 = arith.constant 0.000000e+00 : f32
    %9 = vector.broadcast %cst_6 : f32 to vector<8x16xf32>
    %10 = vector.broadcast %cst_7 : f32 to vector<8x16xf32>
    %11 = arith.select %8, %9, %10 : vector<8x16xi1>, vector<8x16xf32>
    %c0_8 = arith.constant 0 : index
    %c0_9 = arith.constant 0 : index
    %12 = vector.load %arg6[%c0_8, %c0_9] : memref<32x32xf32, #tpu.memory_space<vmem>>, vector<32x32xf32>
    %cst_10 = arith.constant dense<0.000000e+00> : vector<8x32xf32>
    %13 = tpu.matmul %1, %12, %cst_10 {dimension_numbers = #tpu.dot_dimension_numbers<[1], [0], [0], [1], [0, 0, 1, 1], [], []>} : vector<8x32xf32>, vector<32x32xf32>, vector<8x32xf32> -> vector<8x32xf32>
    %c0_11 = arith.constant 0 : index
    %c0_12 = arith.constant 0 : index
    %14 = vector.load %arg7[%c0_11, %c0_12] : memref<1x32xf32, #tpu.memory_space<vmem>>, vector<1x32xf32>
    %15 = vector.broadcast %14 : vector<1x32xf32> to vector<8x32xf32>
    %16 = arith.addf %13, %15 : vector<8x32xf32>
    %c0_13 = arith.constant 0 : index
    %c0_14 = arith.constant 0 : index
    %17 = vector.load %arg21[%c0_13, %c0_14] : memref<16x32xf32, #tpu.memory_space<vmem>>, vector<16x32xf32>
    %c0_15 = arith.constant 0 : index
    %c0_16 = arith.constant 0 : index
    %18 = vector.load %arg22[%c0_15, %c0_16] : memref<16x32xf32, #tpu.memory_space<vmem>>, vector<16x32xf32>
    %19 = vector.extract_strided_slice %16 {offsets = [0, 0], sizes = [8, 8], strides = [1, 1]} : vector<8x32xf32> to vector<8x8xf32>
    %20 = vector.extract_strided_slice %17 {offsets = [0, 0], sizes = [16, 8], strides = [1, 1]} : vector<16x32xf32> to vector<16x8xf32>
    %21 = vector.extract_strided_slice %18 {offsets = [0, 0], sizes = [16, 8], strides = [1, 1]} : vector<16x32xf32> to vector<16x8xf32>
    %cst_17 = arith.constant dense<0.000000e+00> : vector<8x16xf32>
    %22 = tpu.matmul %19, %20, %cst_17 {dimension_numbers = #tpu.dot_dimension_numbers<[1], [1], [0], [0], [0, 0, 1, 0], [], []>} : vector<8x8xf32>, vector<16x8xf32>, vector<8x16xf32> -> vector<8x16xf32>
    %cst_18 = arith.constant 0.353553385 : f32
    %23 = vector.broadcast %cst_18 : f32 to vector<8x16xf32>
    %24 = arith.mulf %22, %23 : vector<8x16xf32>
    %25 = arith.addf %24, %11 : vector<8x16xf32>
    %cst_19 = arith.constant dense<0xFF800000> : vector<8xf32>
    %26 = vector.multi_reduction <maximumf>, %25, %cst_19 [1] : vector<8x16xf32> to vector<8xf32>
    %27 = vector.shape_cast %26 : vector<8xf32> to vector<8x1xf32>
    %28 = vector.broadcast %27 : vector<8x1xf32> to vector<8x16xf32>
    %29 = arith.subf %25, %28 : vector<8x16xf32>
    %30 = math.exp %29 : vector<8x16xf32>
    %cst_20 = arith.constant dense<0.000000e+00> : vector<8xf32>
    %31 = vector.multi_reduction <add>, %30, %cst_20 [1] : vector<8x16xf32> to vector<8xf32>
    %32 = vector.shape_cast %31 : vector<8xf32> to vector<8x1xf32>
    %33 = vector.broadcast %32 : vector<8x1xf32> to vector<8x16xf32>
    %34 = arith.divf %30, %33 : vector<8x16xf32>
    %cst_21 = arith.constant dense<0.000000e+00> : vector<8x8xf32>
    %35 = tpu.matmul %34, %21, %cst_21 {dimension_numbers = #tpu.dot_dimension_numbers<[1], [0], [0], [1], [0, 0, 1, 1], [], []>} : vector<8x16xf32>, vector<16x8xf32>, vector<8x8xf32> -> vector<8x8xf32>
    %36 = vector.extract_strided_slice %16 {offsets = [0, 8], sizes = [8, 8], strides = [1, 1]} : vector<8x32xf32> to vector<8x8xf32>
    %37 = vector.extract_strided_slice %17 {offsets = [0, 8], sizes = [16, 8], strides = [1, 1]} : vector<16x32xf32> to vector<16x8xf32>
    %38 = vector.extract_strided_slice %18 {offsets = [0, 8], sizes = [16, 8], strides = [1, 1]} : vector<16x32xf32> to vector<16x8xf32>
    %cst_22 = arith.constant dense<0.000000e+00> : vector<8x16xf32>
    %39 = tpu.matmul %36, %37, %cst_22 {dimension_numbers = #tpu.dot_dimension_numbers<[1], [1], [0], [0], [0, 0, 1, 0], [], []>} : vector<8x8xf32>, vector<16x8xf32>, vector<8x16xf32> -> vector<8x16xf32>
    %cst_23 = arith.constant 0.353553385 : f32
    %40 = vector.broadcast %cst_23 : f32 to vector<8x16xf32>
    %41 = arith.mulf %39, %40 : vector<8x16xf32>
    %42 = arith.addf %41, %11 : vector<8x16xf32>
    %cst_24 = arith.constant dense<0xFF800000> : vector<8xf32>
    %43 = vector.multi_reduction <maximumf>, %42, %cst_24 [1] : vector<8x16xf32> to vector<8xf32>
    %44 = vector.shape_cast %43 : vector<8xf32> to vector<8x1xf32>
    %45 = vector.broadcast %44 : vector<8x1xf32> to vector<8x16xf32>
    %46 = arith.subf %42, %45 : vector<8x16xf32>
    %47 = math.exp %46 : vector<8x16xf32>
    %cst_25 = arith.constant dense<0.000000e+00> : vector<8xf32>
    %48 = vector.multi_reduction <add>, %47, %cst_25 [1] : vector<8x16xf32> to vector<8xf32>
    %49 = vector.shape_cast %48 : vector<8xf32> to vector<8x1xf32>
    %50 = vector.broadcast %49 : vector<8x1xf32> to vector<8x16xf32>
    %51 = arith.divf %47, %50 : vector<8x16xf32>
    %cst_26 = arith.constant dense<0.000000e+00> : vector<8x8xf32>
    %52 = tpu.matmul %51, %38, %cst_26 {dimension_numbers = #tpu.dot_dimension_numbers<[1], [0], [0], [1], [0, 0, 1, 1], [], []>} : vector<8x16xf32>, vector<16x8xf32>, vector<8x8xf32> -> vector<8x8xf32>
    %53 = vector.extract_strided_slice %16 {offsets = [0, 16], sizes = [8, 8], strides = [1, 1]} : vector<8x32xf32> to vector<8x8xf32>
    %54 = vector.extract_strided_slice %17 {offsets = [0, 16], sizes = [16, 8], strides = [1, 1]} : vector<16x32xf32> to vector<16x8xf32>
    %55 = vector.extract_strided_slice %18 {offsets = [0, 16], sizes = [16, 8], strides = [1, 1]} : vector<16x32xf32> to vector<16x8xf32>
    %cst_27 = arith.constant dense<0.000000e+00> : vector<8x16xf32>
    %56 = tpu.matmul %53, %54, %cst_27 {dimension_numbers = #tpu.dot_dimension_numbers<[1], [1], [0], [0], [0, 0, 1, 0], [], []>} : vector<8x8xf32>, vector<16x8xf32>, vector<8x16xf32> -> vector<8x16xf32>
    %cst_28 = arith.constant 0.353553385 : f32
    %57 = vector.broadcast %cst_28 : f32 to vector<8x16xf32>
    %58 = arith.mulf %56, %57 : vector<8x16xf32>
    %59 = arith.addf %58, %11 : vector<8x16xf32>
    %cst_29 = arith.constant dense<0xFF800000> : vector<8xf32>
    %60 = vector.multi_reduction <maximumf>, %59, %cst_29 [1] : vector<8x16xf32> to vector<8xf32>
    %61 = vector.shape_cast %60 : vector<8xf32> to vector<8x1xf32>
    %62 = vector.broadcast %61 : vector<8x1xf32> to vector<8x16xf32>
    %63 = arith.subf %59, %62 : vector<8x16xf32>
    %64 = math.exp %63 : vector<8x16xf32>
    %cst_30 = arith.constant dense<0.000000e+00> : vector<8xf32>
    %65 = vector.multi_reduction <add>, %64, %cst_30 [1] : vector<8x16xf32> to vector<8xf32>
    %66 = vector.shape_cast %65 : vector<8xf32> to vector<8x1xf32>
    %67 = vector.broadcast %66 : vector<8x1xf32> to vector<8x16xf32>
    %68 = arith.divf %64, %67 : vector<8x16xf32>
    %cst_31 = arith.constant dense<0.000000e+00> : vector<8x8xf32>
    %69 = tpu.matmul %68, %55, %cst_31 {dimension_numbers = #tpu.dot_dimension_numbers<[1], [0], [0], [1], [0, 0, 1, 1], [], []>} : vector<8x16xf32>, vector<16x8xf32>, vector<8x8xf32> -> vector<8x8xf32>
    %70 = vector.extract_strided_slice %16 {offsets = [0, 24], sizes = [8, 8], strides = [1, 1]} : vector<8x32xf32> to vector<8x8xf32>
    %71 = vector.extract_strided_slice %17 {offsets = [0, 24], sizes = [16, 8], strides = [1, 1]} : vector<16x32xf32> to vector<16x8xf32>
    %72 = vector.extract_strided_slice %18 {offsets = [0, 24], sizes = [16, 8], strides = [1, 1]} : vector<16x32xf32> to vector<16x8xf32>
    %cst_32 = arith.constant dense<0.000000e+00> : vector<8x16xf32>
    %73 = tpu.matmul %70, %71, %cst_32 {dimension_numbers = #tpu.dot_dimension_numbers<[1], [1], [0], [0], [0, 0, 1, 0], [], []>} : vector<8x8xf32>, vector<16x8xf32>, vector<8x16xf32> -> vector<8x16xf32>
    %cst_33 = arith.constant 0.353553385 : f32
    %74 = vector.broadcast %cst_33 : f32 to vector<8x16xf32>
    %75 = arith.mulf %73, %74 : vector<8x16xf32>
    %76 = arith.addf %75, %11 : vector<8x16xf32>
    %cst_34 = arith.constant dense<0xFF800000> : vector<8xf32>
    %77 = vector.multi_reduction <maximumf>, %76, %cst_34 [1] : vector<8x16xf32> to vector<8xf32>
    %78 = vector.shape_cast %77 : vector<8xf32> to vector<8x1xf32>
    %79 = vector.broadcast %78 : vector<8x1xf32> to vector<8x16xf32>
    %80 = arith.subf %76, %79 : vector<8x16xf32>
    %81 = math.exp %80 : vector<8x16xf32>
    %cst_35 = arith.constant dense<0.000000e+00> : vector<8xf32>
    %82 = vector.multi_reduction <add>, %81, %cst_35 [1] : vector<8x16xf32> to vector<8xf32>
    %83 = vector.shape_cast %82 : vector<8xf32> to vector<8x1xf32>
    %84 = vector.broadcast %83 : vector<8x1xf32> to vector<8x16xf32>
    %85 = arith.divf %81, %84 : vector<8x16xf32>
    %cst_36 = arith.constant dense<0.000000e+00> : vector<8x8xf32>
    %86 = tpu.matmul %85, %72, %cst_36 {dimension_numbers = #tpu.dot_dimension_numbers<[1], [0], [0], [1], [0, 0, 1, 1], [], []>} : vector<8x16xf32>, vector<16x8xf32>, vector<8x8xf32> -> vector<8x8xf32>
    %87 = tpu.concatenate %35, %52, %69, %86 in 1 : vector<8x8xf32>, vector<8x8xf32>, vector<8x8xf32>, vector<8x8xf32> -> vector<8x32xf32>
    %c0_37 = arith.constant 0 : index
    %c0_38 = arith.constant 0 : index
    %88 = vector.load %arg18[%c0_37, %c0_38] : memref<1x32xf32, #tpu.memory_space<vmem>>, vector<1x32xf32>
    %c0_39 = arith.constant 0 : index
    %c0_40 = arith.constant 0 : index
    %89 = vector.load %arg19[%c0_39, %c0_40] : memref<1x32xf32, #tpu.memory_space<vmem>>, vector<1x32xf32>
    %c0_41 = arith.constant 0 : index
    %c0_42 = arith.constant 0 : index
    %90 = vector.load %arg12[%c0_41, %c0_42] : memref<32x32xf32, #tpu.memory_space<vmem>>, vector<32x32xf32>
    %cst_43 = arith.constant dense<0.000000e+00> : vector<8x32xf32>
    %91 = tpu.matmul %87, %90, %cst_43 {dimension_numbers = #tpu.dot_dimension_numbers<[1], [0], [0], [1], [0, 0, 1, 1], [], []>} : vector<8x32xf32>, vector<32x32xf32>, vector<8x32xf32> -> vector<8x32xf32>
    %c0_44 = arith.constant 0 : index
    %c0_45 = arith.constant 0 : index
    %92 = vector.load %arg13[%c0_44, %c0_45] : memref<1x32xf32, #tpu.memory_space<vmem>>, vector<1x32xf32>
    %93 = vector.broadcast %92 : vector<1x32xf32> to vector<8x32xf32>
    %94 = arith.addf %91, %93 : vector<8x32xf32>
    %95 = arith.addf %94, %1 : vector<8x32xf32>
    %cst_46 = arith.constant dense<0.000000e+00> : vector<8xf32>
    %96 = vector.multi_reduction <add>, %95, %cst_46 [1] : vector<8x32xf32> to vector<8xf32>
    %97 = vector.shape_cast %96 : vector<8xf32> to vector<8x1xf32>
    %cst_47 = arith.constant 3.200000e+01 : f32
    %98 = vector.broadcast %cst_47 : f32 to vector<8x1xf32>
    %99 = arith.divf %97, %98 : vector<8x1xf32>
    %100 = vector.broadcast %99 : vector<8x1xf32> to vector<8x32xf32>
    %101 = arith.subf %95, %100 : vector<8x32xf32>
    %102 = arith.mulf %101, %101 : vector<8x32xf32>
    %cst_48 = arith.constant dense<0.000000e+00> : vector<8xf32>
    %103 = vector.multi_reduction <add>, %102, %cst_48 [1] : vector<8x32xf32> to vector<8xf32>
    %104 = vector.shape_cast %103 : vector<8xf32> to vector<8x1xf32>
    %cst_49 = arith.constant 3.200000e+01 : f32
    %105 = vector.broadcast %cst_49 : f32 to vector<8x1xf32>
    %106 = arith.divf %104, %105 : vector<8x1xf32>
    %cst_50 = arith.constant 9.99999996E-13 : f32
    %107 = vector.broadcast %cst_50 : f32 to vector<8x1xf32>
    %108 = arith.addf %106, %107 : vector<8x1xf32>
    %109 = math.rsqrt %108 : vector<8x1xf32>
    %110 = vector.broadcast %109 : vector<8x1xf32> to vector<8x32xf32>
    %111 = arith.mulf %101, %110 : vector<8x32xf32>
    %112 = vector.broadcast %88 : vector<1x32xf32> to vector<8x32xf32>
    %113 = arith.mulf %111, %112 : vector<8x32xf32>
    %114 = vector.broadcast %89 : vector<1x32xf32> to vector<8x32xf32>
    %115 = arith.addf %113, %114 : vector<8x32xf32>
    %c0_51 = arith.constant 0 : index
    %c0_52 = arith.constant 0 : index
    %116 = vector.load %arg14[%c0_51, %c0_52] : memref<32x64xf32, #tpu.memory_space<vmem>>, vector<32x64xf32>
    %cst_53 = arith.constant dense<0.000000e+00> : vector<8x64xf32>
    %117 = tpu.matmul %115, %116, %cst_53 {dimension_numbers = #tpu.dot_dimension_numbers<[1], [0], [0], [1], [0, 0, 1, 1], [], []>} : vector<8x32xf32>, vector<32x64xf32>, vector<8x64xf32> -> vector<8x64xf32>
    %c0_54 = arith.constant 0 : index
    %c0_55 = arith.constant 0 : index
    %118 = vector.load %arg15[%c0_54, %c0_55] : memref<1x64xf32, #tpu.memory_space<vmem>>, vector<1x64xf32>
    %119 = vector.broadcast %118 : vector<1x64xf32> to vector<8x64xf32>
    %120 = arith.addf %117, %119 : vector<8x64xf32>
    %cst_56 = arith.constant 0.000000e+00 : f32
    %121 = vector.broadcast %cst_56 : f32 to vector<8x64xf32>
    %122 = arith.maximumf %120, %121 : vector<8x64xf32>
    %c0_57 = arith.constant 0 : index
    %c0_58 = arith.constant 0 : index
    %123 = vector.load %arg16[%c0_57, %c0_58] : memref<64x32xf32, #tpu.memory_space<vmem>>, vector<64x32xf32>
    %cst_59 = arith.constant dense<0.000000e+00> : vector<8x32xf32>
    %124 = tpu.matmul %122, %123, %cst_59 {dimension_numbers = #tpu.dot_dimension_numbers<[1], [0], [0], [1], [0, 0, 1, 1], [], []>} : vector<8x64xf32>, vector<64x32xf32>, vector<8x32xf32> -> vector<8x32xf32>
    %c0_60 = arith.constant 0 : index
    %c0_61 = arith.constant 0 : index
    %125 = vector.load %arg17[%c0_60, %c0_61] : memref<1x32xf32, #tpu.memory_space<vmem>>, vector<1x32xf32>
    %126 = vector.broadcast %125 : vector<1x32xf32> to vector<8x32xf32>
    %127 = arith.addf %124, %126 : vector<8x32xf32>
    %128 = arith.addf %127, %115 : vector<8x32xf32>
    %cst_62 = arith.constant dense<0.000000e+00> : vector<8xf32>
    %129 = vector.multi_reduction <add>, %128, %cst_62 [1] : vector<8x32xf32> to vector<8xf32>
    %130 = vector.shape_cast %129 : vector<8xf32> to vector<8x1xf32>
    %cst_63 = arith.constant 3.200000e+01 : f32
    %131 = vector.broadcast %cst_63 : f32 to vector<8x1xf32>
    %132 = arith.divf %130, %131 : vector<8x1xf32>
    %133 = vector.broadcast %132 : vector<8x1xf32> to vector<8x32xf32>
    %134 = arith.subf %128, %133 : vector<8x32xf32>
    %135 = arith.mulf %134, %134 : vector<8x32xf32>
    %cst_64 = arith.constant dense<0.000000e+00> : vector<8xf32>
    %136 = vector.multi_reduction <add>, %135, %cst_64 [1] : vector<8x32xf32> to vector<8xf32>
    %137 = vector.shape_cast %136 : vector<8xf32> to vector<8x1xf32>
    %cst_65 = arith.constant 3.200000e+01 : f32
    %138 = vector.broadcast %cst_65 : f32 to vector<8x1xf32>
    %139 = arith.divf %137, %138 : vector<8x1xf32>
    %cst_66 = arith.constant 9.99999996E-13 : f32
    %140 = vector.broadcast %cst_66 : f32 to vector<8x1xf32>
    %141 = arith.addf %139, %140 : vector<8x1xf32>
    %142 = math.rsqrt %141 : vector<8x1xf32>
    %143 = vector.broadcast %142 : vector<8x1xf32> to vector<8x32xf32>
    %144 = arith.mulf %134, %143 : vector<8x32xf32>
    %145 = vector.broadcast %88 : vector<1x32xf32> to vector<8x32xf32>
    %146 = arith.mulf %144, %145 : vector<8x32xf32>
    %147 = vector.broadcast %89 : vector<1x32xf32> to vector<8x32xf32>
    %148 = arith.addf %146, %147 : vector<8x32xf32>
    %c0_67 = arith.constant 0 : index
    %c0_68 = arith.constant 0 : index
    %c0_69 = arith.constant 0 : index
    %149 = vector.load %arg20[%c0_67, %c0_68, %c0_69] : memref<1x8x32xf32, #tpu.memory_space<vmem>>, vector<1x8x32xf32>
    %150 = vector.shape_cast %149 : vector<1x8x32xf32> to vector<8x32xf32>
    %151 = vector.shape_cast %148 : vector<8x32xf32> to vector<1x8x32xf32>
    tpu.vector_store %arg20[%c0_67, %c0_68, %c0_69], %151 {strides = array<i32>} : memref<1x8x32xf32, #tpu.memory_space<vmem>>, vector<1x8x32xf32>,
    return
  }
  func.func @transform_0(%arg0: i32, %arg1: i32) -> (i32, i32, i32) {
    %c0_i32 = arith.constant 0 : i32
    %c0_i32_0 = arith.constant 0 : i32
    return %arg0, %arg1, %c0_i32 : i32, i32, i32
  }
  func.func @transform_1(%arg0: i32, %arg1: i32) -> (i32, i32, i32) {
    %c0_i32 = arith.constant 0 : i32
    %c0_i32_0 = arith.constant 0 : i32
    %c0_i32_1 = arith.constant 0 : i32
    return %arg0, %c0_i32, %c0_i32_0 : i32, i32, i32
  }
  func.func @transform_2(%arg0: i32, %arg1: i32) -> (i32, i32, i32) {
    %c0_i32 = arith.constant 0 : i32
    %c0_i32_0 = arith.constant 0 : i32
    %c0_i32_1 = arith.constant 0 : i32
    return %arg0, %c0_i32, %c0_i32_0 : i32, i32, i32
  }
  func.func @transform_3(%arg0: i32, %arg1: i32) -> (i32, i32, i32) {
    %c0_i32 = arith.constant 0 : i32
    %c0_i32_0 = arith.constant 0 : i32
    return %arg0, %arg1, %c0_i32 : i32, i32, i32
  }
  func.func @transform_4(%arg0: i32, %arg1: i32) -> (i32, i32) {
    %c0_i32 = arith.constant 0 : i32
    %c0_i32_0 = arith.constant 0 : i32
    %c0_i32_1 = arith.constant 0 : i32
    return %c0_i32, %c0_i32_0 : i32, i32
  }
  func.func @transform_5(%arg0: i32, %arg1: i32) -> (i32, i32) {
    %c0_i32 = arith.constant 0 : i32
    %c0_i32_0 = arith.constant 0 : i32
    %c0_i32_1 = arith.constant 0 : i32
    return %c0_i32, %c0_i32_0 : i32, i32
  }
  func.func @transform_6(%arg0: i32, %arg1: i32) -> (i32, i32) {
    %c0_i32 = arith.constant 0 : i32
    %c0_i32_0 = arith.constant 0 : i32
    %c0_i32_1 = arith.constant 0 : i32
    return %c0_i32, %c0_i32_0 : i32, i32
  }
  func.func @transform_7(%arg0: i32, %arg1: i32) -> (i32, i32) {
    %c0_i32 = arith.constant 0 : i32
    %c0_i32_0 = arith.constant 0 : i32
    %c0_i32_1 = arith.constant 0 : i32
    return %c0_i32, %c0_i32_0 : i32, i32
  }
  func.func @transform_8(%arg0: i32, %arg1: i32) -> (i32, i32) {
    %c0_i32 = arith.constant 0 : i32
    %c0_i32_0 = arith.constant 0 : i32
    %c0_i32_1 = arith.constant 0 : i32
    return %c0_i32, %c0_i32_0 : i32, i32
  }
  func.func @transform_9(%arg0: i32, %arg1: i32) -> (i32, i32) {
    %c0_i32 = arith.constant 0 : i32
    %c0_i32_0 = arith.constant 0 : i32
    %c0_i32_1 = arith.constant 0 : i32
    return %c0_i32, %c0_i32_0 : i32, i32
  }
  func.func @transform_10(%arg0: i32, %arg1: i32) -> (i32, i32) {
    %c0_i32 = arith.constant 0 : i32
    %c0_i32_0 = arith.constant 0 : i32
    %c0_i32_1 = arith.constant 0 : i32
    return %c0_i32, %c0_i32_0 : i32, i32
  }
  func.func @transform_11(%arg0: i32, %arg1: i32) -> (i32, i32) {
    %c0_i32 = arith.constant 0 : i32
    %c0_i32_0 = arith.constant 0 : i32
    %c0_i32_1 = arith.constant 0 : i32
    return %c0_i32, %c0_i32_0 : i32, i32
  }
  func.func @transform_12(%arg0: i32, %arg1: i32) -> (i32, i32) {
    %c0_i32 = arith.constant 0 : i32
    %c0_i32_0 = arith.constant 0 : i32
    %c0_i32_1 = arith.constant 0 : i32
    return %c0_i32, %c0_i32_0 : i32, i32
  }
  func.func @transform_13(%arg0: i32, %arg1: i32) -> (i32, i32) {
    %c0_i32 = arith.constant 0 : i32
    %c0_i32_0 = arith.constant 0 : i32
    %c0_i32_1 = arith.constant 0 : i32
    return %c0_i32, %c0_i32_0 : i32, i32
  }
  func.func @transform_14(%arg0: i32, %arg1: i32) -> (i32, i32) {
    %c0_i32 = arith.constant 0 : i32
    %c0_i32_0 = arith.constant 0 : i32
    %c0_i32_1 = arith.constant 0 : i32
    return %c0_i32, %c0_i32_0 : i32, i32
  }
  func.func @transform_15(%arg0: i32, %arg1: i32) -> (i32, i32) {
    %c0_i32 = arith.constant 0 : i32
    %c0_i32_0 = arith.constant 0 : i32
    %c0_i32_1 = arith.constant 0 : i32
    return %c0_i32, %c0_i32_0 : i32, i32
  }
  func.func @transform_16(%arg0: i32, %arg1: i32) -> (i32, i32) {
    %c0_i32 = arith.constant 0 : i32
    %c0_i32_0 = arith.constant 0 : i32
    %c0_i32_1 = arith.constant 0 : i32
    return %c0_i32, %c0_i32_0 : i32, i32
  }
  func.func @transform_17(%arg0: i32, %arg1: i32) -> (i32, i32) {
    %c0_i32 = arith.constant 0 : i32
    %c0_i32_0 = arith.constant 0 : i32
    %c0_i32_1 = arith.constant 0 : i32
    return %c0_i32, %c0_i32_0 : i32, i32
  }
  func.func @transform_18(%arg0: i32, %arg1: i32) -> (i32, i32, i32) {
    %c0_i32 = arith.constant 0 : i32
    %c0_i32_0 = arith.constant 0 : i32
    return %arg0, %arg1, %c0_i32 : i32, i32, i32
  }
}

</mosaic_0001>

<bundles_post_ra>
// kernel: tpu_custom_call.1
= control target key start
LH: loop header
LB: loop body
LE: loop exit
PB: predicated region body
PF: predicated region fallthrough
CT: control target
= control target key end

     0   :  { %s3722_s0 = inlined_call_operand.vmem [shape: f32[2,16,32], index: 0, kind: input, shape index: {}]   ;;  %s3723_s1 = inlined_call_operand.vmem [shape: f32[2,16,32], index: 1, kind: input, shape index: {}]   ;;  %s3724_s2 = inlined_call_operand.vmem [shape: f32[2,16,32], index: 2, kind: input, shape index: {}]   ;;  %s3725_s3 = inlined_call_operand.hbm [shape: f32[2,16,16], index: 3, kind: input, shape index: {}]   ;;  %s3726_s4 = inlined_call_operand.hbm [shape: f32[32,32], index: 4, kind: input, shape index: {}]   ;;  %s3727_s5 = inlined_call_operand.vmem [shape: f32[1,32], index: 5, kind: input, shape index: {}]   ;;  %s3728_s6 = inlined_call_operand.hbm [shape: f32[32,32], index: 6, kind: input, shape index: {}]   ;;  %s3729_s7 = inlined_call_operand.vmem [shape: f32[1,32], index: 7, kind: input, shape index: {}]   ;;  %s3730_s8 = inlined_call_operand.hbm [shape: f32[32,32], index: 8, kind: input, shape index: {}]   ;;  %s3731_s9 = inlined_call_operand.vmem [shape: f32[1,32], index: 9, kind: input, shape index: {}]   ;;  %s3732_s10 = inlined_call_operand.hbm [shape: f32[32,32], index: 10, kind: input, shape index: {}]   ;;  %s3733_s11 = inlined_call_operand.vmem [shape: f32[1,32], index: 11, kind: input, shape index: {}]   ;;  %s3734_s12 = inlined_call_operand.hbm [shape: f32[32,64], index: 12, kind: input, shape index: {}]   ;;  %s3735_s13 = inlined_call_operand.vmem [shape: f32[1,64], index: 13, kind: input, shape index: {}]   ;;  %s3736_s14 = inlined_call_operand.vmem [shape: f32[64,32], index: 14, kind: input, shape index: {}]   ;;  %s3737_s15 = inlined_call_operand.vmem [shape: f32[1,32], index: 15, kind: input, shape index: {}]   ;;  %s3738_s16 = inlined_call_operand.vmem [shape: f32[1,32], index: 16, kind: input, shape index: {}]   ;;  %s3739_s17 = inlined_call_operand.vmem [shape: f32[1,32], index: 17, kind: input, shape index: {}]   ;;  %s3740_s18 = inlined_call_operand.hbm [shape: f32[2,16,32], index: 18, kind: output, shape index: {}]  }
   0x1   :  { %3752 = sst [smem:[#allocation25_spill]] %s3722_s0 }
   0x2   :  { %3753 = sst [smem:[#allocation26_spill]] %s3723_s1 }
   0x3   :  { %3754 = sst [smem:[#allocation27_spill]] %s3724_s2 }
   0x4   :  { %3755 = sst [smem:[#allocation28_spill]] %s3725_s3 }
   0x5   :  { %3756 = sst [smem:[#allocation29_spill]] %s3726_s4 }
   0x6   :  { %3757 = sst [smem:[#allocation30_spill]] %s3727_s5 }
   0x7   :  { %3758 = sst [smem:[#allocation31_spill]] %s3728_s6 }
   0x8   :  { %3759 = sst [smem:[#allocation32_spill]] %s3729_s7 }
   0x9   :  { %3760 = sst [smem:[#allocation33_spill]] %s3730_s8 }
   0xa   :  { %3761 = sst [smem:[#allocation34_spill]] %s3731_s9 }
   0xb   :  { %3762 = sst [smem:[#allocation35_spill]] %s3732_s10 }
   0xc   :  { %3763 = sst [smem:[#allocation36_spill]] %s3733_s11 }
   0xd   :  { %3764 = sst [smem:[#allocation37_spill]] %s3734_s12 }
   0xe   :  { %3765 = sst [smem:[#allocation38_spill]] %s3735_s13 }
   0xf   :  { %3766 = sst [smem:[#allocation39_spill]] %s3736_s14 }
  0x10   :  { %3767 = sst [smem:[#allocation40_spill]] %s3737_s15 }
  0x11   :  { %3768 = sst [smem:[#allocation41_spill]] %s3738_s16 }
  0x12   :  { %3769 = sst [smem:[#allocation42_spill]] %s3739_s17 }
  0x13   :  { %3770 = sst [smem:[#allocation43_spill]] %s3740_s18 }
  0x14   :  { %23 = vsyncpa [#allocation5], 0 }
  0x15   :  { %25 = vsyncpa [#allocation5 + $0x1], 0 }
  0x16   :  { %26 = vsyncpa [#allocation8], 0 }
  0x17   :  { %27 = vsyncpa [#allocation11], 0 }
  0x18   :  { %28 = vsyncpa [#allocation14], 0 }
  0x19   :  { %29 = vsyncpa [#allocation6], 0 }
  0x1a   :  { %31 = vsyncpa [#allocation6 + $0x1], 0  ;;  %s3162_s27 = smov 0   ;;  %s3164_s28 = smov 0  }
  0x1b   :  { %s3166_s29 = smov 0   ;;  %s3168_s30 = smov 0  }
  0x1c   :  { %s3170_s0 = smov 0   ;;  %s3172_s19 = smov 0  }
  0x1d   :  { %s3174_s1 = smov 0   ;;  %s3176_s20 = smov 0  }
  0x1e LB: > { %3771 = sst [smem:[#allocation21_spill]] %s3031_s30  ;;  %s3741_s21 = sadd.s32 4294967295, %s3047_s20   ;;  %s3047_s20 = sphi %s3176_s20, %s37_s20   ;;  %s3043_s1 = sphi %s3174_s1, %s3815_s1   ;;  %s3039_s19 = sphi %s3172_s19, %s3820_s19   ;;  %s3035_s0 = sphi %s3170_s0, %s3813_s0   ;;  %s3031_s30 = sphi %s3168_s30, %s3819_s30   ;;  %s3027_s29 = sphi %s3166_s29, %s3818_s29   ;;  %s3023_s28 = sphi %s3164_s28, %s3817_s28   ;;  %s3019_s27 = sphi %s3162_s27, %s3816_s27  }
  0x1f   : > { %3772 = sst [smem:[#allocation22_spill]] %s3043_s1  ;;  %p2249_p0 = scmp.ge.s32.totalorder %s3047_s20, 1 }
  0x20   : > { %p3206_p1 = scmp.eq.s32.totalorder %s3741_s21, 0  ;;  %p484_p2 = scmp.lt.s32.totalorder %s3047_s20, 5 }
  0x21   : > { %s3049_s23 = smov [#allocation7]   ;;  %s3050_s26 = smov [#allocation10]  }
  0x22   : > { %s3773_s22 = scalar_select %p3206_p1, 1, 0 }
  0x23   : > { %p3211_p3 = pnand %p2249_p0, %p484_p2  ;;  %s496_s24 = sshll.u32 %s3049_s23, 4  ;;  %s3215_s24 = int_to_ptr.vmem [resolvable:$true] %s496_s24 }
  0x24   : > { %s528_s21 = sshll.u32 %s3050_s26, 4  ;;  %s3051_s18 = smov [#allocation9]   ;;  %s3225_s21 = int_to_ptr.vmem [resolvable:$true] %s528_s21 }
  0x25   : > { %s3774_s2 = scalar_select %p3211_p3, 1, 0 }
  0x26   : > { %p2601_p4 = pneg %p3211_p3  ;;  %s3227_s15 = sshll.u32 %s3051_s18, 4  ;;  %s513_s15 = int_to_ptr.vmem [resolvable:$true] %s3227_s15 }
  0x27   : > { %s3776_s4 = sld [smem:[#allocation29_spill]] }
  0x28   : > { %p3221_p5 = pnand %p2601_p4, %p3206_p1 }
  0x2a   : > { %p3237_p7 = pneg %p3221_p5 }
  0x2d   : > { %s2767_s23 = scalar_lea.hbm %s3776_s4, 512 }
  0x2e   : > { %p2768_p6 = scmp.ne.s32.totalorder %s3776_s4, %s2767_s23  ;;  %p2774_p10 = scmp.lt.u32.totalorder %s2767_s23, %s3776_s4 }
  0x30   : > { %p2770_p8 = pnand %p3237_p7, %p2768_p6 }
  0x32   : > { %p2771_p9 = pneg %p2770_p8 }
  0x34   : > { %p2776_p11 = pnand %p2774_p10, %p2771_p9 }
  0x36   : > { %2779 = shalt.err (!%p2776_p11)
}
  0x37   : > { %s2780_s13 = scalar_lea.vmem %s3215_s24, 512  ;;  %p2788_p2 = scmp.lt.s32.totalorder %s3215_s24, %s3215_s24 }
  0x38   : > { %p2781_p12 = scmp.ne.s32.totalorder %s3215_s24, %s2780_s13  ;;  %p2789_p4 = scmp.lt.s32.totalorder %s2780_s13, %s2780_s13 }
  0x3a   : > { %p2783_p13 = pnand %p2781_p12, %p3237_p7  ;;  %p2790_p6 = por %p2789_p4, %p2788_p2 }
  0x3c   : > { %p2784_p0 = pneg %p2783_p13 }
  0x3e   : > { %p2791_p8 = pnand %p2790_p6, %p2784_p0 }
  0x40   : > { %2794 = shalt.err (!%p2791_p8)
}
  0x41   : > { %s3052_s14 = smov 128   ;;  %s3053_s16 = smov 8  }
  0x42   : > { %2604 = dma.hbm_to_vmem [thread:$0]  (!%p3221_p5), %s3776_s4, 512, %s3215_s24, [#allocation8], %s3052_s14, %s3052_s14, %s3053_s16  }
  0x43   : > { %s3778_s8 = sld [smem:[#allocation33_spill]] }
  0x49   : > { %s2795_s13 = scalar_lea.hbm %s3778_s8, 512 }
  0x4a   : > { %p2796_p9 = scmp.ne.s32.totalorder %s3778_s8, %s2795_s13  ;;  %p2802_p12 = scmp.lt.u32.totalorder %s2795_s13, %s3778_s8 }
  0x4c   : > { %p2798_p10 = pnand %p2796_p9, %p3237_p7 }
  0x4e   : > { %p2799_p11 = pneg %p2798_p10 }
  0x50   : > { %p2804_p13 = pnand %p2802_p12, %p2799_p11 }
  0x52   : > { %2807 = shalt.err (!%p2804_p13)
}
  0x53   : > { %s2808_s24 = scalar_lea.vmem %s3225_s21, 512  ;;  %p2816_p6 = scmp.lt.s32.totalorder %s3225_s21, %s3225_s21 }
  0x54   : > { %p2809_p0 = scmp.ne.s32.totalorder %s3225_s21, %s2808_s24  ;;  %p2817_p8 = scmp.lt.s32.totalorder %s2808_s24, %s2808_s24 }
  0x56   : > { %p2811_p2 = pnand %p2809_p0, %p3237_p7  ;;  %p2818_p9 = por %p2817_p8, %p2816_p6 }
  0x58   : > { %p2812_p4 = pneg %p2811_p2 }
  0x5a   : > { %p2819_p10 = pnand %p2818_p9, %p2812_p4 }
  0x5c   : > { %2822 = shalt.err (!%p2819_p10)
}
  0x5d   : > { %2610 = dma.hbm_to_vmem [thread:$0]  (!%p3221_p5), %s3778_s8, 512, %s3225_s21, [#allocation11], %s3052_s14, %s3052_s14, %s3053_s16  }
  0x5e   : > { %s3779_s6 = sld [smem:[#allocation31_spill]] }
  0x64   : > { %s2823_s17 = scalar_lea.hbm %s3779_s6, 512 }
  0x65   : > { %p2824_p11 = scmp.ne.s32.totalorder %s3779_s6, %s2823_s17  ;;  %p2830_p0 = scmp.lt.u32.totalorder %s2823_s17, %s3779_s6 }
  0x67   : > { %p2826_p12 = pnand %p2824_p11, %p3237_p7 }
  0x69   : > { %p2827_p13 = pneg %p2826_p12 }
  0x6b   : > { %p2832_p2 = pnand %p2830_p0, %p2827_p13 }
  0x6d   : > { %2835 = shalt.err (!%p2832_p2)
}
  0x6e   : > { %s2836_s24 = scalar_lea.vmem %s513_s15, 512  ;;  %p2844_p9 = scmp.lt.s32.totalorder %s513_s15, %s513_s15 }
  0x6f   : > { %p2837_p4 = scmp.ne.s32.totalorder %s513_s15, %s2836_s24  ;;  %p2845_p10 = scmp.lt.s32.totalorder %s2836_s24, %s2836_s24 }
  0x71   : > { %p2839_p6 = pnand %p2837_p4, %p3237_p7  ;;  %p2846_p3 = por %p2845_p10, %p2844_p9 }
  0x73   : > { %p2840_p8 = pneg %p2839_p6 }
  0x75   : > { %p2847_p1 = pnand %p2846_p3, %p2840_p8 }
  0x77   : > { %2850 = shalt.err (!%p2847_p1)
}
  0x78   : > { %2607 = dma.hbm_to_vmem [thread:$0]  (!%p3221_p5), %s3779_s6, 512, %s513_s15, [#allocation8], %s3052_s14, %s3052_s14, %s3053_s16  }
  0x79   : > { %s3054_s7 = smov [#allocation12]   ;;  %s3055_s30 = smov [#allocation13]  }
  0x7a   : > { %s544_s9 = sshll.u32 %s3054_s7, 4  ;;  %s560_s17 = sshll.u32 %s3055_s30, 4  ;;  %s545_s9 = int_to_ptr.vmem [resolvable:$true] %s544_s9  ;;  %s561_s17 = int_to_ptr.vmem [resolvable:$true] %s560_s17 }
  0x7b   : > { %s3780_s10 = sld [smem:[#allocation35_spill]] }
  0x81   : > { %s2851_s18 = scalar_lea.hbm %s3780_s10, 512 }
  0x82   : > { %p2852_p1 = scmp.ne.s32.totalorder %s3780_s10, %s2851_s18  ;;  %p2858_p12 = scmp.lt.u32.totalorder %s2851_s18, %s3780_s10 }
  0x84   : > { %p2854_p3 = pnand %p2852_p1, %p3237_p7 }
  0x86   : > { %p2855_p11 = pneg %p2854_p3 }
  0x88   : > { %p2860_p13 = pnand %p2858_p12, %p2855_p11 }
  0x8a   : > { %2863 = shalt.err (!%p2860_p13)
}
  0x8b   : > { %s2864_s15 = scalar_lea.vmem %s545_s9, 512  ;;  %p2872_p6 = scmp.lt.s32.totalorder %s545_s9, %s545_s9 }
  0x8c   : > { %p2865_p0 = scmp.ne.s32.totalorder %s545_s9, %s2864_s15  ;;  %p2873_p8 = scmp.lt.s32.totalorder %s2864_s15, %s2864_s15 }
  0x8e   : > { %p2867_p2 = pnand %p2865_p0, %p3237_p7  ;;  %p2874_p9 = por %p2873_p8, %p2872_p6 }
  0x90   : > { %p2868_p4 = pneg %p2867_p2 }
  0x92   : > { %p2875_p10 = pnand %p2874_p9, %p2868_p4 }
  0x94   : > { %2878 = shalt.err (!%p2875_p10)
}
  0x95   : > { %2613 = dma.hbm_to_vmem [thread:$0]  (!%p3221_p5), %s3780_s10, 512, %s545_s9, [#allocation11], %s3052_s14, %s3052_s14, %s3053_s16  }
  0x96   : > { %s3781_s12 = sld [smem:[#allocation37_spill]] }
  0x9c   : > { %s2879_s23 = scalar_lea.hbm %s3781_s12, 512 }
  0x9d   : > { %p2880_p1 = scmp.ne.s32.totalorder %s3781_s12, %s2879_s23  ;;  %p2886_p12 = scmp.lt.u32.totalorder %s2879_s23, %s3781_s12 }
  0x9f   : > { %p2882_p3 = pnand %p2880_p1, %p3237_p7 }
  0xa1   : > { %p2883_p11 = pneg %p2882_p3 }
  0xa3   : > { %p2888_p13 = pnand %p2886_p12, %p2883_p11 }
  0xa5   : > { %2891 = shalt.err (!%p2888_p13)
}
  0xa6   : > { %s2892_s21 = scalar_lea.vmem %s561_s17, 512  ;;  %p2900_p6 = scmp.lt.s32.totalorder %s561_s17, %s561_s17 }
  0xa7   : > { %p2893_p0 = scmp.ne.s32.totalorder %s561_s17, %s2892_s21  ;;  %p2901_p8 = scmp.lt.s32.totalorder %s2892_s21, %s2892_s21 }
  0xa9   : > { %p2895_p2 = pnand %p2893_p0, %p3237_p7  ;;  %p2902_p9 = por %p2901_p8, %p2900_p6 }
  0xab   : > { %p2896_p4 = pneg %p2895_p2 }
  0xad   : > { %p2903_p10 = pnand %p2902_p9, %p2896_p4 }
  0xaf   : > { %2906 = shalt.err (!%p2903_p10)
}
  0xb0   : > { %2616 = dma.hbm_to_vmem [thread:$0]  (!%p3221_p5), %s3781_s12, 512, %s561_s17, [#allocation14], %s3052_s14, %s3052_s14, %s3053_s16  }
  0xb1   : > { %s2248_s11 = sadd.s32 4294967294, %s3047_s20   ;;  %s46_s25 = sadd.s32 1, %s3039_s19 }
  0xb2   : > { %s49_s4 = sadd.s32 1, %s3043_s1  ;;  %p47_p7 = scmp.ge.s32.totalorder %s46_s25, 2 }
  0xb3   : > { %s138_s5 = sadd.s32 1, %s3027_s29  ;;  %p145_p1 = scmp.ne.s32.totalorder %s3027_s29, %s3023_s28 }
  0xb4   : > { %p146_p3 = scmp.eq.s32.totalorder %s3047_s20, 0  ;;  %s3822_s25 = smov (%p47_p7, %s46_s25), 0 }
  0xb5   : > { %3782 = sst [smem:[#allocation23_spill]] %s3822_s25  ;;  %s3824_s4 = smov (!%p47_p7, %s49_s4), %s3043_s1 }
  0xb6   : > { %s134_s7 = ssub.s32 %s3039_s19, %s3822_s25  ;;  %p3363_p11 = por %p146_p3, %p145_p1 }
  0xb7   : > { %p51_p5 = scmp.ge.s32.totalorder %s3824_s4, 2  ;;  %p151_p12 = scmp.ne.s32.totalorder %s3023_s28, %s3019_s27 }
  0xb8   : > { %s3784_s14 = sadd.s32 4294967295, %s3047_s20   ;;  %p477_p0 = scmp.eq.s32.totalorder %s2248_s11, 3 }
  0xb9   : > { %p471_p13 = scmp.eq.s32.totalorder %s3784_s14, 3  ;;  %s3826_s4 = smov (%p51_p5, %s3824_s4), 0 }
  0xba   : > { %3785 = sst [smem:[#allocation24_spill]] %s3826_s4  ;;  %p3786_p2 = scmp.ne.s32.totalorder %s3773_s22, 0 }
  0xbb   : > { %p3379_p6 = por %p471_p13, %p145_p1  ;;  %s133_s23 = ssub.s32 %s3043_s1, %s3826_s4 }
  0xbc   : > { %p3375_p4 = por %p3786_p2, %p151_p12  ;;  %p3385_p8 = por %p477_p0, %p151_p12 }
  0xbd   : > { %s3788_s17 = scalar_select %p3379_p6, 1, 0 }
  0xbe   : > { %s3789_s26 = scalar_select %p3385_p8, 1, 0 }
  0xbf   : > { %s135_s18 = sor.u32 %s134_s7, %s133_s23  ;;  %p2630_p9 = scmp.lt.s32.totalorder %s3047_s20, 4 }
  0xc0   : > { %p136_p10 = scmp.eq.s32.totalorder %s135_s18, 0  ;;  %s616_s13 = sand.u32 1, %s3027_s29  }
  0xc1   : > { %s2256_s24 = sshll.u32 %s616_s13, 3  ;;  %s2257_s9 = sshll.u32 %s3043_s1, 1 }
  0xc2   : > { %s3392_s21 = scalar_select %p136_p10, %s3027_s29, %s138_s5  }
  0xc3   : > { %s625_s15 = sadd.s32 %s3039_s19, %s2257_s9  ;;  %s620_s11 = scalar_lea.vmem [#allocation4], %s2256_s24 }
  0xc4   : > { %s629_s14 = sshll.u32 %s620_s11, 4  ;;  %s2258_s6 = sshll.u32 %s625_s15, 7  ;;  %s3396_s14 = int_to_ptr.vmem [resolvable:$true] %s629_s14 }
  0xc5   : > { %s3790_s3 = sld [smem:[#allocation28_spill]]  ;;  %p3405_p7 = pnand %p2630_p9, %p3363_p11 }
  0xc6   : > { %s617_s7 = scalar_lea.sflag [#allocation5], %s616_s13 }
  0xc7   : > { %p2909_p3 = pneg %p3405_p7 }
  0xcb   : > { %s3401_s12 = scalar_lea.hbm %s3790_s3, %s2258_s6  ;;  %s2912_s10 = scalar_lea.hbm %s3790_s3, 512 }
  0xcc   : > { %s2907_s23 = scalar_lea.hbm %s3401_s12, 128  ;;  %p2913_p11 = scmp.lt.u32.totalorder %s3401_s12, %s3790_s3 }
  0xcd   : > { %p2908_p1 = scmp.ne.s32.totalorder %s3401_s12, %s2907_s23  ;;  %p2914_p13 = scmp.lt.u32.totalorder %s2912_s10, %s2907_s23 }
  0xce   : > { %p2916_p2 = scmp.lt.u32.totalorder %s2907_s23, %s3401_s12 }
  0xcf   : > { %p2910_p5 = pnand %p2909_p3, %p2908_p1  ;;  %p2915_p0 = por %p2914_p13, %p2913_p11 }
  0xd1   : > { %p2911_p12 = pneg %p2910_p5  ;;  %p2917_p9 = por %p2916_p2, %p2915_p0 }
  0xd3   : > { %p2918_p10 = pnand %p2917_p9, %p2911_p12 }
  0xd5   : > { %2921 = shalt.err (!%p2918_p10)
}
  0xd6   : > { %s2922_s13 = scalar_lea.vmem %s3396_s14, 128  ;;  %s3056_s24 = smov [#allocation4]  }
  0xd7   : > { %p2923_p1 = scmp.ne.s32.totalorder %s3396_s14, %s2922_s13  ;;  %s2927_s9 = sshll.u32 %s3056_s24, 4  ;;  %s2928_s9 = int_to_ptr.vmem [resolvable:$false] %s2927_s9 }
  0xd8   : > { %s2929_s15 = scalar_lea.vmem %s2928_s9, 256  ;;  %p2930_p6 = scmp.lt.s32.totalorder %s3396_s14, %s2928_s9 }
  0xd9   : > { %p2925_p5 = pnand %p2923_p1, %p2909_p3  ;;  %p2931_p11 = scmp.lt.s32.totalorder %s2929_s15, %s2922_s13 }
  0xdb   : > { %p2926_p8 = pneg %p2925_p5  ;;  %p2932_p13 = por %p2931_p11, %p2930_p6 }
  0xdd   : > { %p2933_p0 = pnand %p2932_p13, %p2926_p8 }
  0xdf   : > { %2936 = shalt.err (!%p2933_p0)
}
  0xe0   : > { %2620 = dma.hbm_to_vmem [thread:$0]  (!%p3405_p7), %s3401_s12, 128, %s3396_s14, %s617_s7  }
  0xe1   : > { %p3792_p12 = scmp.ne.s32.totalorder %s3774_s2, 0 }
  0xe2   : > { %s3437_s11 = sand.u32 (!%p3792_p12), 1, %s3023_s28  }
  0xe3   : > { %638 = sbr.rel (%p3792_p12) target bundleno = 4039 (0xfc7), region = 92  ;;  %s2260_s23 = sshll.u32 (!%p3792_p12), %s3437_s11, 3 }
  0xe4   : > { %s641_s6 = scalar_lea.sflag (!%p3792_p12), [#allocation5], %s3437_s11  ;;  %s644_s8 = scalar_lea.vmem (!%p3792_p12), [#allocation4], %s2260_s23 }
  0xea   : > { %2998 = dma.done.wait (%p3375_p4), %s641_s6, 128  }
  0xeb   : > { %3000 = vsyncadd (%p3375_p4), %s641_s6, 4294967168  ;;  %p3793_p6 = scmp.ne.s32.totalorder %s3773_s22, 0 }
  0xed   : > { %3002 = dma.done.wait (%p3793_p6), [#allocation8], 1024  }
  0xee   : > { %3004 = vsyncadd (%p3793_p6), [#allocation8], 4294966272 }
  0xef   : > { %3006 = dma.done.wait (%p3793_p6), [#allocation11], 1024  }
  0xf0   : > { %3008 = vsyncadd (%p3793_p6), [#allocation11], 4294966272 }
  0xf1   : > { %3010 = dma.done.wait (%p3793_p6), [#allocation14], 512  }
  0xf2   : > { %3012 = vsyncadd (%p3793_p6), [#allocation14], 4294966784  ;;  %s3794_s12 = sld [smem:[#allocation21_spill]]  ;;  %p735_p4 = scmp.lt.s32.totalorder %s3035_s0, 1  ;;  %v3474_v0 = vld [vmem:[%s644_s8] sm:$0xff] }
  0xf3   : > { %s3795_s18 = sld [smem:[#allocation26_spill]]  ;;  %s3796_s15 = sld [smem:[#allocation27_spill]] }
  0xf4   : > { %s736_s2 = scalar_select %p735_p4, %s3035_s0, 1 }
  0xf5   : > { %s3797_s25 = sld [smem:[#allocation25_spill]] }
  0xf6   : > { %s2267_s14 = sshll.u32 %s736_s2, 1  ;;  %s2311_s5 = sshll.u32 %s736_s2, 4 }
  0xf7   : > { %s3478_s2 = scalar_lea.vmem [#allocation15], %s2260_s23 }
  0xf8   : > { %p737_p8 = scmp.lt.s32.totalorder %s3794_s12, 1  ;;  %p2273_p7 = scmp.ne.s32.totalorder %s3794_s12, 0 }
  0xf9   : > { %s3464_s13 = scalar_lea.vmem %s3795_s18, %s2311_s5  ;;  %s3469_s6 = scalar_lea.vmem %s3796_s15, %s2311_s5  ;;  %v761_v2 = vld [vmem:[#allocation9] sm:$0xff] (!%p2273_p7)  ;;  %v762_v3 = vld [vmem:[#allocation9 + $0x8] sm:$0xff] (!%p2273_p7)  ;;  %vm772_vm0 = vcmask (!%p2273_p7), 261120   ;;  %v763_v7 = vld [vmem:[#allocation9 + $0x10] sm:$0xff] (!%p2273_p7) }
  0xfa   : > { %s738_s16 = scalar_select %p737_p8, %s3794_s12, 1 }
  0xfb   : > { %758 = sbr.rel (%p2273_p7) target bundleno = 478 (0x1de), region = 120  ;;  %v856_v4 = vld [vmem:[#allocation10] sm:$0xff] (!%p2273_p7)  ;;  %v2503_v5 = vpack.c.bf16 (!%p2273_p7), %v762_v3, %v761_v2  ;;  %v857_v6 = vld [vmem:[#allocation10 + $0x8] sm:$0xff] (!%p2273_p7)  ;;  %v764_v8 = vld [vmem:[#allocation9 + $0x18] sm:$0xff] (!%p2273_p7)  ;;  %s3799_s8 = sld [smem:[#allocation34_spill]] (!%p2273_p7) }
  0xfc   : > { %s740_s7 = sadd.s32 %s2267_s14, %s738_s16  ;;  %v2511_v9 = vpack.c.bf16 (!%p2273_p7), %v857_v6, %v856_v4  ;;  %v2507_v10 = vpack.c.bf16 (!%p2273_p7), %v764_v8, %v763_v7  ;;  %v858_v11 = vld [vmem:[#allocation10 + $0x10] sm:$0xff] (!%p2273_p7)  ;;  %v859_v12 = vld [vmem:[#allocation10 + $0x18] sm:$0xff] (!%p2273_p7) }
  0xfd   : > { %s2268_s24 = sshll.u32 %s740_s7, 3  ;;  %v759_v13 = vld [vmem:[%s3464_s13] sm:$0xff] (!%p2273_p7)  ;;  %2504 = vmatprep.subr.bf16.mxu0 (!%p2273_p7), %v2503_v5  ;;  %v2515_v14 = vpack.c.bf16 (!%p2273_p7), %v859_v12, %v858_v11  ;;  %v760_v16 = vld [vmem:[%s3464_s13 + $0x8] sm:$0xff] (!%p2273_p7) }
  0xfe   : > { %s742_s1 = scalar_lea.vmem %s3797_s25, %s2268_s24  ;;  %2381 = vmatprep.mubr.msk.f32.mxu0 (!%p2273_p7), %vm772_vm0, %v759_v13  ;;  %v854_v15 = vld [vmem:[%s3469_s6] sm:$0xff] (!%p2273_p7)  ;;  %2512 = vmatprep.subr.bf16.mxu1 (!%p2273_p7), %v2511_v9  ;;  %v855_v17 = vld [vmem:[%s3469_s6 + $0x8] sm:$0xff] (!%p2273_p7)  ;;  %s3798_s25 = sld [smem:[#allocation32_spill]] (!%p2273_p7) }
  0xff   : > { %v3476_v1 = vld [vmem:[%s742_s1] sm:$0xff]  ;;  %2506 = vmatpush3.bf16.msra.mxu0 (!%p2273_p7), %v2503_v5  ;;  %2514 = vmatpush3.bf16.msra.mxu1 (!%p2273_p7), %v2511_v9 }
 0x100   : > { %2508 = vmatprep.subr.bf16.mxu0 (!%p2273_p7), %v2507_v10  ;;  %2516 = vmatprep.subr.bf16.mxu1 (!%p2273_p7), %v2515_v14 }
 0x101   : > { %2392 = vmatprep.mubr.msk.f32.mxu1 (!%p2273_p7), %vm772_vm0, %v854_v15  ;;  %v2277_v19 = vld [vmem:[%s3799_s8] ss:$0 sm:$0xff] (!%p2273_p7) }
 0x103   : > { %2510 = vmatpush3.bf16.msra.mxu0 %v2507_v10  ;;  %2518 = vmatpush3.bf16.msra.mxu1 %v2515_v14 }
 0x104   : > { %v2274_v18 = vld [vmem:[%s3798_s25] ss:$0 sm:$0xff] }
 0x106   : > { %2382 = vmatmul.mubr.msk.f32.vlgmr.msra.gmra.mrb[0].mxu0 %vm772_vm0, %v760_v16  ;;  %2393 = vmatmul.mubr.msk.f32.vlgmr.msra.gmra.mrb[0].mxu1 %vm772_vm0, %v855_v17 }
 0x1d9   : > { %v2383_v20 = vpop.f32.mrb[0].mxu0  ;;  %v2394_v22 = vpop.f32.mrb[0].mxu1 }
 0x1da   : > { %v851_v21 = vadd.f32 %v2383_v20, %v2274_v18  ;;  %v845_v23 = vpop.f32.mrb[1].mxu0  ;;  %v945_v24 = vadd.f32 %v2394_v22, %v2277_v19  ;;  %v939_v26 = vpop.f32.mrb[1].mxu1 }
 0x1db   : > { %v846_v25 = vadd.f32 %v2274_v18, %v845_v23  ;;  %v940_v27 = vadd.f32 %v2277_v19, %v939_v26 }
 0x1dc   : > { %949 = vst.msk [vmem:[#allocation2 + $0x8] sm:$0xff] %vm772_vm0, %v851_v21  ;;  %951 = vst.msk [vmem:[#allocation3 + $0x8] sm:$0xff] %vm772_vm0, %v945_v24 }
 0x1dd   : > { %948 = vst.msk [vmem:[#allocation2] sm:$0xff] %vm772_vm0, %v846_v25  ;;  %950 = vst.msk [vmem:[#allocation3] sm:$0xff] %vm772_vm0, %v940_v27 }
 0x1de PF: > { %v954_v28 = vld [vmem:[#allocation7] sm:$0xff]  ;;  %v955_v29 = vld [vmem:[#allocation7 + $0x8] sm:$0xff]  ;;  %v956_v30 = vld [vmem:[#allocation7 + $0x10] sm:$0xff]  ;;  %v3057_v31 = vmov 0.0|0.0   ;;  %vm3058_vm1 = vmmov 0   ;;  %v3059_v34 = vmov 0.0  }
 0x1df   : > { %2519 = vmatprep.subr.bf16.mxu1 %v3057_v31  ;;  %v2520_v32 = vpack.c.bf16 %v955_v29, %v954_v28  ;;  %v957_v33 = vld [vmem:[#allocation7 + $0x18] sm:$0xff]  ;;  %2403 = vmatprep.mubr.msk.f32.mxu1 %vm3058_vm1, %v3059_v34  ;;  %s3060_s12 = smov 120   ;;  %vm965_vm2 = vcmask 261120   ;;  %vm1043_vm3 = vcmask 64512   ;;  %s3802_s5 = sld [smem:[#allocation30_spill]]  ;;  %vm952_vm5 = vcmp.eq.f32.partialorder %v3474_v0, 0.0 }
 0x1e0   : > { %2529 = vmatprep.subr.bf16.mxu0 %v3057_v31  ;;  %2417 = vmatprep.mubr.msk.f32.mxu0 %vm3058_vm1, %v3059_v34  ;;  %v2523_v38 = vpack.c.bf16 %v957_v33, %v956_v30  ;;  %vm3517_vm4 = vmpackc.low %vm1043_vm3, %vm1043_vm3  ;;  %v3543_v51 = vsel %vm952_vm5, -10000.0, %v3059_v34  ;;  %vm1125_vm6 = vcmask 130048   ;;  %s3061_s7 = smov 112   ;;  %s3062_s10 = smov 104   ;;  %vm1748_vm7 = vcmask 195584  }
 0x1e1   : > { %2521 = vmatpush3.bf16.msra.mxu1 %v2520_v32  ;;  %s3063_s30 = smov 8   ;;  %s3064_s18 = smov 16   ;;  %vm1965_vm8 = vcmask 523264  }
 0x1e2   : > { %2522 = vmatprep.subr.bf16.mxu1 %v3057_v31  ;;  %s3065_s13 = smov 24   ;;  %s3803_s22 = sld [smem:[#allocation36_spill]] }
 0x1e3   : > { %v1040_v36 = vld [vmem:[#allocation2 + $0x8] sm:$0xff]  ;;  %v1042_v62 = vld [vmem:[#allocation3 + $0x8] sm:$0xff]  ;;  %s3804_s3 = sld [smem:[#allocation39_spill]]  ;;  %s3806_s9 = sld [smem:[#allocation42_spill]] }
 0x1e4   : > { %v1039_v35 = vld [vmem:[#allocation2] sm:$0xff]  ;;  %v1041_v61 = vld [vmem:[#allocation3] sm:$0xff]  ;;  %s3807_s23 = sld [smem:[#allocation38_spill]]  ;;  %s3808_s16 = sld [smem:[#allocation40_spill]] }
 0x1e5   : > { %v3502_v37 = vpack.i.bf16 %v1040_v36, %v1039_v35  ;;  %2524 = vmatpush3.bf16.msra.mxu1 %v2523_v38  ;;  %v2526_v39 = vpack.c.bf16 %v1040_v36, %v1039_v35  ;;  %v2280_v44 = vld [vmem:[%s3802_s5] ss:$0 sm:$0xff]  ;;  %v3549_v63 = vpack.i.bf16 %v1042_v62, %v1041_v61  ;;  %v2530_v6 = vpack.c.bf16 %v1042_v62, %v1041_v61  ;;  %s3809_s14 = sld [smem:[#allocation21_spill]]  ;;  %s2307_s5 = sshll.u32 %s3035_s0, 1 }
 0x1e6   : > { %2525 = vmatprep.subr.bf16.mxu1 %v3057_v31  ;;  %s3810_s24 = sld [smem:[#allocation43_spill]]  ;;  %s2057_s0 = scalar_lea.sflag [#allocation6], %s3437_s11 }
 0x1e7   : > { %2718 = vrot.lane.b32.xlu0 %v3502_v37, %s3060_s12  ;;  %2531 = vmatpush3.bf16.msra.mxu0 %v2530_v6  ;;  %p3811_p2 = scmp.ne.s32.totalorder %s3788_s17, 0  ;;  %s3066_s15 = smov [#allocation15]  }
 0x1e8   : > { %2404 = vmatmul.mubr.msk.f32.vlgmr.msra.gmra.mrb[0].mxu1 %vm965_vm2, %v3476_v1  ;;  %2536 = vmatprep.subr.bf16.mxu0 %v3057_v31  ;;  %s2941_s6 = sshll.u32 %s3066_s15, 4  ;;  %s2942_s6 = int_to_ptr.vmem [resolvable:$false] %s2941_s6 }
 0x1e9   : > { %2410 = vmatprep.mubr.msk.f32.mxu1 %vm3058_vm1, %v3059_v34  ;;  %s2943_s1 = scalar_lea.vmem %s2942_s6, 256 }
 0x1ee   : > { %2528 = vmatpush3.bf16.xpose.msk.msra.mxu1 %vm3517_vm4, %v2526_v39 }
 0x1ef   : > { %2532 = vmatprep.subr.bf16.mxu1 %v3057_v31 }
 0x259   : > { %v2719_v41 = vpop.permute.xlu0 %2718 }
 0x25a   : > { %v2721_v42 = vunpack.i.h.bf16 %v2719_v41  ;;  %v2720_v43 = vunpack.i.l.bf16 %v2719_v41 }
 0x25c   : > { %v2533_v46 = vpack.c.bf16 %v2721_v42, %v2720_v43 }
 0x2bb   : > { %v1035_v45 = vpop.f32.mrb[0].mxu1 }
 0x2bc   : > { %v3527_v47 = vadd.f32 %v2280_v44, %v1035_v45  ;;  %v2405_v48 = vpop.f32.mrb[1].mxu1 }
 0x2be   : > { %1210 = vrot.lane.b32.xlu0 %v3527_v47, %s3060_s12  ;;  %2411 = vmatmul.mubr.msk.f32.vlgmr.msra.gmra.mrb[2].mxu1 %vm1043_vm3, %v3527_v47 }
 0x2bf   : > { %2535 = vmatpush3.bf16.xpose.msk.msra.mxu1 %vm3517_vm4, %v2533_v46  ;;  %2424 = vmatprep.mubr.msk.f32.mxu1 %vm3058_vm1, %v3059_v34 }
 0x2c0   : > { %2543 = vmatprep.subr.bf16.mxu1 %v3057_v31 }
 0x330   : > { %v1211_v49 = vpop.permute.xlu0 %1210 }
 0x331   : > { %2425 = vmatmul.mubr.msk.f32.vlgmr.msra.gmra.mrb[4].mxu1 %vm1043_vm3, %v1211_v49 }
 0x332   : > { %2445 = vmatprep.mubr.msk.f32.mxu1 %vm3058_vm1, %v3059_v34 }
 0x391   : > { %v1119_v50 = vpop.f32.mrb[2].mxu1 }
 0x392   : > { %v1123_v52 = vmul.f32 0.35355338, %v1119_v50  ;;  %v2412_v53 = vpop.f32.mrb[3].mxu1 }
 0x394   : > { %v1124_v54 = vadd.f32 %v1123_v52, %v3543_v51 }
 0x396   : > { %v1126_v55 = vsel %vm1125_vm6, %v1124_v54, -inf }
 0x397   : > { %1127 = vmax.xlane.f32.xlu1 %v1126_v55 }
 0x404   : > { %v1288_v56 = vpop.f32.mrb[4].mxu1 }
 0x405   : > { %v1292_v57 = vmul.f32 0.35355338, %v1288_v56  ;;  %v2426_v58 = vpop.f32.mrb[5].mxu1 }
 0x407   : > { %v1293_v59 = vadd.f32 %v1292_v57, %v3543_v51 }
 0x409   : > { %v1294_v60 = vsel %vm1125_vm6, %v1293_v59, -inf }
 0x40a   : > { %1295 = vmax.xlane.f32.xlu1 %v1294_v60 }
 0x41b   : > { %2723 = vrot.lane.b32.xlu1 %v3549_v63, %s3060_s12 }
 0x41f   : > { %2728 = vrot.lane.b32.xlu1 %v3502_v37, %s3061_s7 }
 0x424   : > { %v1128_v0 = vpop.xlane.xlu1 %1127 }
 0x425   : > { %v1129_v2 = vsub.f32 %v1124_v54, %v1128_v0 }
 0x427   : > { %v1130_v3 = vmul.f32 1.442695, %v1129_v2 }
 0x429   : > { %2747 = vpow2.f32 %v1130_v3 }
 0x433   : > { %v2748_v4 = vpop.eup %2747 }
 0x434   : > { %v1132_v5 = vsel %vm1125_vm6, %v2748_v4, 0.0 }
 0x435   : > { %1133 = vadd.xlane.f32.xlu0 %v1132_v5 }
 0x44b   : > { %2733 = vrot.lane.b32.xlu0 %v3549_v63, %s3061_s7 }
 0x497   : > { %v1296_v7 = vpop.xlane.xlu1 %1295 }
 0x498   : > { %v1297_v8 = vsub.f32 %v1293_v59, %v1296_v7 }
 0x49a   : > { %v1298_v9 = vmul.f32 1.442695, %v1297_v8 }
 0x49b   : > { %v2724_v13 = vpop.permute.xlu1 %2723 }
 0x49c   : > { %2749 = vpow2.f32 %v1298_v9  ;;  %v2726_v14 = vunpack.i.h.bf16 %v2724_v13  ;;  %v2725_v15 = vunpack.i.l.bf16 %v2724_v13  ;;  %v1754_v13 = vld [vmem:[#allocation12 + $0x10] sm:$0xff] }
 0x49e   : > { %v2537_v17 = vpack.c.bf16 %v2726_v14, %v2725_v15  ;;  %v1755_v15 = vld [vmem:[#allocation12 + $0x18] sm:$0xff] }
 0x49f   : > { %v2729_v19 = vpop.permute.xlu1 %2728 }
 0x4a0   : > { %v2731_v21 = vunpack.i.h.bf16 %v2729_v19  ;;  %v2730_v22 = vunpack.i.l.bf16 %v2729_v19 }
 0x4a2   : > { %v2540_v25 = vpack.c.bf16 %v2731_v21, %v2730_v22 }
 0x4a6   : > { %v2750_v10 = vpop.eup %2749 }
 0x4a7   : > { %v1300_v11 = vsel %vm1125_vm6, %v2750_v10, 0.0 }
 0x4a8   : > { %1301 = vadd.xlane.f32.xlu1 %v1300_v11 }
 0x4b9   : > { %1386 = vrot.lane.b32.xlu1 %v3527_v47, %s3061_s7  ;;  %s2068_s7 = sadd.s32 %s3809_s14, %s2307_s5 }
 0x4c2   : > { %v1134_v12 = vpop.xlane.xlu0 %1133 }
 0x4c3   : > { %2751 = vrcp.f32 %v1134_v12  ;;  %v1753_v12 = vld [vmem:[#allocation12 + $0x8] sm:$0xff] }
 0x4c6   : > { %v2734_v39 = vpop.permute.xlu0 %2733 }
 0x4c7   : > { %v2736_v41 = vunpack.i.h.bf16 %v2734_v39  ;;  %v2735_v42 = vunpack.i.l.bf16 %v2734_v39  ;;  %v1866_v39 = vld [vmem:[#allocation13 + $0x8] sm:$0xff] }
 0x4c9   : > { %v2544_v43 = vpack.c.bf16 %v2736_v41, %v2735_v42  ;;  %v1867_v42 = vld [vmem:[#allocation13 + $0x10] sm:$0xff] }
 0x4cb   : > { %2545 = vmatpush3.bf16.msra.mxu1 %v2544_v43  ;;  %v1868_v43 = vld [vmem:[#allocation13 + $0x18] sm:$0xff] }
 0x4cc   : > { %2546 = vmatprep.subr.bf16.mxu1 %v3057_v31 }
 0x4cd   : > { %v2752_v16 = vpop.eup %2751 }
 0x4ce   : > { %v1136_v18 = vmul.f32 %v2752_v16, %v2748_v4  ;;  %v2557_v16 = vpack.c.bf16 %v1755_v15, %v1754_v13 }
 0x4d0   : > { %2418 = vmatmul.mubr.msk.f32.vlgmr.msra.gmra.mrb[0].mxu0 %vm1125_vm6, %v1136_v18 }
 0x4d1   : > { %2538 = vmatpush3.bf16.msra.mxu0 %v2537_v17  ;;  %2431 = vmatprep.mubr.msk.f32.mxu0 %vm3058_vm1, %v3059_v34 }
 0x4d2   : > { %2539 = vmatprep.subr.bf16.mxu0 %v3057_v31 }
 0x535   : > { %v1302_v20 = vpop.xlane.xlu1 %1301 }
 0x536   : > { %2753 = vrcp.f32 %v1302_v20 }
 0x539   : > { %v1387_v26 = vpop.permute.xlu1 %1386 }
 0x540   : > { %v2754_v23 = vpop.eup %2753 }
 0x541   : > { %v1304_v24 = vmul.f32 %v2754_v23, %v2750_v10 }
 0x543   : > { %2432 = vmatmul.mubr.msk.f32.vlgmr.msra.gmra.mrb[2].mxu0 %vm1125_vm6, %v1304_v24 }
 0x544   : > { %2542 = vmatpush3.bf16.xpose.msk.msra.mxu0 %vm3517_vm4, %v2540_v25  ;;  %2438 = vmatprep.mubr.msk.f32.mxu0 %vm3058_vm1, %v3059_v34  ;;  %v2298_v25 = vld [vmem:[%s3803_s22] ss:$0 sm:$0xff] }
 0x545   : > { %2550 = vmatprep.subr.bf16.mxu0 %v3057_v31 }
 0x54b   : > { %2439 = vmatmul.mubr.msk.f32.vlgmr.msra.gmra.mrb[4].mxu0 %vm1043_vm3, %v1387_v26 }
 0x54c   : > { %2459 = vmatprep.mubr.msk.f32.mxu0 %vm3058_vm1, %v3059_v34 }
 0x5a3   : > { %v3573_v27 = vpop.f32.mrb[0].mxu0 }
 0x5a4   : > { %v2419_v28 = vpop.f32.mrb[1].mxu0 }
 0x616   : > { %v1382_v29 = vpop.f32.mrb[2].mxu0 }
 0x617   : > { %v2433_v30 = vpop.f32.mrb[3].mxu0 }
 0x61e   : > { %v1464_v32 = vpop.f32.mrb[4].mxu0 }
 0x61f   : > { %v1468_v33 = vmul.f32 0.35355338, %v1464_v32  ;;  %v2440_v35 = vpop.f32.mrb[5].mxu0 }
 0x621   : > { %v1469_v36 = vadd.f32 %v1468_v33, %v3543_v51 }
 0x623   : > { %v1470_v38 = vsel %vm1125_vm6, %v1469_v36, -inf }
 0x624   : > { %1471 = vmax.xlane.f32.xlu1 %v1470_v38 }
 0x6b1   : > { %v1472_v44 = vpop.xlane.xlu1 %1471 }
 0x6b2   : > { %v1473_v45 = vsub.f32 %v1469_v36, %v1472_v44  ;;  %v2563_v44 = vpack.c.bf16 %v1868_v43, %v1867_v42 }
 0x6b4   : > { %v1474_v46 = vmul.f32 1.442695, %v1473_v45  ;;  %v1951_v45 = vld [vmem:[%s3804_s3 + $0x8] sm:$0xff] }
 0x6b6   : > { %2755 = vpow2.f32 %v1474_v46  ;;  %v1952_v46 = vld [vmem:[%s3804_s3 + $0x10] sm:$0xff] }
 0x6c0   : > { %v2756_v48 = vpop.eup %2755 }
 0x6c1   : > { %v1476_v49 = vsel %vm1125_vm6, %v2756_v48, 0.0 }
 0x6c2   : > { %1477 = vadd.xlane.f32.xlu0 %v1476_v49  ;;  %v1953_v49 = vld [vmem:[%s3804_s3 + $0x18] sm:$0xff] }
 0x6d8   : > { %2738 = vrot.lane.b32.xlu0 %v3502_v37, %s3062_s10 }
 0x6dc   : > { %1560 = vrot.lane.b32.xlu0 %v3527_v47, %s3062_s10 }
 0x74f   : > { %v1478_v50 = vpop.xlane.xlu0 %1477 }
 0x750   : > { %2757 = vrcp.f32 %v1478_v50  ;;  %v2569_v50 = vpack.c.bf16 %v1953_v49, %v1952_v46 }
 0x753   : > { %v2739_v52 = vpop.permute.xlu0 %2738 }
 0x754   : > { %v2741_v53 = vunpack.i.h.bf16 %v2739_v52  ;;  %v2740_v54 = vunpack.i.l.bf16 %v2739_v52  ;;  %v1954_v52 = vld [vmem:[%s3804_s3 + $0x20] sm:$0xff] }
 0x756   : > { %v2547_v56 = vpack.c.bf16 %v2741_v53, %v2740_v54  ;;  %v1955_v53 = vld [vmem:[%s3804_s3 + $0x28] sm:$0xff] }
 0x757   : > { %v1561_v37 = vpop.permute.xlu0 %1560  ;;  %v2572_v54 = vpack.c.bf16 %v1955_v53, %v1954_v52 }
 0x75a   : > { %v2758_v55 = vpop.eup %2757 }
 0x75b   : > { %v1480_v57 = vmul.f32 %v2758_v55, %v2756_v48 }
 0x75d   : > { %2446 = vmatmul.mubr.msk.f32.vlgmr.msra.gmra.mrb[6].mxu1 %vm1125_vm6, %v1480_v57 }
 0x75e   : > { %2549 = vmatpush3.bf16.xpose.msk.msra.mxu1 %vm3517_vm4, %v2547_v56  ;;  %2452 = vmatprep.mubr.msk.f32.mxu1 %vm3058_vm1, %v3059_v34 }
 0x75f   : > { %2559 = vmatprep.subr.bf16.mxu1 %v3057_v31 }
 0x765   : > { %2453 = vmatmul.mubr.msk.f32.vlgmr.msra.gmra.mrb[8].mxu1 %vm1043_vm3, %v1561_v37 }
 0x766   : > { %2481 = vmatprep.mubr.msk.f32.mxu1 %vm3058_vm1, %v3059_v34 }
 0x830   : > { %v1556_v47 = vpop.f32.mrb[6].mxu1 }
 0x831   : > { %v2447_v58 = vpop.f32.mrb[7].mxu1 }
 0x838   : > { %v1638_v59 = vpop.f32.mrb[8].mxu1 }
 0x839   : > { %v1642_v60 = vmul.f32 0.35355338, %v1638_v59  ;;  %v2454_v61 = vpop.f32.mrb[9].mxu1  ;;  %v2301_v59 = vld [vmem:[%s3806_s9] ss:$0 sm:$0xff] }
 0x83b   : > { %v1643_v62 = vadd.f32 %v1642_v60, %v3543_v51 }
 0x83d   : > { %v1644_v40 = vsel %vm1125_vm6, %v1643_v62, -inf }
 0x83e   : > { %1645 = vmax.xlane.f32.xlu0 %v1644_v40 }
 0x8cb   : > { %v1646_v0 = vpop.xlane.xlu0 %1645 }
 0x8cc   : > { %v1647_v2 = vsub.f32 %v1643_v62, %v1646_v0  ;;  %v1957_v62 = vld [vmem:[%s3804_s3 + $0x38] sm:$0xff]  ;;  %v2302_v0 = vld [vmem:[%s3807_s23] ss:$0 sm:$0xff] }
 0x8ce   : > { %v1648_v3 = vmul.f32 1.442695, %v1647_v2 }
 0x8d0   : > { %2759 = vpow2.f32 %v1648_v3 }
 0x8da   : > { %v2760_v4 = vpop.eup %2759 }
 0x8db   : > { %v1650_v5 = vsel %vm1125_vm6, %v2760_v4, 0.0 }
 0x8dc   : > { %1651 = vadd.xlane.f32.xlu1 %v1650_v5 }
 0x8ed   : > { %2743 = vrot.lane.b32.xlu1 %v3549_v63, %s3062_s10  ;;  %v1752_v63 = vld [vmem:[#allocation12] sm:$0xff]  ;;  %s2308_s10 = sshll.u32 %s2068_s7, 7 }
 0x8ee   : > { %v2554_v14 = vpack.c.bf16 %v1753_v12, %v1752_v63  ;;  %s3666_s9 = scalar_lea.hbm %s3810_s24, %s2308_s10 }
 0x8f1   : > { %1735 = vrot.lane.b32.xlu1 %v1382_v29, %s3063_s30  ;;  %s2072_s30 = sshll.u32 %s3478_s2, 4  ;;  %s3668_s30 = int_to_ptr.vmem [resolvable:$true] %s2072_s30 }
 0x8f2   : > { %s2937_s22 = scalar_lea.vmem %s3668_s30, 128  ;;  %p2944_p1 = scmp.lt.s32.totalorder %s3668_s30, %s2942_s6 }
 0x8f3   : > { %p2938_p3 = scmp.ne.s32.totalorder %s3668_s30, %s2937_s22  ;;  %p2945_p5 = scmp.lt.s32.totalorder %s2943_s1, %s2937_s22 }
 0x8f5   : > { %1739 = vrot.lane.b32.xlu1 %v1556_v47, %s3064_s18  ;;  %s3805_s18 = sld [smem:[#allocation41_spill]]  ;;  %p2939_p9 = pnand %p2938_p3, %p3811_p2 }
 0x8f6   : > { %p2946_p11 = por %p2945_p5, %p2944_p1 }
 0x8f7   : > { %p2940_p10 = pneg %p2939_p9 }
 0x8f9   : > { %p2947_p13 = pnand %p2946_p11, %p2940_p10 }
 0x8fb   : > { %v2300_v47 = vld [vmem:[%s3805_s18] ss:$0 sm:$0xff] }
 0x969   : > { %v1652_v6 = vpop.xlane.xlu1 %1651 }
 0x96a   : > { %2761 = vrcp.f32 %v1652_v6  ;;  %v2304_v6 = vld [vmem:[%s3808_s16] ss:$0 sm:$0xff] }
 0x96d   : > { %v2744_v51 = vpop.permute.xlu1 %2743 }
 0x96e   : > { %v2746_v7 = vunpack.i.h.bf16 %v2744_v51  ;;  %v2745_v8 = vunpack.i.l.bf16 %v2744_v51 }
 0x970   : > { %v2551_v9 = vpack.c.bf16 %v2746_v7, %v2745_v8 }
 0x971   : > { %v1736_v19 = vpop.permute.xlu1 %1735 }
 0x972   : > { %2552 = vmatpush3.bf16.msra.mxu0 %v2551_v9  ;;  %v1746_v21 = vsel %vm1043_vm3, %v3573_v27, %v1736_v19 }
 0x973   : > { %2553 = vmatprep.subr.bf16.mxu0 %v3057_v31 }
 0x974   : > { %v2762_v10 = vpop.eup %2761 }
 0x975   : > { %v1654_v11 = vmul.f32 %v2762_v10, %v2760_v4  ;;  %v1740_v20 = vpop.permute.xlu1 %1739 }
 0x976   : > { %v1747_v22 = vsel %vm1125_vm6, %v1746_v21, %v1740_v20 }
 0x977   : > { %2460 = vmatmul.mubr.msk.f32.vlgmr.msra.gmra.mrb[6].mxu0 %vm1125_vm6, %v1654_v11 }
 0x978   : > { %2470 = vmatprep.mubr.msk.f32.mxu0 %vm3058_vm1, %v3059_v34  ;;  %2555 = vmatpush3.bf16.msra.mxu0 %v2554_v14 }
 0x979   : > { %2556 = vmatprep.subr.bf16.mxu0 %v3057_v31 }
 0x97c   : > { %2558 = vmatpush3.bf16.msra.mxu0 %v2557_v16 }
 0x97d   : > { %2565 = vmatprep.subr.bf16.mxu0 %v3057_v31 }
 0xa4a   : > { %v1730_v17 = vpop.f32.mrb[6].mxu0 }
 0xa4b   : > { %1743 = vrot.lane.b32.xlu1 %v1730_v17, %s3065_s13  ;;  %v2461_v18 = vpop.f32.mrb[7].mxu0 }
 0xabd   : > { %v1744_v23 = vpop.permute.xlu1 %1743 }
 0xabe   : > { %v1749_v24 = vsel %vm1748_vm7, %v1747_v22, %v1744_v23 }
 0xabf   : > { %2471 = vmatmul.mubr.msk.f32.vlgmr.msra.gmra.mrb[8].mxu0 %vm965_vm2, %v1749_v24 }
 0xac0   : > { %2500 = vmatprep.mubr.msk.f32.mxu0 %vm3058_vm1, %v3059_v34  ;;  %v1865_v34 = vld [vmem:[#allocation13] sm:$0xff] }
 0xac1   : > { %v2560_v41 = vpack.c.bf16 %v1866_v39, %v1865_v34 }
 0xac3   : > { %2561 = vmatpush3.bf16.msra.mxu1 %v2560_v41 }
 0xac4   : > { %2562 = vmatprep.subr.bf16.mxu1 %v3057_v31 }
 0xac7   : > { %2564 = vmatpush3.bf16.msra.mxu1 %v2563_v44 }
 0xb92   : > { %v1832_v26 = vpop.f32.mrb[8].mxu0 }
 0xb93   : > { %v1833_v28 = vadd.f32 %v2298_v25, %v1832_v26  ;;  %v2472_v29 = vpop.f32.mrb[9].mxu0 }
 0xb95   : > { %v1836_v30 = vadd.f32 %v1833_v28, %v3476_v1  ;;  %v1950_v1 = vld [vmem:[%s3804_s3] sm:$0xff] }
 0xb96   : > { %v2566_v48 = vpack.c.bf16 %v1951_v45, %v1950_v1 }
 0xb97   : > { %v1837_v27 = vsel %vm965_vm2, %v1836_v30, 0.0 }
 0xb98   : > { %1838 = vadd.xlane.f32.xlu0 %v1837_v27  ;;  %2567 = vmatpush3.bf16.msra.mxu0 %v2566_v48 }
 0xb99   : > { %2568 = vmatprep.subr.bf16.mxu0 %v3057_v31 }
 0xb9c   : > { %2570 = vmatpush3.bf16.msra.mxu0 %v2569_v50 }
 0xb9d   : > { %2571 = vmatprep.subr.bf16.mxu0 %v3057_v31 }
 0xba0   : > { %2573 = vmatpush3.bf16.msra.mxu0 %v2572_v54 }
 0xba1   : > { %2574 = vmatprep.subr.bf16.mxu0 %v3057_v31  ;;  %v1956_v31 = vld [vmem:[%s3804_s3 + $0x30] sm:$0xff] }
 0xba2   : > { %v2575_v40 = vpack.c.bf16 %v1957_v62, %v1956_v31 }
 0xba4   : > { %2576 = vmatpush3.bf16.msra.mxu0 %v2575_v40 }
 0xc25   : > { %v1839_v32 = vpop.xlane.xlu0 %1838 }
 0xc26   : > { %v1841_v33 = vmul.f32 0.03125, %v1839_v32 }
 0xc28   : > { %v1842_v35 = vsub.f32 %v1836_v30, %v1841_v33 }
 0xc2a   : > { %v1843_v36 = vmul.f32 %v1842_v35, %v1842_v35 }
 0xc2c   : > { %v1844_v38 = vsel %vm965_vm2, %v1843_v36, 0.0 }
 0xc2d   : > { %1845 = vadd.xlane.f32.xlu1 %v1844_v38 }
 0xcba   : > { %v1846_v55 = vpop.xlane.xlu1 %1845 }
 0xcbb   : > { %v1847_v56 = vmul.f32 0.03125, %v1846_v55 }
 0xcbd   : > { %v1848_v57 = vadd.f32 1e-12, %v1847_v56 }
 0xcbf   : > { %2763 = vrsqrt.f32 %v1848_v57 }
 0xcc9   : > { %v2764_v37 = vpop.eup %2763 }
 0xcca   : > { %v1850_v58 = vmul.f32 %v2764_v37, %v1842_v35 }
 0xccc   : > { %v1857_v60 = vmul.f32 %v2300_v47, %v1850_v58 }
 0xcce   : > { %v1864_v61 = vadd.f32 %v2301_v59, %v1857_v60 }
 0xcd0   : > { %2482 = vmatmul.mubr.msk.f32.vlgmr.msra.gmra.mrb[10].mxu1 %vm965_vm2, %v1864_v61 }
 0xda3   : > { %v1945_v2 = vpop.f32.mrb[10].mxu1 }
 0xda4   : > { %v1946_v3 = vadd.f32 %v2302_v0, %v1945_v2  ;;  %v2483_v4 = vpop.f32.mrb[11].mxu1 }
 0xda6   : > { %v1949_v5 = vmax.f32 %v1946_v3, 0.0 }
 0xda8   : > { %2501 = vmatmul.mubr.msk.f32.vlgmr.msra.gmra.mrb[10].mxu0 %vm1965_vm8, %v1949_v5 }
 0xe7b   : > { %v2035_v51 = vpop.f32.mrb[10].mxu0 }
 0xe7c   : > { %v2036_v7 = vadd.f32 %v2304_v6, %v2035_v51  ;;  %v2502_v8 = vpop.f32.mrb[11].mxu0 }
 0xe7e   : > { %v2039_v9 = vadd.f32 %v2036_v7, %v1864_v61 }
 0xe80   : > { %v2040_v10 = vsel %vm965_vm2, %v2039_v9, 0.0 }
 0xe81   : > { %2041 = vadd.xlane.f32.xlu0 %v2040_v10 }
 0xf0e   : > { %v2042_v11 = vpop.xlane.xlu0 %2041 }
 0xf0f   : > { %v2043_v63 = vmul.f32 0.03125, %v2042_v11 }
 0xf11   : > { %v2044_v12 = vsub.f32 %v2039_v9, %v2043_v63 }
 0xf13   : > { %v2045_v13 = vmul.f32 %v2044_v12, %v2044_v12 }
 0xf15   : > { %v2046_v14 = vsel %vm965_vm2, %v2045_v13, 0.0 }
 0xf16   : > { %2047 = vadd.xlane.f32.xlu0 %v2046_v14 }
 0xfa3   : > { %v2048_v15 = vpop.xlane.xlu0 %2047 }
 0xfa4   : > { %v2049_v16 = vmul.f32 0.03125, %v2048_v15 }
 0xfa6   : > { %v2050_v17 = vadd.f32 1e-12, %v2049_v16 }
 0xfa8   : > { %2765 = vrsqrt.f32 %v2050_v17 }
 0xfb2   : > { %v2766_v18 = vpop.eup %2765 }
 0xfb3   : > { %v2052_v19 = vmul.f32 %v2766_v18, %v2044_v12 }
 0xfb5   : > { %v2053_v20 = vmul.f32 %v2300_v47, %v2052_v19 }
 0xfb7   : > { %v2054_v21 = vadd.f32 %v2301_v59, %v2053_v20 }
 0xfb9   : > { %2055 = vst.msk [vmem:[%s3478_s2] sm:$0xff] %vm965_vm2, %v2054_v21 }
 0xfba   : > { %2950 = shalt.err (!%p2947_p13)
}
 0xfbb   : > { %s2951_s11 = scalar_lea.hbm %s3666_s9, 128  ;;  %s2955_s4 = scalar_lea.hbm %s3810_s24, 512 }
 0xfbc   : > { %p2952_p0 = scmp.ne.s32.totalorder %s3666_s9, %s2951_s11  ;;  %p2956_p4 = scmp.lt.u32.totalorder %s3666_s9, %s3810_s24 }
 0xfbd   : > { %p2957_p8 = scmp.lt.u32.totalorder %s2955_s4, %s2951_s11  ;;  %p2959_p3 = scmp.lt.u32.totalorder %s2951_s11, %s3666_s9 }
 0xfbe   : > { %p2953_p12 = pnand %p2952_p0, %p3811_p2 }
 0xfbf   : > { %p2958_p7 = por %p2957_p8, %p2956_p4 }
 0xfc0   : > { %p2954_p6 = pneg %p2953_p12 }
 0xfc1   : > { %p2960_p9 = por %p2959_p3, %p2958_p7 }
 0xfc3   : > { %p2961_p10 = pnand %p2960_p9, %p2954_p6 }
 0xfc5   : > { %2964 = shalt.err (!%p2961_p10)
}
 0xfc6   : > { %2599 = dma.vmem_to_hbm [thread:$0]  (%p3811_p2), %s3668_s30, 128, %s3666_s9, %s2057_s0  }
 0xfc7 PF: > { %p2636_p1 = scmp.ge.s32.totalorder %s3047_s20, 2  ;;  %s2084_s12 = sand.u32 1, %s3019_s27  }
 0xfc8   : > { %p3812_p5 = scmp.ne.s32.totalorder %s3789_s26, 0  ;;  %s2085_s16 = scalar_lea.sflag [#allocation6], %s2084_s12 }
 0xfca   : > { %p2622_p11 = pnand %p2636_p1, %p3812_p5 }
 0xfcc   : > { %3014 = dma.done.wait (!%p2622_p11), %s2085_s16, 128  }
 0xfcd   : > { %3016 = vsyncadd (!%p2622_p11), %s2085_s16, 4294967168  ;;  %s37_s20 = sadd.s32 1, %s3047_s20   ;;  %s3813_s0 = sld [smem:[#allocation22_spill]] }
 0xfce   : > { %p34_p13 = scmp.ge.s32.totalorder %s37_s20, 6   ;;  %s3814_s17 = sld [smem:[#allocation23_spill]] }
 0xfcf   : > { %s3815_s1 = sld [smem:[#allocation24_spill]]  ;;  %s3816_s27 = smov %s3023_s28 }
 0xfd0   : > { %s3817_s28 = smov %s3027_s29  ;;  %s3818_s29 = smov %s3392_s21 }
 0xfd1   : > { %s3819_s30 = smov %s3039_s19  ;;  %36 = sbr.rel (!%p34_p13) target bundleno = 30 (0x1e), region = 170 }
 0xfd4   : > { %s3820_s19 = smov %s3814_s17 }
 0xfd8   :  { %2090 = vsyncpa [#allocation5], 1 }
 0xfd9   :  { %2092 = vsyncpa [#allocation5 + $0x1], 1 }
 0xfda   :  { %2093 = vsyncpa [#allocation8], 1 }
 0xfdb   :  { %2094 = vsyncpa [#allocation11], 1 }
 0xfdc   :  { %2095 = vsyncpa [#allocation14], 1 }
 0xfdd   :  { %2096 = vsyncpa [#allocation6], 1 }
 0xfde   :  { %2098 = vsyncpa [#allocation6 + $0x1], 1 }

// kernel: tpu_custom_call.1
= control target key start
LH: loop header
LB: loop body
LE: loop exit
PB: predicated region body
PF: predicated region fallthrough
CT: control target
= control target key end

     0   :  { %s3722_s0 = inlined_call_operand.vmem [shape: f32[2,16,32], index: 0, kind: input, shape index: {}]   ;;  %s3723_s1 = inlined_call_operand.vmem [shape: f32[2,16,32], index: 1, kind: input, shape index: {}]   ;;  %s3724_s2 = inlined_call_operand.vmem [shape: f32[2,16,32], index: 2, kind: input, shape index: {}]   ;;  %s3725_s3 = inlined_call_operand.hbm [shape: f32[2,16,16], index: 3, kind: input, shape index: {}]   ;;  %s3726_s4 = inlined_call_operand.hbm [shape: f32[32,32], index: 4, kind: input, shape index: {}]   ;;  %s3727_s5 = inlined_call_operand.vmem [shape: f32[1,32], index: 5, kind: input, shape index: {}]   ;;  %s3728_s6 = inlined_call_operand.hbm [shape: f32[32,32], index: 6, kind: input, shape index: {}]   ;;  %s3729_s7 = inlined_call_operand.vmem [shape: f32[1,32], index: 7, kind: input, shape index: {}]   ;;  %s3730_s8 = inlined_call_operand.hbm [shape: f32[32,32], index: 8, kind: input, shape index: {}]   ;;  %s3731_s9 = inlined_call_operand.vmem [shape: f32[1,32], index: 9, kind: input, shape index: {}]   ;;  %s3732_s10 = inlined_call_operand.hbm [shape: f32[32,32], index: 10, kind: input, shape index: {}]   ;;  %s3733_s11 = inlined_call_operand.vmem [shape: f32[1,32], index: 11, kind: input, shape index: {}]   ;;  %s3734_s12 = inlined_call_operand.hbm [shape: f32[32,64], index: 12, kind: input, shape index: {}]   ;;  %s3735_s13 = inlined_call_operand.vmem [shape: f32[1,64], index: 13, kind: input, shape index: {}]   ;;  %s3736_s14 = inlined_call_operand.vmem [shape: f32[64,32], index: 14, kind: input, shape index: {}]   ;;  %s3737_s15 = inlined_call_operand.vmem [shape: f32[1,32], index: 15, kind: input, shape index: {}]   ;;  %s3738_s16 = inlined_call_operand.vmem [shape: f32[1,32], index: 16, kind: input, shape index: {}]   ;;  %s3739_s17 = inlined_call_operand.vmem [shape: f32[1,32], index: 17, kind: input, shape index: {}]   ;;  %s3740_s18 = inlined_call_operand.hbm [shape: f32[2,16,32], index: 18, kind: output, shape index: {}]  }
   0x1   :  { %3752 = sst [smem:[#allocation25_spill]] %s3722_s0 }
   0x2   :  { %3753 = sst [smem:[#allocation26_spill]] %s3723_s1 }
   0x3   :  { %3754 = sst [smem:[#allocation27_spill]] %s3724_s2 }
   0x4   :  { %3755 = sst [smem:[#allocation28_spill]] %s3725_s3 }
   0x5   :  { %3756 = sst [smem:[#allocation29_spill]] %s3726_s4 }
   0x6   :  { %3757 = sst [smem:[#allocation30_spill]] %s3727_s5 }
   0x7   :  { %3758 = sst [smem:[#allocation31_spill]] %s3728_s6 }
   0x8   :  { %3759 = sst [smem:[#allocation32_spill]] %s3729_s7 }
   0x9   :  { %3760 = sst [smem:[#allocation33_spill]] %s3730_s8 }
   0xa   :  { %3761 = sst [smem:[#allocation34_spill]] %s3731_s9 }
   0xb   :  { %3762 = sst [smem:[#allocation35_spill]] %s3732_s10 }
   0xc   :  { %3763 = sst [smem:[#allocation36_spill]] %s3733_s11 }
   0xd   :  { %3764 = sst [smem:[#allocation37_spill]] %s3734_s12 }
   0xe   :  { %3765 = sst [smem:[#allocation38_spill]] %s3735_s13 }
   0xf   :  { %3766 = sst [smem:[#allocation39_spill]] %s3736_s14 }
  0x10   :  { %3767 = sst [smem:[#allocation40_spill]] %s3737_s15 }
  0x11   :  { %3768 = sst [smem:[#allocation41_spill]] %s3738_s16 }
  0x12   :  { %3769 = sst [smem:[#allocation42_spill]] %s3739_s17 }
  0x13   :  { %3770 = sst [smem:[#allocation43_spill]] %s3740_s18 }
  0x14   :  { %23 = vsyncpa [#allocation5], 0 }
  0x15   :  { %25 = vsyncpa [#allocation5 + $0x1], 0 }
  0x16   :  { %26 = vsyncpa [#allocation8], 0 }
  0x17   :  { %27 = vsyncpa [#allocation11], 0 }
  0x18   :  { %28 = vsyncpa [#allocation14], 0 }
  0x19   :  { %29 = vsyncpa [#allocation6], 0 }
  0x1a   :  { %31 = vsyncpa [#allocation6 + $0x1], 0  ;;  %s3162_s27 = smov 0   ;;  %s3164_s28 = smov 0  }
  0x1b   :  { %s3166_s29 = smov 0   ;;  %s3168_s30 = smov 0  }
  0x1c   :  { %s3170_s0 = smov 0   ;;  %s3172_s19 = smov 0  }
  0x1d   :  { %s3174_s1 = smov 0   ;;  %s3176_s20 = smov 0  }
  0x1e LB: > { %3771 = sst [smem:[#allocation21_spill]] %s3031_s30  ;;  %s3741_s21 = sadd.s32 4294967295, %s3047_s20   ;;  %s3047_s20 = sphi %s3176_s20, %s37_s20   ;;  %s3043_s1 = sphi %s3174_s1, %s3815_s1   ;;  %s3039_s19 = sphi %s3172_s19, %s3820_s19   ;;  %s3035_s0 = sphi %s3170_s0, %s3813_s0   ;;  %s3031_s30 = sphi %s3168_s30, %s3819_s30   ;;  %s3027_s29 = sphi %s3166_s29, %s3818_s29   ;;  %s3023_s28 = sphi %s3164_s28, %s3817_s28   ;;  %s3019_s27 = sphi %s3162_s27, %s3816_s27  }
  0x1f   : > { %3772 = sst [smem:[#allocation22_spill]] %s3043_s1  ;;  %p2249_p0 = scmp.ge.s32.totalorder %s3047_s20, 1 }
  0x20   : > { %p3206_p1 = scmp.eq.s32.totalorder %s3741_s21, 0  ;;  %p484_p2 = scmp.lt.s32.totalorder %s3047_s20, 5 }
  0x21   : > { %s3049_s23 = smov [#allocation7]   ;;  %s3050_s26 = smov [#allocation10]  }
  0x22   : > { %s3773_s22 = scalar_select %p3206_p1, 1, 0 }
  0x23   : > { %p3211_p3 = pnand %p2249_p0, %p484_p2  ;;  %s496_s24 = sshll.u32 %s3049_s23, 4  ;;  %s3215_s24 = int_to_ptr.vmem [resolvable:$true] %s496_s24 }
  0x24   : > { %s528_s21 = sshll.u32 %s3050_s26, 4  ;;  %s3051_s18 = smov [#allocation9]   ;;  %s3225_s21 = int_to_ptr.vmem [resolvable:$true] %s528_s21 }
  0x25   : > { %s3774_s2 = scalar_select %p3211_p3, 1, 0 }
  0x26   : > { %p2601_p4 = pneg %p3211_p3  ;;  %s3227_s15 = sshll.u32 %s3051_s18, 4  ;;  %s513_s15 = int_to_ptr.vmem [resolvable:$true] %s3227_s15 }
  0x27   : > { %s3776_s4 = sld [smem:[#allocation29_spill]] }
  0x28   : > { %p3221_p5 = pnand %p2601_p4, %p3206_p1 }
  0x2a   : > { %p3237_p7 = pneg %p3221_p5 }
  0x2d   : > { %s2767_s23 = scalar_lea.hbm %s3776_s4, 512 }
  0x2e   : > { %p2768_p6 = scmp.ne.s32.totalorder %s3776_s4, %s2767_s23  ;;  %p2774_p10 = scmp.lt.u32.totalorder %s2767_s23, %s3776_s4 }
  0x30   : > { %p2770_p8 = pnand %p3237_p7, %p2768_p6 }
  0x32   : > { %p2771_p9 = pneg %p2770_p8 }
  0x34   : > { %p2776_p11 = pnand %p2774_p10, %p2771_p9 }
  0x36   : > { %2779 = shalt.err (!%p2776_p11)
}
  0x37   : > { %s2780_s13 = scalar_lea.vmem %s3215_s24, 512  ;;  %p2788_p2 = scmp.lt.s32.totalorder %s3215_s24, %s3215_s24 }
  0x38   : > { %p2781_p12 = scmp.ne.s32.totalorder %s3215_s24, %s2780_s13  ;;  %p2789_p4 = scmp.lt.s32.totalorder %s2780_s13, %s2780_s13 }
  0x3a   : > { %p2783_p13 = pnand %p2781_p12, %p3237_p7  ;;  %p2790_p6 = por %p2789_p4, %p2788_p2 }
  0x3c   : > { %p2784_p0 = pneg %p2783_p13 }
  0x3e   : > { %p2791_p8 = pnand %p2790_p6, %p2784_p0 }
  0x40   : > { %2794 = shalt.err (!%p2791_p8)
}
  0x41   : > { %s3052_s14 = smov 128   ;;  %s3053_s16 = smov 8  }
  0x42   : > { %2604 = dma.hbm_to_vmem [thread:$0]  (!%p3221_p5), %s3776_s4, 512, %s3215_s24, [#allocation8], %s3052_s14, %s3052_s14, %s3053_s16  }
  0x43   : > { %s3778_s8 = sld [smem:[#allocation33_spill]] }
  0x49   : > { %s2795_s13 = scalar_lea.hbm %s3778_s8, 512 }
  0x4a   : > { %p2796_p9 = scmp.ne.s32.totalorder %s3778_s8, %s2795_s13  ;;  %p2802_p12 = scmp.lt.u32.totalorder %s2795_s13, %s3778_s8 }
  0x4c   : > { %p2798_p10 = pnand %p2796_p9, %p3237_p7 }
  0x4e   : > { %p2799_p11 = pneg %p2798_p10 }
  0x50   : > { %p2804_p13 = pnand %p2802_p12, %p2799_p11 }
  0x52   : > { %2807 = shalt.err (!%p2804_p13)
}
  0x53   : > { %s2808_s24 = scalar_lea.vmem %s3225_s21, 512  ;;  %p2816_p6 = scmp.lt.s32.totalorder %s3225_s21, %s3225_s21 }
  0x54   : > { %p2809_p0 = scmp.ne.s32.totalorder %s3225_s21, %s2808_s24  ;;  %p2817_p8 = scmp.lt.s32.totalorder %s2808_s24, %s2808_s24 }
  0x56   : > { %p2811_p2 = pnand %p2809_p0, %p3237_p7  ;;  %p2818_p9 = por %p2817_p8, %p2816_p6 }
  0x58   : > { %p2812_p4 = pneg %p2811_p2 }
  0x5a   : > { %p2819_p10 = pnand %p2818_p9, %p2812_p4 }
  0x5c   : > { %2822 = shalt.err (!%p2819_p10)
}
  0x5d   : > { %2610 = dma.hbm_to_vmem [thread:$0]  (!%p3221_p5), %s3778_s8, 512, %s3225_s21, [#allocation11], %s3052_s14, %s3052_s14, %s3053_s16  }
  0x5e   : > { %s3779_s6 = sld [smem:[#allocation31_spill]] }
  0x64   : > { %s2823_s17 = scalar_lea.hbm %s3779_s6, 512 }
  0x65   : > { %p2824_p11 = scmp.ne.s32.totalorder %s3779_s6, %s2823_s17  ;;  %p2830_p0 = scmp.lt.u32.totalorder %s2823_s17, %s3779_s6 }
  0x67   : > { %p2826_p12 = pnand %p2824_p11, %p3237_p7 }
  0x69   : > { %p2827_p13 = pneg %p2826_p12 }
  0x6b   : > { %p2832_p2 = pnand %p2830_p0, %p2827_p13 }
  0x6d   : > { %2835 = shalt.err (!%p2832_p2)
}
  0x6e   : > { %s2836_s24 = scalar_lea.vmem %s513_s15, 512  ;;  %p2844_p9 = scmp.lt.s32.totalorder %s513_s15, %s513_s15 }
  0x6f   : > { %p2837_p4 = scmp.ne.s32.totalorder %s513_s15, %s2836_s24  ;;  %p2845_p10 = scmp.lt.s32.totalorder %s2836_s24, %s2836_s24 }
  0x71   : > { %p2839_p6 = pnand %p2837_p4, %p3237_p7  ;;  %p2846_p3 = por %p2845_p10, %p2844_p9 }
  0x73   : > { %p2840_p8 = pneg %p2839_p6 }
  0x75   : > { %p2847_p1 = pnand %p2846_p3, %p2840_p8 }
  0x77   : > { %2850 = shalt.err (!%p2847_p1)
}
  0x78   : > { %2607 = dma.hbm_to_vmem [thread:$0]  (!%p3221_p5), %s3779_s6, 512, %s513_s15, [#allocation8], %s3052_s14, %s3052_s14, %s3053_s16  }
  0x79   : > { %s3054_s7 = smov [#allocation12]   ;;  %s3055_s30 = smov [#allocation13]  }
  0x7a   : > { %s544_s9 = sshll.u32 %s3054_s7, 4  ;;  %s560_s17 = sshll.u32 %s3055_s30, 4  ;;  %s545_s9 = int_to_ptr.vmem [resolvable:$true] %s544_s9  ;;  %s561_s17 = int_to_ptr.vmem [resolvable:$true] %s560_s17 }
  0x7b   : > { %s3780_s10 = sld [smem:[#allocation35_spill]] }
  0x81   : > { %s2851_s18 = scalar_lea.hbm %s3780_s10, 512 }
  0x82   : > { %p2852_p1 = scmp.ne.s32.totalorder %s3780_s10, %s2851_s18  ;;  %p2858_p12 = scmp.lt.u32.totalorder %s2851_s18, %s3780_s10 }
  0x84   : > { %p2854_p3 = pnand %p2852_p1, %p3237_p7 }
  0x86   : > { %p2855_p11 = pneg %p2854_p3 }
  0x88   : > { %p2860_p13 = pnand %p2858_p12, %p2855_p11 }
  0x8a   : > { %2863 = shalt.err (!%p2860_p13)
}
  0x8b   : > { %s2864_s15 = scalar_lea.vmem %s545_s9, 512  ;;  %p2872_p6 = scmp.lt.s32.totalorder %s545_s9, %s545_s9 }
  0x8c   : > { %p2865_p0 = scmp.ne.s32.totalorder %s545_s9, %s2864_s15  ;;  %p2873_p8 = scmp.lt.s32.totalorder %s2864_s15, %s2864_s15 }
  0x8e   : > { %p2867_p2 = pnand %p2865_p0, %p3237_p7  ;;  %p2874_p9 = por %p2873_p8, %p2872_p6 }
  0x90   : > { %p2868_p4 = pneg %p2867_p2 }
  0x92   : > { %p2875_p10 = pnand %p2874_p9, %p2868_p4 }
  0x94   : > { %2878 = shalt.err (!%p2875_p10)
}
  0x95   : > { %2613 = dma.hbm_to_vmem [thread:$0]  (!%p3221_p5), %s3780_s10, 512, %s545_s9, [#allocation11], %s3052_s14, %s3052_s14, %s3053_s16  }
  0x96   : > { %s3781_s12 = sld [smem:[#allocation37_spill]] }
  0x9c   : > { %s2879_s23 = scalar_lea.hbm %s3781_s12, 512 }
  0x9d   : > { %p2880_p1 = scmp.ne.s32.totalorder %s3781_s12, %s2879_s23  ;;  %p2886_p12 = scmp.lt.u32.totalorder %s2879_s23, %s3781_s12 }
  0x9f   : > { %p2882_p3 = pnand %p2880_p1, %p3237_p7 }
  0xa1   : > { %p2883_p11 = pneg %p2882_p3 }
  0xa3   : > { %p2888_p13 = pnand %p2886_p12, %p2883_p11 }
  0xa5   : > { %2891 = shalt.err (!%p2888_p13)
}
  0xa6   : > { %s2892_s21 = scalar_lea.vmem %s561_s17, 512  ;;  %p2900_p6 = scmp.lt.s32.totalorder %s561_s17, %s561_s17 }
  0xa7   : > { %p2893_p0 = scmp.ne.s32.totalorder %s561_s17, %s2892_s21  ;;  %p2901_p8 = scmp.lt.s32.totalorder %s2892_s21, %s2892_s21 }
  0xa9   : > { %p2895_p2 = pnand %p2893_p0, %p3237_p7  ;;  %p2902_p9 = por %p2901_p8, %p2900_p6 }
  0xab   : > { %p2896_p4 = pneg %p2895_p2 }
  0xad   : > { %p2903_p10 = pnand %p2902_p9, %p2896_p4 }
  0xaf   : > { %2906 = shalt.err (!%p2903_p10)
}
  0xb0   : > { %2616 = dma.hbm_to_vmem [thread:$0]  (!%p3221_p5), %s3781_s12, 512, %s561_s17, [#allocation14], %s3052_s14, %s3052_s14, %s3053_s16  }
  0xb1   : > { %s2248_s11 = sadd.s32 4294967294, %s3047_s20   ;;  %s46_s25 = sadd.s32 1, %s3039_s19 }
  0xb2   : > { %s49_s4 = sadd.s32 1, %s3043_s1  ;;  %p47_p7 = scmp.ge.s32.totalorder %s46_s25, 2 }
  0xb3   : > { %s138_s5 = sadd.s32 1, %s3027_s29  ;;  %p145_p1 = scmp.ne.s32.totalorder %s3027_s29, %s3023_s28 }
  0xb4   : > { %p146_p3 = scmp.eq.s32.totalorder %s3047_s20, 0  ;;  %s3822_s25 = smov (%p47_p7, %s46_s25), 0 }
  0xb5   : > { %3782 = sst [smem:[#allocation23_spill]] %s3822_s25  ;;  %s3824_s4 = smov (!%p47_p7, %s49_s4), %s3043_s1 }
  0xb6   : > { %s134_s7 = ssub.s32 %s3039_s19, %s3822_s25  ;;  %p3363_p11 = por %p146_p3, %p145_p1 }
  0xb7   : > { %p51_p5 = scmp.ge.s32.totalorder %s3824_s4, 2  ;;  %p151_p12 = scmp.ne.s32.totalorder %s3023_s28, %s3019_s27 }
  0xb8   : > { %s3784_s14 = sadd.s32 4294967295, %s3047_s20   ;;  %p477_p0 = scmp.eq.s32.totalorder %s2248_s11, 3 }
  0xb9   : > { %p471_p13 = scmp.eq.s32.totalorder %s3784_s14, 3  ;;  %s3826_s4 = smov (%p51_p5, %s3824_s4), 0 }
  0xba   : > { %3785 = sst [smem:[#allocation24_spill]] %s3826_s4  ;;  %p3786_p2 = scmp.ne.s32.totalorder %s3773_s22, 0 }
  0xbb   : > { %p3379_p6 = por %p471_p13, %p145_p1  ;;  %s133_s23 = ssub.s32 %s3043_s1, %s3826_s4 }
  0xbc   : > { %p3375_p4 = por %p3786_p2, %p151_p12  ;;  %p3385_p8 = por %p477_p0, %p151_p12 }
  0xbd   : > { %s3788_s17 = scalar_select %p3379_p6, 1, 0 }
  0xbe   : > { %s3789_s26 = scalar_select %p3385_p8, 1, 0 }
  0xbf   : > { %s135_s18 = sor.u32 %s134_s7, %s133_s23  ;;  %p2630_p9 = scmp.lt.s32.totalorder %s3047_s20, 4 }
  0xc0   : > { %p136_p10 = scmp.eq.s32.totalorder %s135_s18, 0  ;;  %s616_s13 = sand.u32 1, %s3027_s29  }
  0xc1   : > { %s2256_s24 = sshll.u32 %s616_s13, 3  ;;  %s2257_s9 = sshll.u32 %s3043_s1, 1 }
  0xc2   : > { %s3392_s21 = scalar_select %p136_p10, %s3027_s29, %s138_s5  }
  0xc3   : > { %s625_s15 = sadd.s32 %s3039_s19, %s2257_s9  ;;  %s620_s11 = scalar_lea.vmem [#allocation4], %s2256_s24 }
  0xc4   : > { %s629_s14 = sshll.u32 %s620_s11, 4  ;;  %s2258_s6 = sshll.u32 %s625_s15, 7  ;;  %s3396_s14 = int_to_ptr.vmem [resolvable:$true] %s629_s14 }
  0xc5   : > { %s3790_s3 = sld [smem:[#allocation28_spill]]  ;;  %p3405_p7 = pnand %p2630_p9, %p3363_p11 }
  0xc6   : > { %s617_s7 = scalar_lea.sflag [#allocation5], %s616_s13 }
  0xc7   : > { %p2909_p3 = pneg %p3405_p7 }
  0xcb   : > { %s3401_s12 = scalar_lea.hbm %s3790_s3, %s2258_s6  ;;  %s2912_s10 = scalar_lea.hbm %s3790_s3, 512 }
  0xcc   : > { %s2907_s23 = scalar_lea.hbm %s3401_s12, 128  ;;  %p2913_p11 = scmp.lt.u32.totalorder %s3401_s12, %s3790_s3 }
  0xcd   : > { %p2908_p1 = scmp.ne.s32.totalorder %s3401_s12, %s2907_s23  ;;  %p2914_p13 = scmp.lt.u32.totalorder %s2912_s10, %s2907_s23 }
  0xce   : > { %p2916_p2 = scmp.lt.u32.totalorder %s2907_s23, %s3401_s12 }
  0xcf   : > { %p2910_p5 = pnand %p2909_p3, %p2908_p1  ;;  %p2915_p0 = por %p2914_p13, %p2913_p11 }
  0xd1   : > { %p2911_p12 = pneg %p2910_p5  ;;  %p2917_p9 = por %p2916_p2, %p2915_p0 }
  0xd3   : > { %p2918_p10 = pnand %p2917_p9, %p2911_p12 }
  0xd5   : > { %2921 = shalt.err (!%p2918_p10)
}
  0xd6   : > { %s2922_s13 = scalar_lea.vmem %s3396_s14, 128  ;;  %s3056_s24 = smov [#allocation4]  }
  0xd7   : > { %p2923_p1 = scmp.ne.s32.totalorder %s3396_s14, %s2922_s13  ;;  %s2927_s9 = sshll.u32 %s3056_s24, 4  ;;  %s2928_s9 = int_to_ptr.vmem [resolvable:$false] %s2927_s9 }
  0xd8   : > { %s2929_s15 = scalar_lea.vmem %s2928_s9, 256  ;;  %p2930_p6 = scmp.lt.s32.totalorder %s3396_s14, %s2928_s9 }
  0xd9   : > { %p2925_p5 = pnand %p2923_p1, %p2909_p3  ;;  %p2931_p11 = scmp.lt.s32.totalorder %s2929_s15, %s2922_s13 }
  0xdb   : > { %p2926_p8 = pneg %p2925_p5  ;;  %p2932_p13 = por %p2931_p11, %p2930_p6 }
  0xdd   : > { %p2933_p0 = pnand %p2932_p13, %p2926_p8 }
  0xdf   : > { %2936 = shalt.err (!%p2933_p0)
}
  0xe0   : > { %2620 = dma.hbm_to_vmem [thread:$0]  (!%p3405_p7), %s3401_s12, 128, %s3396_s14, %s617_s7  }
  0xe1   : > { %p3792_p12 = scmp.ne.s32.totalorder %s3774_s2, 0 }
  0xe2   : > { %s3437_s11 = sand.u32 (!%p3792_p12), 1, %s3023_s28  }
  0xe3   : > { %638 = sbr.rel (%p3792_p12) target bundleno = 4039 (0xfc7), region = 92  ;;  %s2260_s23 = sshll.u32 (!%p3792_p12), %s3437_s11, 3 }
  0xe4   : > { %s641_s6 = scalar_lea.sflag (!%p3792_p12), [#allocation5], %s3437_s11  ;;  %s644_s8 = scalar_lea.vmem (!%p3792_p12), [#allocation4], %s2260_s23 }
  0xea   : > { %2998 = dma.done.wait (%p3375_p4), %s641_s6, 128  }
  0xeb   : > { %3000 = vsyncadd (%p3375_p4), %s641_s6, 4294967168  ;;  %p3793_p6 = scmp.ne.s32.totalorder %s3773_s22, 0 }
  0xed   : > { %3002 = dma.done.wait (%p3793_p6), [#allocation8], 1024  }
  0xee   : > { %3004 = vsyncadd (%p3793_p6), [#allocation8], 4294966272 }
  0xef   : > { %3006 = dma.done.wait (%p3793_p6), [#allocation11], 1024  }
  0xf0   : > { %3008 = vsyncadd (%p3793_p6), [#allocation11], 4294966272 }
  0xf1   : > { %3010 = dma.done.wait (%p3793_p6), [#allocation14], 512  }
  0xf2   : > { %3012 = vsyncadd (%p3793_p6), [#allocation14], 4294966784  ;;  %s3794_s12 = sld [smem:[#allocation21_spill]]  ;;  %p735_p4 = scmp.lt.s32.totalorder %s3035_s0, 1  ;;  %v3474_v0 = vld [vmem:[%s644_s8] sm:$0xff] }
  0xf3   : > { %s3795_s18 = sld [smem:[#allocation26_spill]]  ;;  %s3796_s15 = sld [smem:[#allocation27_spill]] }
  0xf4   : > { %s736_s2 = scalar_select %p735_p4, %s3035_s0, 1 }
  0xf5   : > { %s3797_s25 = sld [smem:[#allocation25_spill]] }
  0xf6   : > { %s2267_s14 = sshll.u32 %s736_s2, 1  ;;  %s2311_s5 = sshll.u32 %s736_s2, 4 }
  0xf7   : > { %s3478_s2 = scalar_lea.vmem [#allocation15], %s2260_s23 }
  0xf8   : > { %p737_p8 = scmp.lt.s32.totalorder %s3794_s12, 1  ;;  %p2273_p7 = scmp.ne.s32.totalorder %s3794_s12, 0 }
  0xf9   : > { %s3464_s13 = scalar_lea.vmem %s3795_s18, %s2311_s5  ;;  %s3469_s6 = scalar_lea.vmem %s3796_s15, %s2311_s5  ;;  %v761_v2 = vld [vmem:[#allocation9] sm:$0xff] (!%p2273_p7)  ;;  %v762_v3 = vld [vmem:[#allocation9 + $0x8] sm:$0xff] (!%p2273_p7)  ;;  %vm772_vm0 = vcmask (!%p2273_p7), 261120   ;;  %v763_v7 = vld [vmem:[#allocation9 + $0x10] sm:$0xff] (!%p2273_p7) }
  0xfa   : > { %s738_s16 = scalar_select %p737_p8, %s3794_s12, 1 }
  0xfb   : > { %758 = sbr.rel (%p2273_p7) target bundleno = 478 (0x1de), region = 120  ;;  %v856_v4 = vld [vmem:[#allocation10] sm:$0xff] (!%p2273_p7)  ;;  %v2503_v5 = vpack.c.bf16 (!%p2273_p7), %v762_v3, %v761_v2  ;;  %v857_v6 = vld [vmem:[#allocation10 + $0x8] sm:$0xff] (!%p2273_p7)  ;;  %v764_v8 = vld [vmem:[#allocation9 + $0x18] sm:$0xff] (!%p2273_p7)  ;;  %s3799_s8 = sld [smem:[#allocation34_spill]] (!%p2273_p7) }
  0xfc   : > { %s740_s7 = sadd.s32 %s2267_s14, %s738_s16  ;;  %v2511_v9 = vpack.c.bf16 (!%p2273_p7), %v857_v6, %v856_v4  ;;  %v2507_v10 = vpack.c.bf16 (!%p2273_p7), %v764_v8, %v763_v7  ;;  %v858_v11 = vld [vmem:[#allocation10 + $0x10] sm:$0xff] (!%p2273_p7)  ;;  %v859_v12 = vld [vmem:[#allocation10 + $0x18] sm:$0xff] (!%p2273_p7) }
  0xfd   : > { %s2268_s24 = sshll.u32 %s740_s7, 3  ;;  %v759_v13 = vld [vmem:[%s3464_s13] sm:$0xff] (!%p2273_p7)  ;;  %2504 = vmatprep.subr.bf16.mxu0 (!%p2273_p7), %v2503_v5  ;;  %v2515_v14 = vpack.c.bf16 (!%p2273_p7), %v859_v12, %v858_v11  ;;  %v760_v16 = vld [vmem:[%s3464_s13 + $0x8] sm:$0xff] (!%p2273_p7) }
  0xfe   : > { %s742_s1 = scalar_lea.vmem %s3797_s25, %s2268_s24  ;;  %2381 = vmatprep.mubr.msk.f32.mxu0 (!%p2273_p7), %vm772_vm0, %v759_v13  ;;  %v854_v15 = vld [vmem:[%s3469_s6] sm:$0xff] (!%p2273_p7)  ;;  %2512 = vmatprep.subr.bf16.mxu1 (!%p2273_p7), %v2511_v9  ;;  %v855_v17 = vld [vmem:[%s3469_s6 + $0x8] sm:$0xff] (!%p2273_p7)  ;;  %s3798_s25 = sld [smem:[#allocation32_spill]] (!%p2273_p7) }
  0xff   : > { %v3476_v1 = vld [vmem:[%s742_s1] sm:$0xff]  ;;  %2506 = vmatpush3.bf16.msra.mxu0 (!%p2273_p7), %v2503_v5  ;;  %2514 = vmatpush3.bf16.msra.mxu1 (!%p2273_p7), %v2511_v9 }
 0x100   : > { %2508 = vmatprep.subr.bf16.mxu0 (!%p2273_p7), %v2507_v10  ;;  %2516 = vmatprep.subr.bf16.mxu1 (!%p2273_p7), %v2515_v14 }
 0x101   : > { %2392 = vmatprep.mubr.msk.f32.mxu1 (!%p2273_p7), %vm772_vm0, %v854_v15  ;;  %v2277_v19 = vld [vmem:[%s3799_s8] ss:$0 sm:$0xff] (!%p2273_p7) }
 0x103   : > { %2510 = vmatpush3.bf16.msra.mxu0 %v2507_v10  ;;  %2518 = vmatpush3.bf16.msra.mxu1 %v2515_v14 }
 0x104   : > { %v2274_v18 = vld [vmem:[%s3798_s25] ss:$0 sm:$0xff] }
 0x106   : > { %2382 = vmatmul.mubr.msk.f32.vlgmr.msra.gmra.mrb[0].mxu0 %vm772_vm0, %v760_v16  ;;  %2393 = vmatmul.mubr.msk.f32.vlgmr.msra.gmra.mrb[0].mxu1 %vm772_vm0, %v855_v17 }
 0x1d9   : > { %v2383_v20 = vpop.f32.mrb[0].mxu0  ;;  %v2394_v22 = vpop.f32.mrb[0].mxu1 }
 0x1da   : > { %v851_v21 = vadd.f32 %v2383_v20, %v2274_v18  ;;  %v845_v23 = vpop.f32.mrb[1].mxu0  ;;  %v945_v24 = vadd.f32 %v2394_v22, %v2277_v19  ;;  %v939_v26 = vpop.f32.mrb[1].mxu1 }
 0x1db   : > { %v846_v25 = vadd.f32 %v2274_v18, %v845_v23  ;;  %v940_v27 = vadd.f32 %v2277_v19, %v939_v26 }
 0x1dc   : > { %949 = vst.msk [vmem:[#allocation2 + $0x8] sm:$0xff] %vm772_vm0, %v851_v21  ;;  %951 = vst.msk [vmem:[#allocation3 + $0x8] sm:$0xff] %vm772_vm0, %v945_v24 }
 0x1dd   : > { %948 = vst.msk [vmem:[#allocation2] sm:$0xff] %vm772_vm0, %v846_v25  ;;  %950 = vst.msk [vmem:[#allocation3] sm:$0xff] %vm772_vm0, %v940_v27 }
 0x1de PF: > { %v954_v28 = vld [vmem:[#allocation7] sm:$0xff]  ;;  %v955_v29 = vld [vmem:[#allocation7 + $0x8] sm:$0xff]  ;;  %v956_v30 = vld [vmem:[#allocation7 + $0x10] sm:$0xff]  ;;  %v3057_v31 = vmov 0.0|0.0   ;;  %vm3058_vm1 = vmmov 0   ;;  %v3059_v34 = vmov 0.0  }
 0x1df   : > { %2519 = vmatprep.subr.bf16.mxu1 %v3057_v31  ;;  %v2520_v32 = vpack.c.bf16 %v955_v29, %v954_v28  ;;  %v957_v33 = vld [vmem:[#allocation7 + $0x18] sm:$0xff]  ;;  %2403 = vmatprep.mubr.msk.f32.mxu1 %vm3058_vm1, %v3059_v34  ;;  %s3060_s12 = smov 120   ;;  %vm965_vm2 = vcmask 261120   ;;  %vm1043_vm3 = vcmask 64512   ;;  %s3802_s5 = sld [smem:[#allocation30_spill]]  ;;  %vm952_vm5 = vcmp.eq.f32.partialorder %v3474_v0, 0.0 }
 0x1e0   : > { %2529 = vmatprep.subr.bf16.mxu0 %v3057_v31  ;;  %2417 = vmatprep.mubr.msk.f32.mxu0 %vm3058_vm1, %v3059_v34  ;;  %v2523_v38 = vpack.c.bf16 %v957_v33, %v956_v30  ;;  %vm3517_vm4 = vmpackc.low %vm1043_vm3, %vm1043_vm3  ;;  %v3543_v51 = vsel %vm952_vm5, -10000.0, %v3059_v34  ;;  %vm1125_vm6 = vcmask 130048   ;;  %s3061_s7 = smov 112   ;;  %s3062_s10 = smov 104   ;;  %vm1748_vm7 = vcmask 195584  }
 0x1e1   : > { %2521 = vmatpush3.bf16.msra.mxu1 %v2520_v32  ;;  %s3063_s30 = smov 8   ;;  %s3064_s18 = smov 16   ;;  %vm1965_vm8 = vcmask 523264  }
 0x1e2   : > { %2522 = vmatprep.subr.bf16.mxu1 %v3057_v31  ;;  %s3065_s13 = smov 24   ;;  %s3803_s22 = sld [smem:[#allocation36_spill]] }
 0x1e3   : > { %v1040_v36 = vld [vmem:[#allocation2 + $0x8] sm:$0xff]  ;;  %v1042_v62 = vld [vmem:[#allocation3 + $0x8] sm:$0xff]  ;;  %s3804_s3 = sld [smem:[#allocation39_spill]]  ;;  %s3806_s9 = sld [smem:[#allocation42_spill]] }
 0x1e4   : > { %v1039_v35 = vld [vmem:[#allocation2] sm:$0xff]  ;;  %v1041_v61 = vld [vmem:[#allocation3] sm:$0xff]  ;;  %s3807_s23 = sld [smem:[#allocation38_spill]]  ;;  %s3808_s16 = sld [smem:[#allocation40_spill]] }
 0x1e5   : > { %v3502_v37 = vpack.i.bf16 %v1040_v36, %v1039_v35  ;;  %2524 = vmatpush3.bf16.msra.mxu1 %v2523_v38  ;;  %v2526_v39 = vpack.c.bf16 %v1040_v36, %v1039_v35  ;;  %v2280_v44 = vld [vmem:[%s3802_s5] ss:$0 sm:$0xff]  ;;  %v3549_v63 = vpack.i.bf16 %v1042_v62, %v1041_v61  ;;  %v2530_v6 = vpack.c.bf16 %v1042_v62, %v1041_v61  ;;  %s3809_s14 = sld [smem:[#allocation21_spill]]  ;;  %s2307_s5 = sshll.u32 %s3035_s0, 1 }
 0x1e6   : > { %2525 = vmatprep.subr.bf16.mxu1 %v3057_v31  ;;  %s3810_s24 = sld [smem:[#allocation43_spill]]  ;;  %s2057_s0 = scalar_lea.sflag [#allocation6], %s3437_s11 }
 0x1e7   : > { %2718 = vrot.lane.b32.xlu0 %v3502_v37, %s3060_s12  ;;  %2531 = vmatpush3.bf16.msra.mxu0 %v2530_v6  ;;  %p3811_p2 = scmp.ne.s32.totalorder %s3788_s17, 0  ;;  %s3066_s15 = smov [#allocation15]  }
 0x1e8   : > { %2404 = vmatmul.mubr.msk.f32.vlgmr.msra.gmra.mrb[0].mxu1 %vm965_vm2, %v3476_v1  ;;  %2536 = vmatprep.subr.bf16.mxu0 %v3057_v31  ;;  %s2941_s6 = sshll.u32 %s3066_s15, 4  ;;  %s2942_s6 = int_to_ptr.vmem [resolvable:$false] %s2941_s6 }
 0x1e9   : > { %2410 = vmatprep.mubr.msk.f32.mxu1 %vm3058_vm1, %v3059_v34  ;;  %s2943_s1 = scalar_lea.vmem %s2942_s6, 256 }
 0x1ee   : > { %2528 = vmatpush3.bf16.xpose.msk.msra.mxu1 %vm3517_vm4, %v2526_v39 }
 0x1ef   : > { %2532 = vmatprep.subr.bf16.mxu1 %v3057_v31 }
 0x259   : > { %v2719_v41 = vpop.permute.xlu0 %2718 }
 0x25a   : > { %v2721_v42 = vunpack.i.h.bf16 %v2719_v41  ;;  %v2720_v43 = vunpack.i.l.bf16 %v2719_v41 }
 0x25c   : > { %v2533_v46 = vpack.c.bf16 %v2721_v42, %v2720_v43 }
 0x2bb   : > { %v1035_v45 = vpop.f32.mrb[0].mxu1 }
 0x2bc   : > { %v3527_v47 = vadd.f32 %v2280_v44, %v1035_v45  ;;  %v2405_v48 = vpop.f32.mrb[1].mxu1 }
 0x2be   : > { %1210 = vrot.lane.b32.xlu0 %v3527_v47, %s3060_s12  ;;  %2411 = vmatmul.mubr.msk.f32.vlgmr.msra.gmra.mrb[2].mxu1 %vm1043_vm3, %v3527_v47 }
 0x2bf   : > { %2535 = vmatpush3.bf16.xpose.msk.msra.mxu1 %vm3517_vm4, %v2533_v46  ;;  %2424 = vmatprep.mubr.msk.f32.mxu1 %vm3058_vm1, %v3059_v34 }
 0x2c0   : > { %2543 = vmatprep.subr.bf16.mxu1 %v3057_v31 }
 0x330   : > { %v1211_v49 = vpop.permute.xlu0 %1210 }
 0x331   : > { %2425 = vmatmul.mubr.msk.f32.vlgmr.msra.gmra.mrb[4].mxu1 %vm1043_vm3, %v1211_v49 }
 0x332   : > { %2445 = vmatprep.mubr.msk.f32.mxu1 %vm3058_vm1, %v3059_v34 }
 0x391   : > { %v1119_v50 = vpop.f32.mrb[2].mxu1 }
 0x392   : > { %v1123_v52 = vmul.f32 0.35355338, %v1119_v50  ;;  %v2412_v53 = vpop.f32.mrb[3].mxu1 }
 0x394   : > { %v1124_v54 = vadd.f32 %v1123_v52, %v3543_v51 }
 0x396   : > { %v1126_v55 = vsel %vm1125_vm6, %v1124_v54, -inf }
 0x397   : > { %1127 = vmax.xlane.f32.xlu1 %v1126_v55 }
 0x404   : > { %v1288_v56 = vpop.f32.mrb[4].mxu1 }
 0x405   : > { %v1292_v57 = vmul.f32 0.35355338, %v1288_v56  ;;  %v2426_v58 = vpop.f32.mrb[5].mxu1 }
 0x407   : > { %v1293_v59 = vadd.f32 %v1292_v57, %v3543_v51 }
 0x409   : > { %v1294_v60 = vsel %vm1125_vm6, %v1293_v59, -inf }
 0x40a   : > { %1295 = vmax.xlane.f32.xlu1 %v1294_v60 }
 0x41b   : > { %2723 = vrot.lane.b32.xlu1 %v3549_v63, %s3060_s12 }
 0x41f   : > { %2728 = vrot.lane.b32.xlu1 %v3502_v37, %s3061_s7 }
 0x424   : > { %v1128_v0 = vpop.xlane.xlu1 %1127 }
 0x425   : > { %v1129_v2 = vsub.f32 %v1124_v54, %v1128_v0 }
 0x427   : > { %v1130_v3 = vmul.f32 1.442695, %v1129_v2 }
 0x429   : > { %2747 = vpow2.f32 %v1130_v3 }
 0x433   : > { %v2748_v4 = vpop.eup %2747 }
 0x434   : > { %v1132_v5 = vsel %vm1125_vm6, %v2748_v4, 0.0 }
 0x435   : > { %1133 = vadd.xlane.f32.xlu0 %v1132_v5 }
 0x44b   : > { %2733 = vrot.lane.b32.xlu0 %v3549_v63, %s3061_s7 }
 0x497   : > { %v1296_v7 = vpop.xlane.xlu1 %1295 }
 0x498   : > { %v1297_v8 = vsub.f32 %v1293_v59, %v1296_v7 }
 0x49a   : > { %v1298_v9 = vmul.f32 1.442695, %v1297_v8 }
 0x49b   : > { %v2724_v13 = vpop.permute.xlu1 %2723 }
 0x49c   : > { %2749 = vpow2.f32 %v1298_v9  ;;  %v2726_v14 = vunpack.i.h.bf16 %v2724_v13  ;;  %v2725_v15 = vunpack.i.l.bf16 %v2724_v13  ;;  %v1754_v13 = vld [vmem:[#allocation12 + $0x10] sm:$0xff] }
 0x49e   : > { %v2537_v17 = vpack.c.bf16 %v2726_v14, %v2725_v15  ;;  %v1755_v15 = vld [vmem:[#allocation12 + $0x18] sm:$0xff] }
 0x49f   : > { %v2729_v19 = vpop.permute.xlu1 %2728 }
 0x4a0   : > { %v2731_v21 = vunpack.i.h.bf16 %v2729_v19  ;;  %v2730_v22 = vunpack.i.l.bf16 %v2729_v19 }
 0x4a2   : > { %v2540_v25 = vpack.c.bf16 %v2731_v21, %v2730_v22 }
 0x4a6   : > { %v2750_v10 = vpop.eup %2749 }
 0x4a7   : > { %v1300_v11 = vsel %vm1125_vm6, %v2750_v10, 0.0 }
 0x4a8   : > { %1301 = vadd.xlane.f32.xlu1 %v1300_v11 }
 0x4b9   : > { %1386 = vrot.lane.b32.xlu1 %v3527_v47, %s3061_s7  ;;  %s2068_s7 = sadd.s32 %s3809_s14, %s2307_s5 }
 0x4c2   : > { %v1134_v12 = vpop.xlane.xlu0 %1133 }
 0x4c3   : > { %2751 = vrcp.f32 %v1134_v12  ;;  %v1753_v12 = vld [vmem:[#allocation12 + $0x8] sm:$0xff] }
 0x4c6   : > { %v2734_v39 = vpop.permute.xlu0 %2733 }
 0x4c7   : > { %v2736_v41 = vunpack.i.h.bf16 %v2734_v39  ;;  %v2735_v42 = vunpack.i.l.bf16 %v2734_v39  ;;  %v1866_v39 = vld [vmem:[#allocation13 + $0x8] sm:$0xff] }
 0x4c9   : > { %v2544_v43 = vpack.c.bf16 %v2736_v41, %v2735_v42  ;;  %v1867_v42 = vld [vmem:[#allocation13 + $0x10] sm:$0xff] }
 0x4cb   : > { %2545 = vmatpush3.bf16.msra.mxu1 %v2544_v43  ;;  %v1868_v43 = vld [vmem:[#allocation13 + $0x18] sm:$0xff] }
 0x4cc   : > { %2546 = vmatprep.subr.bf16.mxu1 %v3057_v31 }
 0x4cd   : > { %v2752_v16 = vpop.eup %2751 }
 0x4ce   : > { %v1136_v18 = vmul.f32 %v2752_v16, %v2748_v4  ;;  %v2557_v16 = vpack.c.bf16 %v1755_v15, %v1754_v13 }
 0x4d0   : > { %2418 = vmatmul.mubr.msk.f32.vlgmr.msra.gmra.mrb[0].mxu0 %vm1125_vm6, %v1136_v18 }
 0x4d1   : > { %2538 = vmatpush3.bf16.msra.mxu0 %v2537_v17  ;;  %2431 = vmatprep.mubr.msk.f32.mxu0 %vm3058_vm1, %v3059_v34 }
 0x4d2   : > { %2539 = vmatprep.subr.bf16.mxu0 %v3057_v31 }
 0x535   : > { %v1302_v20 = vpop.xlane.xlu1 %1301 }
 0x536   : > { %2753 = vrcp.f32 %v1302_v20 }
 0x539   : > { %v1387_v26 = vpop.permute.xlu1 %1386 }
 0x540   : > { %v2754_v23 = vpop.eup %2753 }
 0x541   : > { %v1304_v24 = vmul.f32 %v2754_v23, %v2750_v10 }
 0x543   : > { %2432 = vmatmul.mubr.msk.f32.vlgmr.msra.gmra.mrb[2].mxu0 %vm1125_vm6, %v1304_v24 }
 0x544   : > { %2542 = vmatpush3.bf16.xpose.msk.msra.mxu0 %vm3517_vm4, %v2540_v25  ;;  %2438 = vmatprep.mubr.msk.f32.mxu0 %vm3058_vm1, %v3059_v34  ;;  %v2298_v25 = vld [vmem:[%s3803_s22] ss:$0 sm:$0xff] }
 0x545   : > { %2550 = vmatprep.subr.bf16.mxu0 %v3057_v31 }
 0x54b   : > { %2439 = vmatmul.mubr.msk.f32.vlgmr.msra.gmra.mrb[4].mxu0 %vm1043_vm3, %v1387_v26 }
 0x54c   : > { %2459 = vmatprep.mubr.msk.f32.mxu0 %vm3058_vm1, %v3059_v34 }
 0x5a3   : > { %v3573_v27 = vpop.f32.mrb[0].mxu0 }
 0x5a4   : > { %v2419_v28 = vpop.f32.mrb[1].mxu0 }
 0x616   : > { %v1382_v29 = vpop.f32.mrb[2].mxu0 }
 0x617   : > { %v2433_v30 = vpop.f32.mrb[3].mxu0 }
 0x61e   : > { %v1464_v32 = vpop.f32.mrb[4].mxu0 }
 0x61f   : > { %v1468_v33 = vmul.f32 0.35355338, %v1464_v32  ;;  %v2440_v35 = vpop.f32.mrb[5].mxu0 }
 0x621   : > { %v1469_v36 = vadd.f32 %v1468_v33, %v3543_v51 }
 0x623   : > { %v1470_v38 = vsel %vm1125_vm6, %v1469_v36, -inf }
 0x624   : > { %1471 = vmax.xlane.f32.xlu1 %v1470_v38 }
 0x6b1   : > { %v1472_v44 = vpop.xlane.xlu1 %1471 }
 0x6b2   : > { %v1473_v45 = vsub.f32 %v1469_v36, %v1472_v44  ;;  %v2563_v44 = vpack.c.bf16 %v1868_v43, %v1867_v42 }
 0x6b4   : > { %v1474_v46 = vmul.f32 1.442695, %v1473_v45  ;;  %v1951_v45 = vld [vmem:[%s3804_s3 + $0x8] sm:$0xff] }
 0x6b6   : > { %2755 = vpow2.f32 %v1474_v46  ;;  %v1952_v46 = vld [vmem:[%s3804_s3 + $0x10] sm:$0xff] }
 0x6c0   : > { %v2756_v48 = vpop.eup %2755 }
 0x6c1   : > { %v1476_v49 = vsel %vm1125_vm6, %v2756_v48, 0.0 }
 0x6c2   : > { %1477 = vadd.xlane.f32.xlu0 %v1476_v49  ;;  %v1953_v49 = vld [vmem:[%s3804_s3 + $0x18] sm:$0xff] }
 0x6d8   : > { %2738 = vrot.lane.b32.xlu0 %v3502_v37, %s3062_s10 }
 0x6dc   : > { %1560 = vrot.lane.b32.xlu0 %v3527_v47, %s3062_s10 }
 0x74f   : > { %v1478_v50 = vpop.xlane.xlu0 %1477 }
 0x750   : > { %2757 = vrcp.f32 %v1478_v50  ;;  %v2569_v50 = vpack.c.bf16 %v1953_v49, %v1952_v46 }
 0x753   : > { %v2739_v52 = vpop.permute.xlu0 %2738 }
 0x754   : > { %v2741_v53 = vunpack.i.h.bf16 %v2739_v52  ;;  %v2740_v54 = vunpack.i.l.bf16 %v2739_v52  ;;  %v1954_v52 = vld [vmem:[%s3804_s3 + $0x20] sm:$0xff] }
 0x756   : > { %v2547_v56 = vpack.c.bf16 %v2741_v53, %v2740_v54  ;;  %v1955_v53 = vld [vmem:[%s3804_s3 + $0x28] sm:$0xff] }
 0x757   : > { %v1561_v37 = vpop.permute.xlu0 %1560  ;;  %v2572_v54 = vpack.c.bf16 %v1955_v53, %v1954_v52 }
 0x75a   : > { %v2758_v55 = vpop.eup %2757 }
 0x75b   : > { %v1480_v57 = vmul.f32 %v2758_v55, %v2756_v48 }
 0x75d   : > { %2446 = vmatmul.mubr.msk.f32.vlgmr.msra.gmra.mrb[6].mxu1 %vm1125_vm6, %v1480_v57 }
 0x75e   : > { %2549 = vmatpush3.bf16.xpose.msk.msra.mxu1 %vm3517_vm4, %v2547_v56  ;;  %2452 = vmatprep.mubr.msk.f32.mxu1 %vm3058_vm1, %v3059_v34 }
 0x75f   : > { %2559 = vmatprep.subr.bf16.mxu1 %v3057_v31 }
 0x765   : > { %2453 = vmatmul.mubr.msk.f32.vlgmr.msra.gmra.mrb[8].mxu1 %vm1043_vm3, %v1561_v37 }
 0x766   : > { %2481 = vmatprep.mubr.msk.f32.mxu1 %vm3058_vm1, %v3059_v34 }
 0x830   : > { %v1556_v47 = vpop.f32.mrb[6].mxu1 }
 0x831   : > { %v2447_v58 = vpop.f32.mrb[7].mxu1 }
 0x838   : > { %v1638_v59 = vpop.f32.mrb[8].mxu1 }
 0x839   : > { %v1642_v60 = vmul.f32 0.35355338, %v1638_v59  ;;  %v2454_v61 = vpop.f32.mrb[9].mxu1  ;;  %v2301_v59 = vld [vmem:[%s3806_s9] ss:$0 sm:$0xff] }
 0x83b   : > { %v1643_v62 = vadd.f32 %v1642_v60, %v3543_v51 }
 0x83d   : > { %v1644_v40 = vsel %vm1125_vm6, %v1643_v62, -inf }
 0x83e   : > { %1645 = vmax.xlane.f32.xlu0 %v1644_v40 }
 0x8cb   : > { %v1646_v0 = vpop.xlane.xlu0 %1645 }
 0x8cc   : > { %v1647_v2 = vsub.f32 %v1643_v62, %v1646_v0  ;;  %v1957_v62 = vld [vmem:[%s3804_s3 + $0x38] sm:$0xff]  ;;  %v2302_v0 = vld [vmem:[%s3807_s23] ss:$0 sm:$0xff] }
 0x8ce   : > { %v1648_v3 = vmul.f32 1.442695, %v1647_v2 }
 0x8d0   : > { %2759 = vpow2.f32 %v1648_v3 }
 0x8da   : > { %v2760_v4 = vpop.eup %2759 }
 0x8db   : > { %v1650_v5 = vsel %vm1125_vm6, %v2760_v4, 0.0 }
 0x8dc   : > { %1651 = vadd.xlane.f32.xlu1 %v1650_v5 }
 0x8ed   : > { %2743 = vrot.lane.b32.xlu1 %v3549_v63, %s3062_s10  ;;  %v1752_v63 = vld [vmem:[#allocation12] sm:$0xff]  ;;  %s2308_s10 = sshll.u32 %s2068_s7, 7 }
 0x8ee   : > { %v2554_v14 = vpack.c.bf16 %v1753_v12, %v1752_v63  ;;  %s3666_s9 = scalar_lea.hbm %s3810_s24, %s2308_s10 }
 0x8f1   : > { %1735 = vrot.lane.b32.xlu1 %v1382_v29, %s3063_s30  ;;  %s2072_s30 = sshll.u32 %s3478_s2, 4  ;;  %s3668_s30 = int_to_ptr.vmem [resolvable:$true] %s2072_s30 }
 0x8f2   : > { %s2937_s22 = scalar_lea.vmem %s3668_s30, 128  ;;  %p2944_p1 = scmp.lt.s32.totalorder %s3668_s30, %s2942_s6 }
 0x8f3   : > { %p2938_p3 = scmp.ne.s32.totalorder %s3668_s30, %s2937_s22  ;;  %p2945_p5 = scmp.lt.s32.totalorder %s2943_s1, %s2937_s22 }
 0x8f5   : > { %1739 = vrot.lane.b32.xlu1 %v1556_v47, %s3064_s18  ;;  %s3805_s18 = sld [smem:[#allocation41_spill]]  ;;  %p2939_p9 = pnand %p2938_p3, %p3811_p2 }
 0x8f6   : > { %p2946_p11 = por %p2945_p5, %p2944_p1 }
 0x8f7   : > { %p2940_p10 = pneg %p2939_p9 }
 0x8f9   : > { %p2947_p13 = pnand %p2946_p11, %p2940_p10 }
 0x8fb   : > { %v2300_v47 = vld [vmem:[%s3805_s18] ss:$0 sm:$0xff] }
 0x969   : > { %v1652_v6 = vpop.xlane.xlu1 %1651 }
 0x96a   : > { %2761 = vrcp.f32 %v1652_v6  ;;  %v2304_v6 = vld [vmem:[%s3808_s16] ss:$0 sm:$0xff] }
 0x96d   : > { %v2744_v51 = vpop.permute.xlu1 %2743 }
 0x96e   : > { %v2746_v7 = vunpack.i.h.bf16 %v2744_v51  ;;  %v2745_v8 = vunpack.i.l.bf16 %v2744_v51 }
 0x970   : > { %v2551_v9 = vpack.c.bf16 %v2746_v7, %v2745_v8 }
 0x971   : > { %v1736_v19 = vpop.permute.xlu1 %1735 }
 0x972   : > { %2552 = vmatpush3.bf16.msra.mxu0 %v2551_v9  ;;  %v1746_v21 = vsel %vm1043_vm3, %v3573_v27, %v1736_v19 }
 0x973   : > { %2553 = vmatprep.subr.bf16.mxu0 %v3057_v31 }
 0x974   : > { %v2762_v10 = vpop.eup %2761 }
 0x975   : > { %v1654_v11 = vmul.f32 %v2762_v10, %v2760_v4  ;;  %v1740_v20 = vpop.permute.xlu1 %1739 }
 0x976   : > { %v1747_v22 = vsel %vm1125_vm6, %v1746_v21, %v1740_v20 }
 0x977   : > { %2460 = vmatmul.mubr.msk.f32.vlgmr.msra.gmra.mrb[6].mxu0 %vm1125_vm6, %v1654_v11 }
 0x978   : > { %2470 = vmatprep.mubr.msk.f32.mxu0 %vm3058_vm1, %v3059_v34  ;;  %2555 = vmatpush3.bf16.msra.mxu0 %v2554_v14 }
 0x979   : > { %2556 = vmatprep.subr.bf16.mxu0 %v3057_v31 }
 0x97c   : > { %2558 = vmatpush3.bf16.msra.mxu0 %v2557_v16 }
 0x97d   : > { %2565 = vmatprep.subr.bf16.mxu0 %v3057_v31 }
 0xa4a   : > { %v1730_v17 = vpop.f32.mrb[6].mxu0 }
 0xa4b   : > { %1743 = vrot.lane.b32.xlu1 %v1730_v17, %s3065_s13  ;;  %v2461_v18 = vpop.f32.mrb[7].mxu0 }
 0xabd   : > { %v1744_v23 = vpop.permute.xlu1 %1743 }
 0xabe   : > { %v1749_v24 = vsel %vm1748_vm7, %v1747_v22, %v1744_v23 }
 0xabf   : > { %2471 = vmatmul.mubr.msk.f32.vlgmr.msra.gmra.mrb[8].mxu0 %vm965_vm2, %v1749_v24 }
 0xac0   : > { %2500 = vmatprep.mubr.msk.f32.mxu0 %vm3058_vm1, %v3059_v34  ;;  %v1865_v34 = vld [vmem:[#allocation13] sm:$0xff] }
 0xac1   : > { %v2560_v41 = vpack.c.bf16 %v1866_v39, %v1865_v34 }
 0xac3   : > { %2561 = vmatpush3.bf16.msra.mxu1 %v2560_v41 }
 0xac4   : > { %2562 = vmatprep.subr.bf16.mxu1 %v3057_v31 }
 0xac7   : > { %2564 = vmatpush3.bf16.msra.mxu1 %v2563_v44 }
 0xb92   : > { %v1832_v26 = vpop.f32.mrb[8].mxu0 }
 0xb93   : > { %v1833_v28 = vadd.f32 %v2298_v25, %v1832_v26  ;;  %v2472_v29 = vpop.f32.mrb[9].mxu0 }
 0xb95   : > { %v1836_v30 = vadd.f32 %v1833_v28, %v3476_v1  ;;  %v1950_v1 = vld [vmem:[%s3804_s3] sm:$0xff] }
 0xb96   : > { %v2566_v48 = vpack.c.bf16 %v1951_v45, %v1950_v1 }
 0xb97   : > { %v1837_v27 = vsel %vm965_vm2, %v1836_v30, 0.0 }
 0xb98   : > { %1838 = vadd.xlane.f32.xlu0 %v1837_v27  ;;  %2567 = vmatpush3.bf16.msra.mxu0 %v2566_v48 }
 0xb99   : > { %2568 = vmatprep.subr.bf16.mxu0 %v3057_v31 }
 0xb9c   : > { %2570 = vmatpush3.bf16.msra.mxu0 %v2569_v50 }
 0xb9d   : > { %2571 = vmatprep.subr.bf16.mxu0 %v3057_v31 }
 0xba0   : > { %2573 = vmatpush3.bf16.msra.mxu0 %v2572_v54 }
 0xba1   : > { %2574 = vmatprep.subr.bf16.mxu0 %v3057_v31  ;;  %v1956_v31 = vld [vmem:[%s3804_s3 + $0x30] sm:$0xff] }
 0xba2   : > { %v2575_v40 = vpack.c.bf16 %v1957_v62, %v1956_v31 }
 0xba4   : > { %2576 = vmatpush3.bf16.msra.mxu0 %v2575_v40 }
 0xc25   : > { %v1839_v32 = vpop.xlane.xlu0 %1838 }
 0xc26   : > { %v1841_v33 = vmul.f32 0.03125, %v1839_v32 }
 0xc28   : > { %v1842_v35 = vsub.f32 %v1836_v30, %v1841_v33 }
 0xc2a   : > { %v1843_v36 = vmul.f32 %v1842_v35, %v1842_v35 }
 0xc2c   : > { %v1844_v38 = vsel %vm965_vm2, %v1843_v36, 0.0 }
 0xc2d   : > { %1845 = vadd.xlane.f32.xlu1 %v1844_v38 }
 0xcba   : > { %v1846_v55 = vpop.xlane.xlu1 %1845 }
 0xcbb   : > { %v1847_v56 = vmul.f32 0.03125, %v1846_v55 }
 0xcbd   : > { %v1848_v57 = vadd.f32 1e-12, %v1847_v56 }
 0xcbf   : > { %2763 = vrsqrt.f32 %v1848_v57 }
 0xcc9   : > { %v2764_v37 = vpop.eup %2763 }
 0xcca   : > { %v1850_v58 = vmul.f32 %v2764_v37, %v1842_v35 }
 0xccc   : > { %v1857_v60 = vmul.f32 %v2300_v47, %v1850_v58 }
 0xcce   : > { %v1864_v61 = vadd.f32 %v2301_v59, %v1857_v60 }
 0xcd0   : > { %2482 = vmatmul.mubr.msk.f32.vlgmr.msra.gmra.mrb[10].mxu1 %vm965_vm2, %v1864_v61 }
 0xda3   : > { %v1945_v2 = vpop.f32.mrb[10].mxu1 }
 0xda4   : > { %v1946_v3 = vadd.f32 %v2302_v0, %v1945_v2  ;;  %v2483_v4 = vpop.f32.mrb[11].mxu1 }
 0xda6   : > { %v1949_v5 = vmax.f32 %v1946_v3, 0.0 }
 0xda8   : > { %2501 = vmatmul.mubr.msk.f32.vlgmr.msra.gmra.mrb[10].mxu0 %vm1965_vm8, %v1949_v5 }
 0xe7b   : > { %v2035_v51 = vpop.f32.mrb[10].mxu0 }
 0xe7c   : > { %v2036_v7 = vadd.f32 %v2304_v6, %v2035_v51  ;;  %v2502_v8 = vpop.f32.mrb[11].mxu0 }
 0xe7e   : > { %v2039_v9 = vadd.f32 %v2036_v7, %v1864_v61 }
 0xe80   : > { %v2040_v10 = vsel %vm965_vm2, %v2039_v9, 0.0 }
 0xe81   : > { %2041 = vadd.xlane.f32.xlu0 %v2040_v10 }
 0xf0e   : > { %v2042_v11 = vpop.xlane.xlu0 %2041 }
 0xf0f   : > { %v2043_v63 = vmul.f32 0.03125, %v2042_v11 }
 0xf11   : > { %v2044_v12 = vsub.f32 %v2039_v9, %v2043_v63 }
 0xf13   : > { %v2045_v13 = vmul.f32 %v2044_v12, %v2044_v12 }
 0xf15   : > { %v2046_v14 = vsel %vm965_vm2, %v2045_v13, 0.0 }
 0xf16   : > { %2047 = vadd.xlane.f32.xlu0 %v2046_v14 }
 0xfa3   : > { %v2048_v15 = vpop.xlane.xlu0 %2047 }
 0xfa4   : > { %v2049_v16 = vmul.f32 0.03125, %v2048_v15 }
 0xfa6   : > { %v2050_v17 = vadd.f32 1e-12, %v2049_v16 }
 0xfa8   : > { %2765 = vrsqrt.f32 %v2050_v17 }
 0xfb2   : > { %v2766_v18 = vpop.eup %2765 }
 0xfb3   : > { %v2052_v19 = vmul.f32 %v2766_v18, %v2044_v12 }
 0xfb5   : > { %v2053_v20 = vmul.f32 %v2300_v47, %v2052_v19 }
 0xfb7   : > { %v2054_v21 = vadd.f32 %v2301_v59, %v2053_v20 }
 0xfb9   : > { %2055 = vst.msk [vmem:[%s3478_s2] sm:$0xff] %vm965_vm2, %v2054_v21 }
 0xfba   : > { %2950 = shalt.err (!%p2947_p13)
}
 0xfbb   : > { %s2951_s11 = scalar_lea.hbm %s3666_s9, 128  ;;  %s2955_s4 = scalar_lea.hbm %s3810_s24, 512 }
 0xfbc   : > { %p2952_p0 = scmp.ne.s32.totalorder %s3666_s9, %s2951_s11  ;;  %p2956_p4 = scmp.lt.u32.totalorder %s3666_s9, %s3810_s24 }
 0xfbd   : > { %p2957_p8 = scmp.lt.u32.totalorder %s2955_s4, %s2951_s11  ;;  %p2959_p3 = scmp.lt.u32.totalorder %s2951_s11, %s3666_s9 }
 0xfbe   : > { %p2953_p12 = pnand %p2952_p0, %p3811_p2 }
 0xfbf   : > { %p2958_p7 = por %p2957_p8, %p2956_p4 }
 0xfc0   : > { %p2954_p6 = pneg %p2953_p12 }
 0xfc1   : > { %p2960_p9 = por %p2959_p3, %p2958_p7 }
 0xfc3   : > { %p2961_p10 = pnand %p2960_p9, %p2954_p6 }
 0xfc5   : > { %2964 = shalt.err (!%p2961_p10)
}
 0xfc6   : > { %2599 = dma.vmem_to_hbm [thread:$0]  (%p3811_p2), %s3668_s30, 128, %s3666_s9, %s2057_s0  }
 0xfc7 PF: > { %p2636_p1 = scmp.ge.s32.totalorder %s3047_s20, 2  ;;  %s2084_s12 = sand.u32 1, %s3019_s27  }
 0xfc8   : > { %p3812_p5 = scmp.ne.s32.totalorder %s3789_s26, 0  ;;  %s2085_s16 = scalar_lea.sflag [#allocation6], %s2084_s12 }
 0xfca   : > { %p2622_p11 = pnand %p2636_p1, %p3812_p5 }
 0xfcc   : > { %3014 = dma.done.wait (!%p2622_p11), %s2085_s16, 128  }
 0xfcd   : > { %3016 = vsyncadd (!%p2622_p11), %s2085_s16, 4294967168  ;;  %s37_s20 = sadd.s32 1, %s3047_s20   ;;  %s3813_s0 = sld [smem:[#allocation22_spill]] }
 0xfce   : > { %p34_p13 = scmp.ge.s32.totalorder %s37_s20, 6   ;;  %s3814_s17 = sld [smem:[#allocation23_spill]] }
 0xfcf   : > { %s3815_s1 = sld [smem:[#allocation24_spill]]  ;;  %s3816_s27 = smov %s3023_s28 }
 0xfd0   : > { %s3817_s28 = smov %s3027_s29  ;;  %s3818_s29 = smov %s3392_s21 }
 0xfd1   : > { %s3819_s30 = smov %s3039_s19  ;;  %36 = sbr.rel (!%p34_p13) target bundleno = 30 (0x1e), region = 170 }
 0xfd4   : > { %s3820_s19 = smov %s3814_s17 }
 0xfd8   :  { %2090 = vsyncpa [#allocation5], 1 }
 0xfd9   :  { %2092 = vsyncpa [#allocation5 + $0x1], 1 }
 0xfda   :  { %2093 = vsyncpa [#allocation8], 1 }
 0xfdb   :  { %2094 = vsyncpa [#allocation11], 1 }
 0xfdc   :  { %2095 = vsyncpa [#allocation14], 1 }
 0xfdd   :  { %2096 = vsyncpa [#allocation6], 1 }
 0xfde   :  { %2098 = vsyncpa [#allocation6 + $0x1], 1 }

</bundles_post_ra>
